<compile_context>
chip_gen: v7x
topology: tpu7x:2x2x1
jax: 0.10.0
libtpu: 0.0.40
codegen_flags: <defaults>
</compile_context>

<pallas_src>
import functools

import jax
import jax.numpy as jnp
from jax.experimental import pallas as pl
from jax.experimental.pallas import tpu as pltpu

NUM_GROUPS = 32  # nn.GroupNorm(32, n_classes)
EPS = 1e-5       # nn.GroupNorm default eps


# ------------------------------ Pallas kernel -------------------------------

def _conv3x3_gn_relu_kernel(xp_ref, w_ref, p_ref, g_ref, b_ref, o_ref,
                            *, H, W, cs, eps):
    """Fused Conv3x3 (no bias) + GroupNorm + ReLU for one (image, channel tile).

    xp_ref: (1, H+2, W+2, Cin)  bf16  zero-padded input image
    w_ref : (9, Cin, Ct)        bf16  conv taps, t = kh*3 + kw
    p_ref : (Ct, Ct)            f32   block-diagonal group projection (ones)
    g_ref : (1, Ct)             f32   GroupNorm gamma (this channel tile)
    b_ref : (1, Ct)             f32   GroupNorm beta  (this channel tile)
    o_ref : (1, H*W, Ct)        f32   output
    """
    cin = xp_ref.shape[-1]
    ct = o_ref.shape[-1]

    # --- 3x3 conv: 9 shifted matmuls accumulated in f32 (no HBM im2col) ----
    acc = jnp.zeros((H * W, ct), jnp.float32)
    for t in range(9):
        kh, kw = t // 3, t % 3
        tap = xp_ref[0, pl.ds(kh, H), pl.ds(kw, W), :].reshape(H * W, cin)
        acc = acc + jnp.dot(tap, w_ref[t], preferred_element_type=jnp.float32)

    # --- GroupNorm (two-pass: mean, then centered variance) + ReLU ---------
    inv_n = 1.0 / float(H * W * cs)                       # 1 / (HW * group_size)
    s = jnp.sum(acc, axis=0, keepdims=True)               # per-channel sums (1, Ct)
    if cs == 1:
        # groups == channels: the group projection is the identity -> skip it.
        mean_c = s * inv_n
    else:
        mean_c = jnp.dot(s, p_ref[...],
                         preferred_element_type=jnp.float32) * inv_n
    centered = acc - mean_c
    sq = jnp.sum(centered * centered, axis=0, keepdims=True)
    if cs == 1:
        var_c = sq * inv_n
    else:
        var_c = jnp.dot(sq, p_ref[...],
                        preferred_element_type=jnp.float32) * inv_n
    y = centered * (jax.lax.rsqrt(var_c + eps) * g_ref[...]) + b_ref[...]
    o_ref[...] = jnp.maximum(y, 0.0).reshape(1, H * W, ct)


# --------------------------- pallas_call wrapper -----------------------------

def _pick_channel_tile(cout, cs):
    # Largest output-channel tile <= 128 that divides cout and keeps whole
    # GroupNorm groups inside one tile (multiple of the group size cs).
    for cand in range(min(cout, 128), 0, -1):
        if cout % cand == 0 and cand % cs == 0:
            return cand
    return cout


def conv3x3_gn_relu(x, w, gamma, beta, *, num_groups=NUM_GROUPS, eps=EPS,
                    upsample=False):
    """x: (N, H, W, Cin) f32 NHWC; w: (3, 3, Cin, Cout) f32 (HWIO layout)."""
    N, H, W, cin = x.shape
    cout = w.shape[-1]
    assert cout % num_groups == 0, (cout, num_groups)
    cs = cout // num_groups                    # channels per group
    ct = _pick_channel_tile(cout, cs)          # output-channel tile

    # bf16 at the MXU boundary (halves HBM traffic / doubles MXU throughput);
    # zero padding is exact in bf16.
    xp = jnp.pad(x.astype(jnp.bfloat16), ((0, 0), (1, 1), (1, 1), (0, 0)))
    wt = w.astype(jnp.bfloat16).reshape(9, cin, cout)
    gid = jnp.arange(ct) // cs
    p = (gid[:, None] == gid[None, :]).astype(jnp.float32)        # (ct, ct)

    kern = functools.partial(_conv3x3_gn_relu_kernel, H=H, W=W, cs=cs, eps=eps)
    y = pl.pallas_call(
        kern,
        out_shape=jax.ShapeDtypeStruct((N, H * W, cout), jnp.float32),
        grid=(N, cout // ct),
        in_specs=[
            pl.BlockSpec((1, H + 2, W + 2, cin), lambda n, c: (n, 0, 0, 0)),
            pl.BlockSpec((9, cin, ct), lambda n, c: (0, 0, c)),
            pl.BlockSpec((ct, ct), lambda n, c: (0, 0)),
            pl.BlockSpec((1, ct), lambda n, c: (0, c)),
            pl.BlockSpec((1, ct), lambda n, c: (0, c)),
        ],
        out_specs=pl.BlockSpec((1, H * W, ct), lambda n, c: (n, 0, c)),
        compiler_params=pltpu.CompilerParams(
            # megacore sharding on v7x; each (image, channel-tile) is independent
            dimension_semantics=("parallel", "parallel"),
            # per-step footprint is a few MiB -> well inside v7x's 32 MiB scoped VMEM
            vmem_limit_bytes=32 * 1024 * 1024),
    )(xp, wt, p,
      gamma.reshape(1, cout).astype(jnp.float32),
      beta.reshape(1, cout).astype(jnp.float32))

    y = y.reshape(N, H, W, cout)
    if upsample:
        # TODO(synk): fuse the 2x bilinear (align_corners=True) upsample into the
        # kernel's store path (lerp on the VMEM tile) to save one more HBM round
        # trip per upsampled block.
        y = bilinear_up2_align_corners(y)
    return y


# ------------------------------- JAX glue ------------------------------------

def bilinear_up2_align_corners(x):
    # F.interpolate(scale_factor=2, mode='bilinear', align_corners=True), NHWC.
    N, H, W, C = x.shape

    def idx(n_in, n_out):
        if n_in == 1:
            z = jnp.zeros((n_out,), jnp.int32)
            return z, z, jnp.zeros((n_out,), jnp.float32)
        pos = jnp.arange(n_out, dtype=jnp.float32) * ((n_in - 1) / (n_out - 1))
        lo = jnp.floor(pos).astype(jnp.int32)
        hi = jnp.minimum(lo + 1, n_in - 1)
        return lo, hi, pos - lo.astype(jnp.float32)

    hl, hh, hf = idx(H, 2 * H)
    wl, wh, wf = idx(W, 2 * W)
    xh = (x[:, hl] * (1.0 - hf)[None, :, None, None]
          + x[:, hh] * hf[None, :, None, None])
    y = (xh[:, :, wl] * (1.0 - wf)[None, None, :, None]
         + xh[:, :, wh] * wf[None, None, :, None])
    return y


# --------------------------- SegmentationBlock -------------------------------

def _upsample_flags(n_upsamples):
    n_blocks = max(n_upsamples, 1)
    return tuple([bool(n_upsamples)] + [True] * (n_blocks - 1))


def init_params(key, n_channels, n_classes, n_upsamples):
    assert n_classes % NUM_GROUPS == 0
    n_blocks = max(n_upsamples, 1)
    keys = jax.random.split(key, 3 * n_blocks)
    blocks = []
    cin = n_channels
    for i in range(n_blocks):
        kw_, kg, kb = keys[3 * i], keys[3 * i + 1], keys[3 * i + 2]
        w = jax.random.normal(kw_, (3, 3, cin, n_classes), jnp.float32) * 0.05
        gamma = 1.0 + 0.1 * jax.random.normal(kg, (n_classes,), jnp.float32)
        beta = 0.1 * jax.random.normal(kb, (n_classes,), jnp.float32)
        blocks.append((w, gamma, beta))
        cin = n_classes
    return {'blocks': tuple(blocks)}


def segmentation_block_forward(params, x_nchw, n_upsamples):
    # PyTorch NCHW in / NCHW out; kernels run channels-last (NHWC).
    x = jnp.transpose(x_nchw, (0, 2, 3, 1)).astype(jnp.float32)
    for (w, gamma, beta), up in zip(params['blocks'], _upsample_flags(n_upsamples)):
        x = conv3x3_gn_relu(x, w, gamma, beta, upsample=up)
    return jnp.transpose(x, (0, 3, 1, 2))


# ------------------------- pure-JAX reference (check) ------------------------

def _reference_block(x, w, gamma, beta, *, num_groups, eps, upsample):
    # Same bf16 quantisation of matmul inputs as the kernel (bf16 products are
    # exact in f32), everything else in f32.
    xq = x.astype(jnp.bfloat16).astype(jnp.float32)
    wq = w.astype(jnp.bfloat16).astype(jnp.float32)
    y = jax.lax.conv_general_dilated(
        xq, wq, window_strides=(1, 1), padding=((1, 1), (1, 1)),
        dimension_numbers=('NHWC', 'HWIO', 'NHWC'),
        precision=jax.lax.Precision.HIGHEST)
    N, H, W, C = y.shape
    cs = C // num_groups
    yg = y.reshape(N, H, W, num_groups, cs)
    mean = jnp.mean(yg, axis=(1, 2, 4), keepdims=True)
    var = jnp.mean((yg - mean) ** 2, axis=(1, 2, 4), keepdims=True)
    yn = ((yg - mean) * jax.lax.rsqrt(var + eps)).reshape(N, H, W, C)
    y = jnp.maximum(yn * gamma.reshape(1, 1, 1, C) + beta.reshape(1, 1, 1, C), 0.0)
    if upsample:
        y = bilinear_up2_align_corners(y)
    return y


def segmentation_block_reference(params, x_nchw, n_upsamples):
    x = jnp.transpose(x_nchw, (0, 2, 3, 1)).astype(jnp.float32)
    for (w, gamma, beta), up in zip(params['blocks'], _upsample_flags(n_upsamples)):
        x = _reference_block(x, w, gamma, beta, num_groups=NUM_GROUPS,
                             eps=EPS, upsample=up)
    return jnp.transpose(x, (0, 3, 1, 2))


# ----------------------------------- main -------------------------------------

if __name__ == "__main__":
    key = jax.random.PRNGKey(0)
    kp, kx = jax.random.split(key)

    # Small but hardware-friendly shapes: GroupNorm(32, C) forces C % 32 == 0,
    # and n_classes = 128 keeps every output store lane-dense.
    N, C_IN, H, W = 2, 64, 16, 16
    N_CLASSES, N_UPSAMPLES = 128, 2

    x = jax.random.normal(kx, (N, C_IN, H, W), jnp.float32)
    params = init_params(kp, C_IN, N_CLASSES, N_UPSAMPLES)

    out = segmentation_block_forward(params, x, N_UPSAMPLES)
    out = jax.block_until_ready(out)

    scale = 2 ** N_UPSAMPLES
    assert out.shape == (N, N_CLASSES, H * scale, W * scale), out.shape
    assert bool(jnp.all(jnp.isfinite(out)))

    ref = segmentation_block_reference(params, x, N_UPSAMPLES)
    assert bool(jnp.allclose(out, ref, atol=2e-3, rtol=2e-3)), \
        float(jnp.max(jnp.abs(out - ref)))

    print("KERNEL_OK")
</pallas_src>

<mosaic_0001>
module attributes {stable_mosaic.version = 11 : i64} {
  func.func @_conv3x3_gn_relu_kernel(%arg0: i32, %arg1: i32, %arg2: memref<1x18x18x64xbf16, #tpu.memory_space<vmem>>, %arg3: memref<9x64x128xbf16, #tpu.memory_space<vmem>>, %arg4: memref<128x128xf32, #tpu.memory_space<vmem>>, %arg5: memref<1x128xf32, #tpu.memory_space<vmem>>, %arg6: memref<1x128xf32, #tpu.memory_space<vmem>>, %arg7: memref<1x256x128xf32, #tpu.memory_space<vmem>>) attributes {dimension_semantics = [#tpu.dimension_semantics<parallel>, #tpu.dimension_semantics<parallel>], iteration_bounds = array<i64: 2, 1>, scalar_prefetch = 0 : i64, scratch_operands = 0 : i64, tpu.core_type = #tpu.core_type<tc>, window_params = [{transform_indices = @transform_0, window_bounds = array<i64: 1, 18, 18, 64>}, {transform_indices = @transform_1, window_bounds = array<i64: 9, 64, 128>}, {pipeline_mode = #tpu.pipeline_mode<synchronous>, transform_indices = @transform_2, window_bounds = array<i64: 128, 128>}, {transform_indices = @transform_3, window_bounds = array<i64: 1, 128>}, {transform_indices = @transform_4, window_bounds = array<i64: 1, 128>}, {transform_indices = @transform_5, window_bounds = array<i64: 1, 256, 128>}]} {
    %cst = arith.constant 0.000000e+00 : f32
    %0 = vector.broadcast %cst : f32 to vector<256x128xf32>
    %c0 = arith.constant 0 : index
    %c0_0 = arith.constant 0 : index
    %c0_1 = arith.constant 0 : index
    %c0_2 = arith.constant 0 : index
    %1 = vector.load %arg2[%c0, %c0_0, %c0_1, %c0_2] : memref<1x18x18x64xbf16, #tpu.memory_space<vmem>>, vector<1x16x16x64xbf16>
    %2 = vector.shape_cast %1 : vector<1x16x16x64xbf16> to vector<16x16x64xbf16>
    %3 = vector.shape_cast %2 : vector<16x16x64xbf16> to vector<256x64xbf16>
    %c0_3 = arith.constant 0 : index
    %c0_4 = arith.constant 0 : index
    %c0_5 = arith.constant 0 : index
    %4 = vector.load %arg3[%c0_3, %c0_4, %c0_5] : memref<9x64x128xbf16, #tpu.memory_space<vmem>>, vector<1x64x128xbf16>
    %5 = vector.shape_cast %4 : vector<1x64x128xbf16> to vector<64x128xbf16>
    %cst_6 = arith.constant dense<0.000000e+00> : vector<256x128xf32>
    %6 = tpu.matmul %3, %5, %cst_6 {dimension_numbers = #tpu.dot_dimension_numbers<[1], [0], [0], [1], [0, 0, 1, 1], [], []>} : vector<256x64xbf16>, vector<64x128xbf16>, vector<256x128xf32> -> vector<256x128xf32>
    %7 = arith.addf %0, %6 : vector<256x128xf32>
    %c0_7 = arith.constant 0 : index
    %c0_8 = arith.constant 0 : index
    %c1 = arith.constant 1 : index
    %c0_9 = arith.constant 0 : index
    %8 = vector.load %arg2[%c0_7, %c0_8, %c1, %c0_9] : memref<1x18x18x64xbf16, #tpu.memory_space<vmem>>, vector<1x16x16x64xbf16>
    %9 = vector.shape_cast %8 : vector<1x16x16x64xbf16> to vector<16x16x64xbf16>
    %10 = vector.shape_cast %9 : vector<16x16x64xbf16> to vector<256x64xbf16>
    %c1_10 = arith.constant 1 : index
    %c0_11 = arith.constant 0 : index
    %c0_12 = arith.constant 0 : index
    %11 = vector.load %arg3[%c1_10, %c0_11, %c0_12] : memref<9x64x128xbf16, #tpu.memory_space<vmem>>, vector<1x64x128xbf16>
    %12 = vector.shape_cast %11 : vector<1x64x128xbf16> to vector<64x128xbf16>
    %cst_13 = arith.constant dense<0.000000e+00> : vector<256x128xf32>
    %13 = tpu.matmul %10, %12, %cst_13 {dimension_numbers = #tpu.dot_dimension_numbers<[1], [0], [0], [1], [0, 0, 1, 1], [], []>} : vector<256x64xbf16>, vector<64x128xbf16>, vector<256x128xf32> -> vector<256x128xf32>
    %14 = arith.addf %7, %13 : vector<256x128xf32>
    %c0_14 = arith.constant 0 : index
    %c0_15 = arith.constant 0 : index
    %c2 = arith.constant 2 : index
    %c0_16 = arith.constant 0 : index
    %15 = vector.load %arg2[%c0_14, %c0_15, %c2, %c0_16] : memref<1x18x18x64xbf16, #tpu.memory_space<vmem>>, vector<1x16x16x64xbf16>
    %16 = vector.shape_cast %15 : vector<1x16x16x64xbf16> to vector<16x16x64xbf16>
    %17 = vector.shape_cast %16 : vector<16x16x64xbf16> to vector<256x64xbf16>
    %c2_17 = arith.constant 2 : index
    %c0_18 = arith.constant 0 : index
    %c0_19 = arith.constant 0 : index
    %18 = vector.load %arg3[%c2_17, %c0_18, %c0_19] : memref<9x64x128xbf16, #tpu.memory_space<vmem>>, vector<1x64x128xbf16>
    %19 = vector.shape_cast %18 : vector<1x64x128xbf16> to vector<64x128xbf16>
    %cst_20 = arith.constant dense<0.000000e+00> : vector<256x128xf32>
    %20 = tpu.matmul %17, %19, %cst_20 {dimension_numbers = #tpu.dot_dimension_numbers<[1], [0], [0], [1], [0, 0, 1, 1], [], []>} : vector<256x64xbf16>, vector<64x128xbf16>, vector<256x128xf32> -> vector<256x128xf32>
    %21 = arith.addf %14, %20 : vector<256x128xf32>
    %c0_21 = arith.constant 0 : index
    %c1_22 = arith.constant 1 : index
    %c0_23 = arith.constant 0 : index
    %c0_24 = arith.constant 0 : index
    %22 = vector.load %arg2[%c0_21, %c1_22, %c0_23, %c0_24] : memref<1x18x18x64xbf16, #tpu.memory_space<vmem>>, vector<1x16x16x64xbf16>
    %23 = vector.shape_cast %22 : vector<1x16x16x64xbf16> to vector<16x16x64xbf16>
    %24 = vector.shape_cast %23 : vector<16x16x64xbf16> to vector<256x64xbf16>
    %c3 = arith.constant 3 : index
    %c0_25 = arith.constant 0 : index
    %c0_26 = arith.constant 0 : index
    %25 = vector.load %arg3[%c3, %c0_25, %c0_26] : memref<9x64x128xbf16, #tpu.memory_space<vmem>>, vector<1x64x128xbf16>
    %26 = vector.shape_cast %25 : vector<1x64x128xbf16> to vector<64x128xbf16>
    %cst_27 = arith.constant dense<0.000000e+00> : vector<256x128xf32>
    %27 = tpu.matmul %24, %26, %cst_27 {dimension_numbers = #tpu.dot_dimension_numbers<[1], [0], [0], [1], [0, 0, 1, 1], [], []>} : vector<256x64xbf16>, vector<64x128xbf16>, vector<256x128xf32> -> vector<256x128xf32>
    %28 = arith.addf %21, %27 : vector<256x128xf32>
    %c0_28 = arith.constant 0 : index
    %c1_29 = arith.constant 1 : index
    %c1_30 = arith.constant 1 : index
    %c0_31 = arith.constant 0 : index
    %29 = vector.load %arg2[%c0_28, %c1_29, %c1_30, %c0_31] : memref<1x18x18x64xbf16, #tpu.memory_space<vmem>>, vector<1x16x16x64xbf16>
    %30 = vector.shape_cast %29 : vector<1x16x16x64xbf16> to vector<16x16x64xbf16>
    %31 = vector.shape_cast %30 : vector<16x16x64xbf16> to vector<256x64xbf16>
    %c4 = arith.constant 4 : index
    %c0_32 = arith.constant 0 : index
    %c0_33 = arith.constant 0 : index
    %32 = vector.load %arg3[%c4, %c0_32, %c0_33] : memref<9x64x128xbf16, #tpu.memory_space<vmem>>, vector<1x64x128xbf16>
    %33 = vector.shape_cast %32 : vector<1x64x128xbf16> to vector<64x128xbf16>
    %cst_34 = arith.constant dense<0.000000e+00> : vector<256x128xf32>
    %34 = tpu.matmul %31, %33, %cst_34 {dimension_numbers = #tpu.dot_dimension_numbers<[1], [0], [0], [1], [0, 0, 1, 1], [], []>} : vector<256x64xbf16>, vector<64x128xbf16>, vector<256x128xf32> -> vector<256x128xf32>
    %35 = arith.addf %28, %34 : vector<256x128xf32>
    %c0_35 = arith.constant 0 : index
    %c1_36 = arith.constant 1 : index
    %c2_37 = arith.constant 2 : index
    %c0_38 = arith.constant 0 : index
    %36 = vector.load %arg2[%c0_35, %c1_36, %c2_37, %c0_38] : memref<1x18x18x64xbf16, #tpu.memory_space<vmem>>, vector<1x16x16x64xbf16>
    %37 = vector.shape_cast %36 : vector<1x16x16x64xbf16> to vector<16x16x64xbf16>
    %38 = vector.shape_cast %37 : vector<16x16x64xbf16> to vector<256x64xbf16>
    %c5 = arith.constant 5 : index
    %c0_39 = arith.constant 0 : index
    %c0_40 = arith.constant 0 : index
    %39 = vector.load %arg3[%c5, %c0_39, %c0_40] : memref<9x64x128xbf16, #tpu.memory_space<vmem>>, vector<1x64x128xbf16>
    %40 = vector.shape_cast %39 : vector<1x64x128xbf16> to vector<64x128xbf16>
    %cst_41 = arith.constant dense<0.000000e+00> : vector<256x128xf32>
    %41 = tpu.matmul %38, %40, %cst_41 {dimension_numbers = #tpu.dot_dimension_numbers<[1], [0], [0], [1], [0, 0, 1, 1], [], []>} : vector<256x64xbf16>, vector<64x128xbf16>, vector<256x128xf32> -> vector<256x128xf32>
    %42 = arith.addf %35, %41 : vector<256x128xf32>
    %c0_42 = arith.constant 0 : index
    %c2_43 = arith.constant 2 : index
    %c0_44 = arith.constant 0 : index
    %c0_45 = arith.constant 0 : index
    %43 = vector.load %arg2[%c0_42, %c2_43, %c0_44, %c0_45] : memref<1x18x18x64xbf16, #tpu.memory_space<vmem>>, vector<1x16x16x64xbf16>
    %44 = vector.shape_cast %43 : vector<1x16x16x64xbf16> to vector<16x16x64xbf16>
    %45 = vector.shape_cast %44 : vector<16x16x64xbf16> to vector<256x64xbf16>
    %c6 = arith.constant 6 : index
    %c0_46 = arith.constant 0 : index
    %c0_47 = arith.constant 0 : index
    %46 = vector.load %arg3[%c6, %c0_46, %c0_47] : memref<9x64x128xbf16, #tpu.memory_space<vmem>>, vector<1x64x128xbf16>
    %47 = vector.shape_cast %46 : vector<1x64x128xbf16> to vector<64x128xbf16>
    %cst_48 = arith.constant dense<0.000000e+00> : vector<256x128xf32>
    %48 = tpu.matmul %45, %47, %cst_48 {dimension_numbers = #tpu.dot_dimension_numbers<[1], [0], [0], [1], [0, 0, 1, 1], [], []>} : vector<256x64xbf16>, vector<64x128xbf16>, vector<256x128xf32> -> vector<256x128xf32>
    %49 = arith.addf %42, %48 : vector<256x128xf32>
    %c0_49 = arith.constant 0 : index
    %c2_50 = arith.constant 2 : index
    %c1_51 = arith.constant 1 : index
    %c0_52 = arith.constant 0 : index
    %50 = vector.load %arg2[%c0_49, %c2_50, %c1_51, %c0_52] : memref<1x18x18x64xbf16, #tpu.memory_space<vmem>>, vector<1x16x16x64xbf16>
    %51 = vector.shape_cast %50 : vector<1x16x16x64xbf16> to vector<16x16x64xbf16>
    %52 = vector.shape_cast %51 : vector<16x16x64xbf16> to vector<256x64xbf16>
    %c7 = arith.constant 7 : index
    %c0_53 = arith.constant 0 : index
    %c0_54 = arith.constant 0 : index
    %53 = vector.load %arg3[%c7, %c0_53, %c0_54] : memref<9x64x128xbf16, #tpu.memory_space<vmem>>, vector<1x64x128xbf16>
    %54 = vector.shape_cast %53 : vector<1x64x128xbf16> to vector<64x128xbf16>
    %cst_55 = arith.constant dense<0.000000e+00> : vector<256x128xf32>
    %55 = tpu.matmul %52, %54, %cst_55 {dimension_numbers = #tpu.dot_dimension_numbers<[1], [0], [0], [1], [0, 0, 1, 1], [], []>} : vector<256x64xbf16>, vector<64x128xbf16>, vector<256x128xf32> -> vector<256x128xf32>
    %56 = arith.addf %49, %55 : vector<256x128xf32>
    %c0_56 = arith.constant 0 : index
    %c2_57 = arith.constant 2 : index
    %c2_58 = arith.constant 2 : index
    %c0_59 = arith.constant 0 : index
    %57 = vector.load %arg2[%c0_56, %c2_57, %c2_58, %c0_59] : memref<1x18x18x64xbf16, #tpu.memory_space<vmem>>, vector<1x16x16x64xbf16>
    %58 = vector.shape_cast %57 : vector<1x16x16x64xbf16> to vector<16x16x64xbf16>
    %59 = vector.shape_cast %58 : vector<16x16x64xbf16> to vector<256x64xbf16>
    %c8 = arith.constant 8 : index
    %c0_60 = arith.constant 0 : index
    %c0_61 = arith.constant 0 : index
    %60 = vector.load %arg3[%c8, %c0_60, %c0_61] : memref<9x64x128xbf16, #tpu.memory_space<vmem>>, vector<1x64x128xbf16>
    %61 = vector.shape_cast %60 : vector<1x64x128xbf16> to vector<64x128xbf16>
    %cst_62 = arith.constant dense<0.000000e+00> : vector<256x128xf32>
    %62 = tpu.matmul %59, %61, %cst_62 {dimension_numbers = #tpu.dot_dimension_numbers<[1], [0], [0], [1], [0, 0, 1, 1], [], []>} : vector<256x64xbf16>, vector<64x128xbf16>, vector<256x128xf32> -> vector<256x128xf32>
    %63 = arith.addf %56, %62 : vector<256x128xf32>
    %cst_63 = arith.constant dense<0.000000e+00> : vector<128xf32>
    %64 = vector.multi_reduction <add>, %63, %cst_63 [0] : vector<256x128xf32> to vector<128xf32>
    %65 = vector.shape_cast %64 : vector<128xf32> to vector<1x128xf32>
    %c0_64 = arith.constant 0 : index
    %c0_65 = arith.constant 0 : index
    %66 = vector.load %arg4[%c0_64, %c0_65] : memref<128x128xf32, #tpu.memory_space<vmem>>, vector<128x128xf32>
    %cst_66 = arith.constant dense<0.000000e+00> : vector<1x128xf32>
    %67 = tpu.matmul %65, %66, %cst_66 {dimension_numbers = #tpu.dot_dimension_numbers<[1], [0], [0], [1], [0, 0, 1, 1], [], []>} : vector<1x128xf32>, vector<128x128xf32>, vector<1x128xf32> -> vector<1x128xf32>
    %cst_67 = arith.constant 9.765625E-4 : f32
    %68 = vector.broadcast %cst_67 : f32 to vector<1x128xf32>
    %69 = arith.mulf %67, %68 : vector<1x128xf32>
    %70 = vector.broadcast %69 : vector<1x128xf32> to vector<256x128xf32>
    %71 = arith.subf %63, %70 : vector<256x128xf32>
    %72 = arith.mulf %71, %71 : vector<256x128xf32>
    %cst_68 = arith.constant dense<0.000000e+00> : vector<128xf32>
    %73 = vector.multi_reduction <add>, %72, %cst_68 [0] : vector<256x128xf32> to vector<128xf32>
    %74 = vector.shape_cast %73 : vector<128xf32> to vector<1x128xf32>
    %c0_69 = arith.constant 0 : index
    %c0_70 = arith.constant 0 : index
    %75 = vector.load %arg4[%c0_69, %c0_70] : memref<128x128xf32, #tpu.memory_space<vmem>>, vector<128x128xf32>
    %cst_71 = arith.constant dense<0.000000e+00> : vector<1x128xf32>
    %76 = tpu.matmul %74, %75, %cst_71 {dimension_numbers = #tpu.dot_dimension_numbers<[1], [0], [0], [1], [0, 0, 1, 1], [], []>} : vector<1x128xf32>, vector<128x128xf32>, vector<1x128xf32> -> vector<1x128xf32>
    %cst_72 = arith.constant 9.765625E-4 : f32
    %77 = vector.broadcast %cst_72 : f32 to vector<1x128xf32>
    %78 = arith.mulf %76, %77 : vector<1x128xf32>
    %cst_73 = arith.constant 9.99999974E-6 : f32
    %79 = vector.broadcast %cst_73 : f32 to vector<1x128xf32>
    %80 = arith.addf %78, %79 : vector<1x128xf32>
    %81 = math.rsqrt %80 : vector<1x128xf32>
    %c0_74 = arith.constant 0 : index
    %c0_75 = arith.constant 0 : index
    %82 = vector.load %arg5[%c0_74, %c0_75] : memref<1x128xf32, #tpu.memory_space<vmem>>, vector<1x128xf32>
    %83 = arith.mulf %81, %82 : vector<1x128xf32>
    %84 = vector.broadcast %83 : vector<1x128xf32> to vector<256x128xf32>
    %85 = arith.mulf %71, %84 : vector<256x128xf32>
    %c0_76 = arith.constant 0 : index
    %c0_77 = arith.constant 0 : index
    %86 = vector.load %arg6[%c0_76, %c0_77] : memref<1x128xf32, #tpu.memory_space<vmem>>, vector<1x128xf32>
    %87 = vector.broadcast %86 : vector<1x128xf32> to vector<256x128xf32>
    %88 = arith.addf %85, %87 : vector<256x128xf32>
    %cst_78 = arith.constant 0.000000e+00 : f32
    %89 = vector.broadcast %cst_78 : f32 to vector<256x128xf32>
    %90 = arith.maximumf %88, %89 : vector<256x128xf32>
    %91 = vector.shape_cast %90 : vector<256x128xf32> to vector<1x256x128xf32>
    %c0_79 = arith.constant 0 : index
    %c0_80 = arith.constant 0 : index
    %c0_81 = arith.constant 0 : index
    %92 = vector.load %arg7[%c0_79, %c0_80, %c0_81] : memref<1x256x128xf32, #tpu.memory_space<vmem>>, vector<1x256x128xf32>
    tpu.vector_store %arg7[%c0_79, %c0_80, %c0_81], %91 {strides = array<i32>} : memref<1x256x128xf32, #tpu.memory_space<vmem>>, vector<1x256x128xf32>,
    return
  }
  func.func @transform_0(%arg0: i32, %arg1: i32) -> (i32, i32, i32, i32) {
    %c0_i32 = arith.constant 0 : i32
    %c0_i32_0 = arith.constant 0 : i32
    %c0_i32_1 = arith.constant 0 : i32
    %c0_i32_2 = arith.constant 0 : i32
    return %arg0, %c0_i32, %c0_i32_0, %c0_i32_1 : i32, i32, i32, i32
  }
  func.func @transform_1(%arg0: i32, %arg1: i32) -> (i32, i32, i32) {
    %c0_i32 = arith.constant 0 : i32
    %c0_i32_0 = arith.constant 0 : i32
    %c0_i32_1 = arith.constant 0 : i32
    return %c0_i32, %c0_i32_0, %arg1 : i32, i32, i32
  }
  func.func @transform_2(%arg0: i32, %arg1: i32) -> (i32, i32) {
    %c0_i32 = arith.constant 0 : i32
    %c0_i32_0 = arith.constant 0 : i32
    %c0_i32_1 = arith.constant 0 : i32
    return %c0_i32, %c0_i32_0 : i32, i32
  }
  func.func @transform_3(%arg0: i32, %arg1: i32) -> (i32, i32) {
    %c0_i32 = arith.constant 0 : i32
    %c0_i32_0 = arith.constant 0 : i32
    return %c0_i32, %arg1 : i32, i32
  }
  func.func @transform_4(%arg0: i32, %arg1: i32) -> (i32, i32) {
    %c0_i32 = arith.constant 0 : i32
    %c0_i32_0 = arith.constant 0 : i32
    return %c0_i32, %arg1 : i32, i32
  }
  func.func @transform_5(%arg0: i32, %arg1: i32) -> (i32, i32, i32) {
    %c0_i32 = arith.constant 0 : i32
    %c0_i32_0 = arith.constant 0 : i32
    return %arg0, %c0_i32, %arg1 : i32, i32, i32
  }
}

</mosaic_0001>

<bundles_post_ra>
// kernel: tpu_custom_call.1
= control target key start
LH: loop header
LB: loop body
LE: loop exit
PB: predicated region body
PF: predicated region fallthrough
CT: control target
= control target key end

     0   :  { %10 = vsyncpa [#allocation3], 0  ;;  %s10027_s0 = inlined_call_operand.vmem [shape: bf16[2,18,18,64], index: 0, kind: input, shape index: {}]   ;;  %s10028_s1 = inlined_call_operand.vmem [shape: bf16[9,64,128], index: 1, kind: input, shape index: {}]   ;;  %s10029_s2 = inlined_call_operand.vmem [shape: f32[128,128], index: 2, kind: input, shape index: {}]   ;;  %s10030_s3 = inlined_call_operand.vmem [shape: f32[1,128], index: 3, kind: input, shape index: {}]   ;;  %s10031_s4 = inlined_call_operand.vmem [shape: f32[1,128], index: 4, kind: input, shape index: {}]   ;;  %s10032_s5 = inlined_call_operand.hbm [shape: f32[2,256,128], index: 5, kind: output, shape index: {}]  }
   0x1   :  { %12 = vsyncpa [#allocation3 + $0x1], 0  ;;  %s7580_s18 = smov 0   ;;  %s7582_s19 = smov 0  }
   0x2   :  { %s7584_s20 = smov 0   ;;  %s7586_s21 = smov 0  }
   0x3   :  { %s7588_s22 = smov 0   ;;  %s7590_s23 = smov 0  }
   0x4 LB: > { %s5662_s24 = sadd.s32 4294967295, %s7542_s23   ;;  %s5663_s25 = sadd.s32 4294967294, %s7542_s23   ;;  %s7542_s23 = sphi %s7590_s23, %s18_s23   ;;  %s7538_s22 = sphi %s7588_s22, %s10114_s22   ;;  %s7534_s21 = sphi %s7586_s21, %s10113_s21   ;;  %s7530_s20 = sphi %s7584_s20, %s10112_s20   ;;  %s7526_s19 = sphi %s7582_s19, %s10111_s19   ;;  %s7522_s18 = sphi %s7580_s18, %s10110_s18  }
   0x5   : > { %s30_s26 = sadd.s32 1, %s7538_s22  ;;  %s164_s27 = sadd.s32 1, %s7530_s20 }
   0x6   : > { %p32_p0 = scmp.ge.s32.totalorder %s30_s26, 2  ;;  %p174_p1 = scmp.ne.s32.totalorder %s7530_s20, %s7526_s19 }
   0x7   : > { %p175_p2 = scmp.eq.s32.totalorder %s5662_s24, 1  ;;  %p180_p3 = scmp.ne.s32.totalorder %s7526_s19, %s7522_s18 }
   0x8   : > { %s10116_s26 = smov (%p32_p0, %s30_s26), 0  ;;  %p181_p5 = scmp.eq.s32.totalorder %s5663_s25, 1 }
   0x9   : > { %p7620_p4 = por %p175_p2, %p174_p1  ;;  %s159_s29 = ssub.s32 %s7538_s22, %s10116_s26 }
   0xa   : > { %p5669_p6 = scmp.ge.s32.totalorder %s7542_s23, 1  ;;  %p162_p7 = scmp.eq.s32.totalorder %s159_s29, 0 }
   0xb   : > { %p7627_p8 = por %p181_p5, %p180_p3  ;;  %p229_p9 = scmp.lt.s32.totalorder %s7542_s23, 3 }
   0xc   : > { %s7633_s6 = scalar_select %p162_p7, %s7530_s20, %s164_s27  }
   0xd   : > { %p230_p10 = pnand %p5669_p6, %p229_p9 }
   0xf   : > { %233 = sbr.rel (%p230_p10) target bundleno = 1238 (0x4d6), region = 40 }
  0x16   : > { %v7316_v0 = vld [vmem:[%s10028_s1 + $0x80] sm:$0xff]   ;;  %p267_p11 = scmp.lt.s32.totalorder %s7534_s21, 1  ;;  %v7318_v2 = vld [vmem:[%s10028_s1 + $0x88] sm:$0xff]   ;;  %v7320_v4 = vld [vmem:[%s10028_s1 + $0x90] sm:$0xff]   ;;  %vm339_vm0 = vsmask.f32 3328 }
  0x17   : > { %v7317_v1 = vld [vmem:[%s10028_s1 + $0x20] sm:$0xff]   ;;  %6681 = vmatprep.subr.bf16.mxu0 %v7316_v0  ;;  %v7319_v3 = vld [vmem:[%s10028_s1 + $0x28] sm:$0xff]   ;;  %v7321_v5 = vld [vmem:[%s10028_s1 + $0x30] sm:$0xff]   ;;  %vm340_vm1 = vsmask.f32 7440  ;;  %vm807_vm3 = vcmask 523264  }
  0x18   : > { %s268_s13 = scalar_select %p267_p11, %s7534_s21, 1  ;;  %6521 = vmatprep.subr.bf16.mxu1 %v7317_v1  ;;  %6682 = vmatpush3.bf16.msra.mxu0 %v7316_v0  ;;  %v7322_v6 = vld [vmem:[%s10028_s1 + $0x98] sm:$0xff]   ;;  %v7681_v28 = vld [vmem:[%s10028_s1 + $0xa0] sm:$0xff]   ;;  %vm7685_vm2 = vmor %vm339_vm0, %vm340_vm1  ;;  %vm1378_vm4 = vcmask 1042432   ;;  %vm1379_vm5 = vcmask 1046532   ;;  %vm7545_vm7 = vmmov 0  }
  0x19   : > { %6522 = vmatpush3.bf16.msra.mxu1 %v7317_v1  ;;  %6683 = vmatprep.subr.bf16.mxu0 %v7318_v2  ;;  %v7323_v7 = vld [vmem:[%s10028_s1 + $0x38] sm:$0xff]   ;;  %v7328_v57 = vld [vmem:[%s10028_s1] sm:$0xff]   ;;  %vm8073_vm6 = vmor %vm1378_vm4, %vm1379_vm5  ;;  %s264_s27 = sand.u32 1, %s7526_s19   ;;  %s6306_s8 = sshll.u32 %s7534_s21, 12 }
  0x1a   : > { %s7255_s24 = smul.u32 216, %s268_s13  ;;  %6523 = vmatprep.subr.bf16.mxu1 %v7319_v3  ;;  %s5670_s29 = sshll.u32 %s264_s27, 8 }
  0x1b   : > { %s9920_s7 = scalar_lea.vmem [#allocation2], %s5670_s29  ;;  %s9959_s12 = scalar_lea.hbm %s10032_s5, %s6306_s8 }
  0x1c   : > { %s7661_s10 = scalar_lea.vmem %s10027_s0, %s7255_s24  ;;  %6684 = vmatpush3.bf16.msra.mxu0 %v7318_v2  ;;  %s5551_s9 = sshll.u32 %s9920_s7, 4  ;;  %s9961_s9 = int_to_ptr.vmem [resolvable:$true] %s5551_s9 }
  0x1d   : > { %6524 = vmatpush3.bf16.msra.mxu1 %v7319_v3  ;;  %6685 = vmatprep.subr.bf16.mxu0 %v7320_v4  ;;  %v283_v8 = vld [vmem:[%s7661_s10] sm:$0xf]  ;;  %v284_v9 = vld [vmem:[%s7661_s10 + $0x4] sm:$0xf]  ;;  %v323_v10 = vld [vmem:[%s7661_s10 + $0x8] sm:$0x1] }
  0x1e   : > { %6525 = vmatprep.subr.bf16.mxu1 %v7321_v5  ;;  %v343_v11 = vshrl.u32 %v283_v8, 16  ;;  %v346_v12 = vshll.u32 %v283_v8, 16  ;;  %v352_v13 = vshll.u32 %v284_v9, 16  ;;  %v356_v14 = vshrl.u32 %v284_v9, 16  ;;  %v5888_v16 = vld [vmem:[%s7661_s10 + $0xc] sm:$0xf] }
  0x1f   : > { %v362_v15 = vshll.u32 %v323_v10, 16  ;;  %v7671_v19 = vld [vmem:[%s7661_s10 + $0x10] sm:$0xf]  ;;  %v7674_v20 = vld [vmem:[%s7661_s10 + $0x14] sm:$0x1]  ;;  %v2251_v23 = vshrl.u32 %v5888_v16, 16 }
  0x20   : > { %6686 = vmatpush3.bf16.msra.mxu0 %v7320_v4  ;;  %v345_v17 = vrot.slane %v343_v11, 4  ;;  %v348_v18 = vrot.slane %v346_v12, 5  ;;  %v354_v21 = vrot.slane %v352_v13, 5  ;;  %v358_v22 = vrot.slane %v356_v14, 4  ;;  %v285_v34 = vld [vmem:[%s7661_s10 + $0xc] sm:$0xf] }
  0x21   : > { %6526 = vmatpush3.bf16.msra.mxu1 %v7321_v5  ;;  %6687 = vmatprep.subr.bf16.mxu0 %v7322_v6  ;;  %v2254_v25 = vshll.u32 %v5888_v16, 16  ;;  %v2260_v26 = vshll.u32 %v7671_v19, 16  ;;  %v2264_v27 = vshrl.u32 %v7671_v19, 16  ;;  %v364_v31 = vrot.slane %v362_v15, 5  ;;  %v286_v39 = vld [vmem:[%s7661_s10 + $0x10] sm:$0xf] }
  0x22   : > { %6527 = vmatprep.subr.bf16.mxu1 %v7323_v7  ;;  %v349_v24 = vor.u32 %v348_v18, %v345_v17  ;;  %v359_v30 = vor.u32 %v358_v22, %v354_v21  ;;  %v2253_v32 = vrot.slane %v2251_v23, 4  ;;  %v2270_v33 = vshll.u32 %v7674_v20, 16  ;;  %v324_v46 = vld [vmem:[%s7661_s10 + $0x14] sm:$0x1]  ;;  %v5891_v56 = vld [vmem:[%s7661_s10 + $0x18] sm:$0xf] }
  0x23   : > { %v2256_v36 = vrot.slane %v2254_v25, 5  ;;  %v2262_v37 = vrot.slane %v2260_v26, 5  ;;  %v2266_v38 = vrot.slane %v2264_v27, 4  ;;  %v367_v42 = vshrl.u32 %v285_v34, 16  ;;  %v7704_v62 = vld [vmem:[%s7661_s10 + $0x1c] sm:$0xf] }
  0x24   : > { %6688 = vmatpush3.bf16.msra.mxu0 %v7322_v6  ;;  %v350_v35 = vrot.slane %v349_v24, 4  ;;  %v360_v40 = vrot.slane %v359_v30, 4  ;;  %v2272_v41 = vrot.slane %v2270_v33, 5  ;;  %v370_v47 = vshll.u32 %v285_v34, 16  ;;  %v7713_v3 = vld [vmem:[%s7661_s10 + $0x20] sm:$0x1] }
  0x25   : > { %6528 = vmatpush3.bf16.msra.mxu1 %v7323_v7  ;;  %6721 = vmatprep.subr.bf16.mxu0 %v7681_v28  ;;  %v2257_v44 = vor.u32 %v2256_v36, %v2253_v32  ;;  %v2267_v45 = vor.u32 %v2266_v38, %v2262_v37  ;;  %v369_v49 = vrot.slane %v367_v42, 4  ;;  %v376_v50 = vshll.u32 %v286_v39, 16  ;;  %v287_v12 = vld [vmem:[%s7661_s10 + $0x18] sm:$0xf]  ;;  %v288_v17 = vld [vmem:[%s7661_s10 + $0x1c] sm:$0xf] }
  0x26   : > { %v355_v43 = vsel %vm7685_vm2, %v350_v35, %v354_v21  ;;  %v365_v48 = vsel %vm7685_vm2, %v360_v40, %v364_v31  ;;  %v380_v51 = vshrl.u32 %v286_v39, 16  ;;  %v372_v55 = vrot.slane %v370_v47, 5  ;;  %6561 = vmatprep.subr.bf16.mxu1 %v7328_v57  ;;  %v325_v24 = vld [vmem:[%s7661_s10 + $0x20] sm:$0x1]  ;;  %v5894_v31 = vld [vmem:[%s7661_s10 + $0x24] sm:$0xf] }
  0x27   : > { %v5680_v52 = vcombine.low %v355_v43, %v365_v48  ;;  %v2258_v53 = vrot.slane %v2257_v44, 4  ;;  %v2268_v54 = vrot.slane %v2267_v45, 4  ;;  %v3022_v58 = vrot.slane %v7671_v19, 5  ;;  %v7329_v36 = vld [vmem:[%s10028_s1 + $0x8] sm:$0xff]   ;;  %s9981_s13 = scalar_lea.sflag [#allocation3], %s264_s27  ;;  %s7464_s14 = scalar_lea.vmem %s9961_s9, 4096 }
  0x28   : > { %v378_v59 = vrot.slane %v376_v50, 5  ;;  %v382_v60 = vrot.slane %v380_v51, 4  ;;  %v386_v61 = vshll.u32 %v324_v46, 16  ;;  %v3025_v1 = vrot.slane %v7674_v20, 5  ;;  %v5896_v45 = vld [vmem:[%s7661_s10 + $0x2c] sm:$0x1]  ;;  %p7465_p12 = scmp.ne.s32.totalorder %s9961_s9, %s7464_s14 }
  0x29   : > { %6529 = vmatprep.mubr.msk.bf16.mxu1 %vm807_vm3, %v5680_v52  ;;  %v2263_v63 = vsel %vm7685_vm2, %v2258_v53, %v2262_v37  ;;  %v2273_v0 = vsel %vm7685_vm2, %v2268_v54, %v2272_v41  ;;  %v373_v2 = vor.u32 %v372_v55, %v369_v49  ;;  %v2275_v7 = vshrl.u32 %v5891_v56, 16  ;;  %v5895_v41 = vld [vmem:[%s7661_s10 + $0x28] sm:$0xf]  ;;  %v289_v51 = vld [vmem:[%s7661_s10 + $0x24] sm:$0xf] }
  0x2a   : > { %v5944_v4 = vcombine.low %v2263_v63, %v2273_v0  ;;  %v383_v5 = vor.u32 %v382_v60, %v378_v59  ;;  %v388_v6 = vrot.slane %v386_v61, 5  ;;  %v2278_v9 = vshll.u32 %v5891_v56, 16  ;;  %v7330_v56 = vld [vmem:[%s10028_s1 + $0x10] sm:$0xff]   ;;  %v290_v0 = vld [vmem:[%s7661_s10 + $0x28] sm:$0xf]  ;;  %p7466_p13 = pnand %p7465_p12, %p7620_p4 }
  0x2b   : > { %v374_v8 = vrot.slane %v373_v2, 4  ;;  %v2284_v10 = vshll.u32 %v7704_v62, 16  ;;  %v2288_v11 = vshrl.u32 %v7704_v62, 16  ;;  %v2277_v14 = vrot.slane %v2275_v7, 4 }
  0x2c   : > { %6689 = vmatprep.mubr.msk.bf16.mxu0 %vm807_vm3, %v5944_v4  ;;  %v384_v13 = vrot.slane %v383_v5, 4  ;;  %v2294_v15 = vshll.u32 %v7713_v3, 16  ;;  %v3029_v16 = vrot.slane %v7704_v62, 5  ;;  %v2280_v21 = vrot.slane %v2278_v9, 5  ;;  %p7467_p0 = pneg %p7466_p13 }
  0x2d   : > { %v379_v18 = vsel %vm7685_vm2, %v374_v8, %v378_v59  ;;  %v2286_v22 = vrot.slane %v2284_v10, 5  ;;  %v2290_v23 = vrot.slane %v2288_v11, 4  ;;  %v3032_v30 = vrot.slane %v7713_v3, 5  ;;  %v326_v10 = vld [vmem:[%s7661_s10 + $0x2c] sm:$0x1] }
  0x2e   : > { %v389_v25 = vsel %vm7685_vm2, %v384_v13, %v388_v6  ;;  %v2296_v26 = vrot.slane %v2294_v15, 5  ;;  %v7729_v27 = vrot.slane %v3029_v16, 4  ;;  %v2281_v33 = vor.u32 %v2280_v21, %v2277_v14 }
  0x2f   : > { %v5681_v32 = vcombine.low %v379_v18, %v389_v25  ;;  %v2291_v34 = vor.u32 %v2290_v23, %v2286_v22  ;;  %v391_v35 = vshrl.u32 %v287_v12, 16  ;;  %v394_v37 = vshll.u32 %v287_v12, 16 }
  0x30   : > { %v400_v38 = vshll.u32 %v288_v17, 16  ;;  %v404_v39 = vshrl.u32 %v288_v17, 16  ;;  %v410_v40 = vshll.u32 %v325_v24, 16  ;;  %v2282_v42 = vrot.slane %v2281_v33, 4  ;;  %v5897_v17 = vld [vmem:[%s7661_s10 + $0x30] sm:$0xf] }
  0x31   : > { %6530 = vmatmul.mubr.msk.bf16.vlgmr.msra.gmra.mrb[0].mxu1 %vm807_vm3, %v5681_v32  ;;  %v2292_v43 = vrot.slane %v2291_v34, 4  ;;  %v393_v44 = vrot.slane %v391_v35, 4  ;;  %v2299_v46 = vshrl.u32 %v5894_v31, 16  ;;  %v396_v47 = vrot.slane %v394_v37, 5  ;;  %v7331_v24 = vld [vmem:[%s10028_s1 + $0x18] sm:$0xff]  }
  0x32   : > { %v402_v48 = vrot.slane %v400_v38, 5  ;;  %v406_v49 = vrot.slane %v404_v39, 4  ;;  %v412_v50 = vrot.slane %v410_v40, 5  ;;  %6562 = vmatpush3.bf16.msra.mxu1 %v7328_v57  ;;  %v2287_v52 = vsel %vm7685_vm2, %v2282_v42, %v2286_v22  ;;  %v7325_v57 = vld [vmem:[%s10028_s1 + $0xa8] sm:$0xff]   ;;  %v5898_v33 = vld [vmem:[%s7661_s10 + $0x34] sm:$0xf] }
  0x33   : > { %v2297_v53 = vsel %vm7685_vm2, %v2292_v43, %v2296_v26  ;;  %v2301_v54 = vrot.slane %v2299_v46, 4  ;;  %v2302_v55 = vshll.u32 %v5894_v31, 16  ;;  %6563 = vmatprep.subr.bf16.mxu1 %v7329_v36  ;;  %v397_v60 = vor.u32 %v396_v47, %v393_v44  ;;  %v7327_v43 = vld [vmem:[%s10028_s1 + $0xb8] sm:$0xff]  }
  0x34   : > { %v5945_v59 = vcombine.low %v2287_v52, %v2297_v53  ;;  %v407_v61 = vor.u32 %v406_v49, %v402_v48  ;;  %v2308_v63 = vshll.u32 %v5895_v41, 16  ;;  %v2312_v4 = vshrl.u32 %v5895_v41, 16  ;;  %v5899_v41 = vld [vmem:[%s7661_s10 + $0x38] sm:$0x1]  ;;  %v292_v53 = vld [vmem:[%s7661_s10 + $0x34] sm:$0xf] }
  0x35   : > { %v2304_v2 = vrot.slane %v2302_v55, 5  ;;  %v2318_v5 = vshll.u32 %v5896_v45, 16  ;;  %v415_v6 = vshrl.u32 %v289_v51, 16  ;;  %v398_v7 = vrot.slane %v397_v60, 4 }
  0x36   : > { %6690 = vmatmul.mubr.msk.bf16.vlgmr.msra.gmra.mrb[0].mxu0 %vm807_vm3, %v5945_v59  ;;  %v408_v8 = vrot.slane %v407_v61, 4  ;;  %v2310_v9 = vrot.slane %v2308_v63, 5  ;;  %v418_v11 = vshll.u32 %v289_v51, 16  ;;  %6564 = vmatpush3.bf16.msra.mxu1 %v7329_v36  ;;  %v2314_v13 = vrot.slane %v2312_v4, 4 }
  0x37   : > { %6722 = vmatpush3.bf16.msra.mxu0 %v7681_v28  ;;  %v2305_v12 = vor.u32 %v2304_v2, %v2301_v54  ;;  %v2320_v14 = vrot.slane %v2318_v5, 5  ;;  %v417_v15 = vrot.slane %v415_v6, 4  ;;  %6565 = vmatprep.subr.bf16.mxu1 %v7330_v56  ;;  %v403_v18 = vsel %vm7685_vm2, %v398_v7, %v402_v48  ;;  %v7326_v28 = vld [vmem:[%s10028_s1 + $0xb0] sm:$0xff]   ;;  %v7333_v2 = vld [vmem:[%s10028_s1 + $0xc0] sm:$0xff]  }
  0x38   : > { %v413_v21 = vsel %vm7685_vm2, %v408_v8, %v412_v50  ;;  %v420_v22 = vrot.slane %v418_v11, 5  ;;  %v424_v23 = vshll.u32 %v290_v0, 16  ;;  %6723 = vmatprep.subr.bf16.mxu0 %v7325_v57  ;;  %v2315_v31 = vor.u32 %v2314_v13, %v2310_v9  ;;  %v291_v48 = vld [vmem:[%s7661_s10 + $0x30] sm:$0xf]  ;;  %v5900_v8 = vld [vmem:[%s7661_s10 + $0x3c] sm:$0xf] }
  0x39   : > { %v5682_v25 = vcombine.low %v403_v18, %v413_v21  ;;  %v2306_v26 = vrot.slane %v2305_v12, 4  ;;  %v428_v32 = vshrl.u32 %v290_v0, 16  ;;  %v434_v36 = vshll.u32 %v326_v10, 16  ;;  %v327_v0 = vld [vmem:[%s7661_s10 + $0x38] sm:$0x1] }
  0x3a   : > { %v421_v34 = vor.u32 %v420_v22, %v417_v15  ;;  %v426_v35 = vrot.slane %v424_v23, 5  ;;  %v2323_v37 = vshrl.u32 %v5897_v17, 16  ;;  %6566 = vmatpush3.bf16.msra.mxu1 %v7330_v56  ;;  %v2316_v39 = vrot.slane %v2315_v31, 4  ;;  %v5901_v13 = vld [vmem:[%s7661_s10 + $0x40] sm:$0xf] }
  0x3b   : > { %6533 = vmatprep.mubr.msk.bf16.mxu1 %vm807_vm3, %v5682_v25  ;;  %v2311_v38 = vsel %vm7685_vm2, %v2306_v26, %v2310_v9  ;;  %v430_v40 = vrot.slane %v428_v32, 4  ;;  %v2326_v42 = vshll.u32 %v5897_v17, 16  ;;  %6724 = vmatpush3.bf16.msra.mxu0 %v7325_v57  ;;  %v436_v45 = vrot.slane %v434_v36, 5  ;;  %v5902_v26 = vld [vmem:[%s7661_s10 + $0x44] sm:$0x1] }
  0x3c   : > { %v422_v44 = vrot.slane %v421_v34, 4  ;;  %v2325_v46 = vrot.slane %v2323_v37, 4  ;;  %v2332_v47 = vshll.u32 %v5898_v33, 16  ;;  %6725 = vmatprep.subr.bf16.mxu0 %v7326_v28  ;;  %6567 = vmatprep.subr.bf16.mxu1 %v7331_v24  ;;  %v2321_v49 = vsel %vm7685_vm2, %v2316_v39, %v2320_v14 }
  0x3d   : > { %v431_v50 = vor.u32 %v430_v40, %v426_v35  ;;  %v2328_v51 = vrot.slane %v2326_v42, 5  ;;  %v2336_v52 = vshrl.u32 %v5898_v33, 16  ;;  %v5946_v54 = vcombine.low %v2311_v38, %v2321_v49  ;;  %v293_v33 = vld [vmem:[%s7661_s10 + $0x3c] sm:$0xf]  ;;  %v294_v38 = vld [vmem:[%s7661_s10 + $0x40] sm:$0xf] }
  0x3e   : > { %v427_v55 = vsel %vm7685_vm2, %v422_v44, %v426_v35  ;;  %v2334_v56 = vrot.slane %v2332_v47, 5  ;;  %v2342_v59 = vshll.u32 %v5899_v41, 16  ;;  %6568 = vmatpush3.bf16.msra.mxu1 %v7331_v24  ;;  %v439_v57 = vshrl.u32 %v291_v48, 16 }
  0x3f   : > { %v432_v60 = vrot.slane %v431_v50, 4  ;;  %v2329_v61 = vor.u32 %v2328_v51, %v2325_v46  ;;  %v2338_v63 = vrot.slane %v2336_v52, 4  ;;  %6726 = vmatpush3.bf16.msra.mxu0 %v7326_v28  ;;  %6693 = vmatprep.mubr.msk.bf16.mxu0 %vm807_vm3, %v5946_v54  ;;  %v442_v5 = vshll.u32 %v291_v48, 16  ;;  %v5903_v48 = vld [vmem:[%s7661_s10 + $0x48] sm:$0xf] }
  0x40   : > { %v2344_v4 = vrot.slane %v2342_v59, 5  ;;  %v448_v6 = vshll.u32 %v292_v53, 16  ;;  %v452_v7 = vshrl.u32 %v292_v53, 16  ;;  %6727 = vmatprep.subr.bf16.mxu0 %v7327_v43  ;;  %v441_v12 = vrot.slane %v439_v57, 4 }
  0x41   : > { %v437_v9 = vsel %vm7685_vm2, %v432_v60, %v436_v45  ;;  %v2330_v10 = vrot.slane %v2329_v61, 4  ;;  %v2339_v11 = vor.u32 %v2338_v63, %v2334_v56  ;;  %v444_v15 = vrot.slane %v442_v5, 5 }
  0x42   : > { %v5683_v14 = vcombine.low %v427_v55, %v437_v9  ;;  %v450_v17 = vrot.slane %v448_v6, 5  ;;  %v454_v18 = vrot.slane %v452_v7, 4  ;;  %v458_v23 = vshll.u32 %v327_v0, 16 }
  0x43   : > { %v2335_v21 = vsel %vm7685_vm2, %v2330_v10, %v2334_v56  ;;  %v2340_v22 = vrot.slane %v2339_v11, 4  ;;  %v2347_v28 = vshrl.u32 %v5900_v8, 16  ;;  %6728 = vmatpush3.bf16.msra.mxu0 %v7327_v43  ;;  %v445_v24 = vor.u32 %v444_v15, %v441_v12  ;;  %v328_v43 = vld [vmem:[%s7661_s10 + $0x44] sm:$0x1]  ;;  %v5905_v10 = vld [vmem:[%s7661_s10 + $0x50] sm:$0x1] }
  0x44   : > { %6534 = vmatmul.mubr.msk.bf16.gmra.mrb[4].mxu1 %vm807_vm3, %v5683_v14  ;;  %v455_v25 = vor.u32 %v454_v18, %v450_v17  ;;  %v2350_v31 = vshll.u32 %v5900_v8, 16  ;;  %v2356_v32 = vshll.u32 %v5901_v13, 16  ;;  %6761 = vmatprep.subr.bf16.mxu0 %v7333_v2  ;;  %v460_v35 = vrot.slane %v458_v23, 5  ;;  %v5904_v2 = vld [vmem:[%s7661_s10 + $0x4c] sm:$0xf] }
  0x45   : > { %v2345_v34 = vsel %vm7685_vm2, %v2340_v22, %v2344_v4  ;;  %v2349_v36 = vrot.slane %v2347_v28, 4  ;;  %v2360_v37 = vshrl.u32 %v5901_v13, 16  ;;  %v446_v40 = vrot.slane %v445_v24, 4  ;;  %v295_v11 = vld [vmem:[%s7661_s10 + $0x48] sm:$0xf] }
  0x46   : > { %v5947_v39 = vcombine.low %v2335_v21, %v2345_v34  ;;  %v456_v41 = vrot.slane %v455_v25, 4  ;;  %v2352_v42 = vrot.slane %v2350_v31, 5  ;;  %v2358_v44 = vrot.slane %v2356_v32, 5  ;;  %v296_v25 = vld [vmem:[%s7661_s10 + $0x4c] sm:$0xf] }
  0x47   : > { %v2362_v45 = vrot.slane %v2360_v37, 4  ;;  %v2366_v46 = vshll.u32 %v5902_v26, 16  ;;  %v463_v47 = vshrl.u32 %v293_v33, 16  ;;  %v451_v49 = vsel %vm7685_vm2, %v446_v40, %v450_v17  ;;  %v329_v34 = vld [vmem:[%s7661_s10 + $0x50] sm:$0x1] }
  0x48   : > { %6694 = vmatmul.mubr.msk.bf16.gmra.mrb[4].mxu0 %vm807_vm3, %v5947_v39  ;;  %v461_v50 = vsel %vm7685_vm2, %v456_v41, %v460_v35  ;;  %v2353_v51 = vor.u32 %v2352_v42, %v2349_v36  ;;  %v466_v52 = vshll.u32 %v293_v33, 16  ;;  %v472_v61 = vshll.u32 %v294_v38, 16  ;;  %v5906_v40 = vld [vmem:[%s7661_s10 + $0x54] sm:$0xf] }
  0x49   : > { %v5684_v53 = vcombine.low %v451_v49, %v461_v50  ;;  %v2363_v54 = vor.u32 %v2362_v45, %v2358_v44  ;;  %v2368_v55 = vrot.slane %v2366_v46, 5  ;;  %v465_v56 = vrot.slane %v463_v47, 4  ;;  %v5907_v45 = vld [vmem:[%s7661_s10 + $0x58] sm:$0xf] }
  0x4a   : > { %v2354_v59 = vrot.slane %v2353_v51, 4  ;;  %v468_v60 = vrot.slane %v466_v52, 5  ;;  %v476_v63 = vshrl.u32 %v294_v38, 16  ;;  %v482_v57 = vshll.u32 %v328_v43, 16 }
  0x4b   : > { %6537 = vmatprep.mubr.msk.bf16.mxu1 %vm807_vm3, %v5684_v53  ;;  %v2364_v0 = vrot.slane %v2363_v54, 4  ;;  %v2371_v4 = vshrl.u32 %v5903_v48, 16  ;;  %v2374_v5 = vshll.u32 %v5903_v48, 16  ;;  %v474_v8 = vrot.slane %v472_v61, 5  ;;  %v5908_v53 = vld [vmem:[%s7661_s10 + $0x5c] sm:$0x1] }
  0x4c   : > { %v2359_v6 = vsel %vm7685_vm2, %v2354_v59, %v2358_v44  ;;  %v469_v7 = vor.u32 %v468_v60, %v465_v56  ;;  %v478_v9 = vrot.slane %v476_v63, 4  ;;  %v484_v13 = vrot.slane %v482_v57, 5 }
  0x4d   : > { %v2369_v12 = vsel %vm7685_vm2, %v2364_v0, %v2368_v55  ;;  %v2373_v14 = vrot.slane %v2371_v4, 4  ;;  %v2376_v15 = vrot.slane %v2374_v5, 5  ;;  %v2380_v22 = vshll.u32 %v5904_v2, 16 }
  0x4e   : > { %v5948_v17 = vcombine.low %v2359_v6, %v2369_v12  ;;  %v470_v18 = vrot.slane %v469_v7, 4  ;;  %v479_v21 = vor.u32 %v478_v9, %v474_v8  ;;  %v2384_v28 = vshrl.u32 %v5904_v2, 16  ;;  %v297_v2 = vld [vmem:[%s7661_s10 + $0x54] sm:$0xf] }
  0x4f   : > { %v2377_v23 = vor.u32 %v2376_v15, %v2373_v14  ;;  %v2390_v24 = vshll.u32 %v5905_v10, 16  ;;  %v487_v26 = vshrl.u32 %v295_v11, 16  ;;  %v2382_v33 = vrot.slane %v2380_v22, 5  ;;  %v330_v15 = vld [vmem:[%s7661_s10 + $0x5c] sm:$0x1] }
  0x50   : > { %6697 = vmatprep.mubr.msk.bf16.mxu0 %vm807_vm3, %v5948_v17  ;;  %v475_v31 = vsel %vm7685_vm2, %v470_v18, %v474_v8  ;;  %v480_v32 = vrot.slane %v479_v21, 4  ;;  %v490_v35 = vshll.u32 %v295_v11, 16  ;;  %v2386_v37 = vrot.slane %v2384_v28, 4  ;;  %v298_v8 = vld [vmem:[%s7661_s10 + $0x58] sm:$0xf] }
  0x51   : > { %v2378_v36 = vrot.slane %v2377_v23, 4  ;;  %v2392_v38 = vrot.slane %v2390_v24, 5  ;;  %v489_v39 = vrot.slane %v487_v26, 4  ;;  %v496_v43 = vshll.u32 %v296_v25, 16  ;;  %v5909_v24 = vld [vmem:[%s7661_s10 + $0x60] sm:$0xf] }
  0x52   : > { %v485_v41 = vsel %vm7685_vm2, %v480_v32, %v484_v13  ;;  %v492_v42 = vrot.slane %v490_v35, 5  ;;  %v500_v44 = vshrl.u32 %v296_v25, 16  ;;  %v2387_v48 = vor.u32 %v2386_v37, %v2382_v33  ;;  %v5910_v25 = vld [vmem:[%s7661_s10 + $0x64] sm:$0xf] }
  0x53   : > { %v5685_v46 = vcombine.low %v475_v31, %v485_v41  ;;  %v2383_v47 = vsel %vm7685_vm2, %v2378_v36, %v2382_v33  ;;  %v506_v49 = vshll.u32 %v329_v34, 16  ;;  %v498_v51 = vrot.slane %v496_v43, 5  ;;  %v299_v43 = vld [vmem:[%s7661_s10 + $0x60] sm:$0xf] }
  0x54   : > { %v493_v50 = vor.u32 %v492_v42, %v489_v39  ;;  %v502_v52 = vrot.slane %v500_v44, 4  ;;  %v2395_v54 = vshrl.u32 %v5906_v40, 16  ;;  %v2388_v55 = vrot.slane %v2387_v48, 4  ;;  %v300_v48 = vld [vmem:[%s7661_s10 + $0x64] sm:$0xf] }
  0x55   : > { %6538 = vmatmul.mubr.msk.bf16.gmra.mrb[8].mxu1 %vm807_vm3, %v5685_v46  ;;  %v508_v56 = vrot.slane %v506_v49, 5  ;;  %v2398_v59 = vshll.u32 %v5906_v40, 16  ;;  %v2404_v60 = vshll.u32 %v5907_v45, 16  ;;  %v2408_v57 = vshrl.u32 %v5907_v45, 16  ;;  %v5911_v40 = vld [vmem:[%s7661_s10 + $0x68] sm:$0x1] }
  0x56   : > { %v494_v61 = vrot.slane %v493_v50, 4  ;;  %v503_v63 = vor.u32 %v502_v52, %v498_v51  ;;  %v2397_v0 = vrot.slane %v2395_v54, 4  ;;  %v2393_v4 = vsel %vm7685_vm2, %v2388_v55, %v2392_v38 }
  0x57   : > { %v2400_v5 = vrot.slane %v2398_v59, 5  ;;  %v2406_v6 = vrot.slane %v2404_v60, 5  ;;  %v2414_v7 = vshll.u32 %v5908_v53, 16  ;;  %v5949_v9 = vcombine.low %v2383_v47, %v2393_v4  ;;  %v331_v59 = vld [vmem:[%s7661_s10 + $0x68] sm:$0x1] }
  0x58   : > { %v499_v10 = vsel %vm7685_vm2, %v494_v61, %v498_v51  ;;  %v504_v11 = vrot.slane %v503_v63, 4  ;;  %v2410_v12 = vrot.slane %v2408_v57, 4  ;;  %v511_v17 = vshrl.u32 %v297_v2, 16  ;;  %v5912_v57 = vld [vmem:[%s7661_s10 + $0x6c] sm:$0xf] }
  0x59   : > { %v2401_v13 = vor.u32 %v2400_v5, %v2397_v0  ;;  %v2416_v14 = vrot.slane %v2414_v7, 5  ;;  %v514_v18 = vshll.u32 %v297_v2, 16  ;;  %6698 = vmatmul.mubr.msk.bf16.gmra.mrb[8].mxu0 %vm807_vm3, %v5949_v9  ;;  %v520_v23 = vshll.u32 %v298_v8, 16  ;;  %v5913_v2 = vld [vmem:[%s7661_s10 + $0x70] sm:$0xf] }
  0x5a   : > { %v509_v21 = vsel %vm7685_vm2, %v504_v11, %v508_v56  ;;  %v2411_v22 = vor.u32 %v2410_v12, %v2406_v6  ;;  %v524_v28 = vshrl.u32 %v298_v8, 16  ;;  %v513_v32 = vrot.slane %v511_v17, 4  ;;  %v7855_v8 = vld [vmem:[%s10028_s1 + $0x40] sm:$0xff]  }
  0x5b   : > { %v5686_v26 = vcombine.low %v499_v10, %v509_v21  ;;  %v2402_v31 = vrot.slane %v2401_v13, 4  ;;  %v516_v33 = vrot.slane %v514_v18, 5  ;;  %v522_v35 = vrot.slane %v520_v23, 5  ;;  %6601 = vmatprep.subr.bf16.mxu1 %v7855_v8 }
  0x5c   : > { %v2412_v34 = vrot.slane %v2411_v22, 4  ;;  %v526_v36 = vrot.slane %v524_v28, 4  ;;  %v530_v37 = vshll.u32 %v330_v15, 16  ;;  %v2419_v41 = vshrl.u32 %v5909_v24, 16  ;;  %v7862_v22 = vld [vmem:[%s7661_s10 + $0x74] sm:$0x1] }
  0x5d   : > { %6541 = vmatprep.mubr.msk.bf16.mxu1 %vm807_vm3, %v5686_v26  ;;  %v2407_v38 = vsel %vm7685_vm2, %v2402_v31, %v2406_v6  ;;  %v517_v39 = vor.u32 %v516_v33, %v513_v32  ;;  %v2422_v42 = vshll.u32 %v5909_v24, 16  ;;  %v2428_v47 = vshll.u32 %v5910_v25, 16 }
  0x5e   : > { %v2417_v44 = vsel %vm7685_vm2, %v2412_v34, %v2416_v14  ;;  %v527_v45 = vor.u32 %v526_v36, %v522_v35  ;;  %v532_v46 = vrot.slane %v530_v37, 5  ;;  %v2421_v51 = vrot.slane %v2419_v41, 4  ;;  %v301_v36 = vld [vmem:[%s7661_s10 + $0x6c] sm:$0xf]  ;;  %v302_v41 = vld [vmem:[%s7661_s10 + $0x70] sm:$0xf] }
  0x5f   : > { %v5950_v49 = vcombine.low %v2407_v38, %v2417_v44  ;;  %v518_v50 = vrot.slane %v517_v39, 4  ;;  %v2424_v52 = vrot.slane %v2422_v42, 5  ;;  %v2430_v54 = vrot.slane %v2428_v47, 5  ;;  %v5915_v47 = vld [vmem:[%s7661_s10 + $0x78] sm:$0xf] }
  0x60   : > { %v528_v53 = vrot.slane %v527_v45, 4  ;;  %v2432_v55 = vshrl.u32 %v5910_v25, 16  ;;  %v2438_v56 = vshll.u32 %v5911_v40, 16  ;;  %v535_v63 = vshrl.u32 %v299_v43, 16 }
  0x61   : > { %6701 = vmatprep.mubr.msk.bf16.mxu0 %vm807_vm3, %v5950_v49  ;;  %v523_v60 = vsel %vm7685_vm2, %v518_v50, %v522_v35  ;;  %v2425_v61 = vor.u32 %v2424_v52, %v2421_v51  ;;  %v538_v0 = vshll.u32 %v299_v43, 16  ;;  %v544_v7 = vshll.u32 %v300_v48, 16 }
  0x62   : > { %v533_v4 = vsel %vm7685_vm2, %v528_v53, %v532_v46  ;;  %v2434_v5 = vrot.slane %v2432_v55, 4  ;;  %v2440_v6 = vrot.slane %v2438_v56, 5  ;;  %v537_v11 = vrot.slane %v535_v63, 4  ;;  %v332_v46 = vld [vmem:[%s7661_s10 + $0x74] sm:$0x1] }
  0x63   : > { %v5687_v9 = vcombine.low %v523_v60, %v533_v4  ;;  %v2426_v10 = vrot.slane %v2425_v61, 4  ;;  %v540_v12 = vrot.slane %v538_v0, 5  ;;  %v546_v14 = vrot.slane %v544_v7, 5  ;;  %v5916_v63 = vld [vmem:[%s7661_s10 + $0x7c] sm:$0xf] }
  0x64   : > { %v2435_v13 = vor.u32 %v2434_v5, %v2430_v54  ;;  %v548_v15 = vshrl.u32 %v300_v48, 16  ;;  %v554_v17 = vshll.u32 %v331_v59, 16  ;;  %v2443_v23 = vshrl.u32 %v5912_v57, 16  ;;  %v5917_v5 = vld [vmem:[%s7661_s10 + $0x80] sm:$0x1] }
  0x65   : > { %6542 = vmatmul.mubr.msk.bf16.gmra.mrb[12].mxu1 %vm807_vm3, %v5687_v9  ;;  %v2431_v18 = vsel %vm7685_vm2, %v2426_v10, %v2430_v54  ;;  %v541_v21 = vor.u32 %v540_v12, %v537_v11  ;;  %v2446_v28 = vshll.u32 %v5912_v57, 16  ;;  %v2452_v31 = vshll.u32 %v5913_v2, 16 }
  0x66   : > { %v2436_v24 = vrot.slane %v2435_v13, 4  ;;  %v550_v25 = vrot.slane %v548_v15, 4  ;;  %v556_v26 = vrot.slane %v554_v17, 5  ;;  %v2445_v33 = vrot.slane %v2443_v23, 4 }
  0x67   : > { %v542_v32 = vrot.slane %v541_v21, 4  ;;  %v2448_v34 = vrot.slane %v2446_v28, 5  ;;  %v2456_v35 = vshrl.u32 %v5913_v2, 16  ;;  %v2454_v39 = vrot.slane %v2452_v31, 5  ;;  %v304_v28 = vld [vmem:[%s7661_s10 + $0x7c] sm:$0xf] }
  0x68   : > { %v2441_v37 = vsel %vm7685_vm2, %v2436_v24, %v2440_v6  ;;  %v551_v38 = vor.u32 %v550_v25, %v546_v14  ;;  %v2462_v40 = vshll.u32 %v7862_v22, 16  ;;  %v559_v50 = vshrl.u32 %v301_v36, 16  ;;  %v303_v6 = vld [vmem:[%s7661_s10 + $0x78] sm:$0xf] }
  0x69   : > { %v5951_v42 = vcombine.low %v2431_v18, %v2441_v37  ;;  %v547_v43 = vsel %vm7685_vm2, %v542_v32, %v546_v14  ;;  %v2449_v44 = vor.u32 %v2448_v34, %v2445_v33  ;;  %v2458_v45 = vrot.slane %v2456_v35, 4 }
  0x6a   : > { %v552_v48 = vrot.slane %v551_v38, 4  ;;  %v2464_v49 = vrot.slane %v2462_v40, 5  ;;  %v562_v51 = vshll.u32 %v301_v36, 16  ;;  %v568_v54 = vshll.u32 %v302_v41, 16 }
  0x6b   : > { %6702 = vmatmul.mubr.msk.bf16.gmra.mrb[12].mxu0 %vm807_vm3, %v5951_v42  ;;  %v2450_v52 = vrot.slane %v2449_v44, 4  ;;  %v2459_v53 = vor.u32 %v2458_v45, %v2454_v39  ;;  %v572_v55 = vshrl.u32 %v302_v41, 16  ;;  %v561_v59 = vrot.slane %v559_v50, 4  ;;  %v5918_v41 = vld [vmem:[%s7661_s10 + $0x84] sm:$0xf] }
  0x6c   : > { %v557_v56 = vsel %vm7685_vm2, %v552_v48, %v556_v26  ;;  %v564_v60 = vrot.slane %v562_v51, 5  ;;  %v578_v61 = vshll.u32 %v332_v46, 16  ;;  %v570_v4 = vrot.slane %v568_v54, 5  ;;  %v7893_v46 = vld [vmem:[%s7661_s10 + $0x88] sm:$0xf] }
  0x6d   : > { %v5688_v0 = vcombine.low %v547_v43, %v557_v56  ;;  %v2455_v57 = vsel %vm7685_vm2, %v2450_v52, %v2454_v39  ;;  %v2460_v2 = vrot.slane %v2459_v53, 4  ;;  %v574_v9 = vrot.slane %v572_v55, 4  ;;  %v333_v39 = vld [vmem:[%s7661_s10 + $0x80] sm:$0x1] }
  0x6e   : > { %v565_v7 = vor.u32 %v564_v60, %v561_v59  ;;  %v580_v10 = vrot.slane %v578_v61, 5  ;;  %v2467_v11 = vshrl.u32 %v5915_v47, 16  ;;  %v2470_v13 = vshll.u32 %v5915_v47, 16  ;;  %v7901_v59 = vld [vmem:[%s7661_s10 + $0x8c] sm:$0x1] }
  0x6f   : > { %6545 = vmatprep.mubr.msk.bf16.mxu1 %vm807_vm3, %v5688_v0  ;;  %v2465_v12 = vsel %vm7685_vm2, %v2460_v2, %v2464_v49  ;;  %v2476_v14 = vshll.u32 %v5916_v63, 16  ;;  %v2480_v15 = vshrl.u32 %v5916_v63, 16  ;;  %v575_v21 = vor.u32 %v574_v9, %v570_v4  ;;  %v7905_v63 = vld [vmem:[%s7661_s10 + $0x84] sm:$0xf] }
  0x70   : > { %v5952_v17 = vcombine.low %v2455_v57, %v2465_v12  ;;  %v566_v18 = vrot.slane %v565_v7, 4  ;;  %v2469_v23 = vrot.slane %v2467_v11, 4  ;;  %v2472_v24 = vrot.slane %v2470_v13, 5  ;;  %v334_v11 = vld [vmem:[%s7661_s10 + $0x8c] sm:$0x1] }
  0x71   : > { %v2478_v25 = vrot.slane %v2476_v14, 5  ;;  %v2482_v26 = vrot.slane %v2480_v15, 4  ;;  %v2486_v31 = vshll.u32 %v5917_v5, 16  ;;  %v576_v33 = vrot.slane %v575_v21, 4  ;;  %v7908_v5 = vld [vmem:[%s7661_s10 + $0x88] sm:$0xf] }
  0x72   : > { %6705 = vmatprep.mubr.msk.bf16.mxu0 %vm807_vm3, %v5952_v17  ;;  %v571_v32 = vsel %vm7685_vm2, %v566_v18, %v570_v4  ;;  %v583_v34 = vshrl.u32 %v303_v6, 16  ;;  %v586_v35 = vshll.u32 %v303_v6, 16  ;;  %v2473_v36 = vor.u32 %v2472_v24, %v2469_v23 }
  0x73   : > { %v2483_v37 = vor.u32 %v2482_v26, %v2478_v25  ;;  %v2488_v38 = vrot.slane %v2486_v31, 5  ;;  %v592_v40 = vshll.u32 %v304_v28, 16  ;;  %v581_v42 = vsel %vm7685_vm2, %v576_v33, %v580_v10 }
  0x74   : > { %v585_v43 = vrot.slane %v583_v34, 4  ;;  %v588_v44 = vrot.slane %v586_v35, 5  ;;  %v596_v45 = vshrl.u32 %v304_v28, 16  ;;  %v5689_v47 = vcombine.low %v571_v32, %v581_v42  ;;  %v5921_v28 = vld [vmem:[%s7661_s10 + $0x90] sm:$0xf] }
  0x75   : > { %v2474_v48 = vrot.slane %v2473_v36, 4  ;;  %v2484_v49 = vrot.slane %v2483_v37, 4  ;;  %v594_v50 = vrot.slane %v592_v40, 5  ;;  %v602_v53 = vshll.u32 %v333_v39, 16  ;;  %v7924_v36 = vld [vmem:[%s7661_s10 + $0x94] sm:$0xf] }
  0x76   : > { %v589_v51 = vor.u32 %v588_v44, %v585_v43  ;;  %v598_v52 = vrot.slane %v596_v45, 4  ;;  %v2491_v54 = vshrl.u32 %v5918_v41, 16  ;;  %6546 = vmatmul.mubr.msk.bf16.gmra.mrb[16].mxu1 %vm807_vm3, %v5689_v47  ;;  %v2494_v60 = vshll.u32 %v5918_v41, 16  ;;  %v7927_v37 = vld [vmem:[%s7661_s10 + $0x98] sm:$0x1] }
  0x77   : > { %v2479_v55 = vsel %vm7685_vm2, %v2474_v48, %v2478_v25  ;;  %v2489_v56 = vsel %vm7685_vm2, %v2484_v49, %v2488_v38  ;;  %v2500_v61 = vshll.u32 %v7893_v46, 16  ;;  %v604_v4 = vrot.slane %v602_v53, 5  ;;  %v7930_v42 = vld [vmem:[%s7661_s10 + $0x90] sm:$0xf]  ;;  %v7936_v48 = vld [vmem:[%s7661_s10 + $0x94] sm:$0xf] }
  0x78   : > { %v5953_v0 = vcombine.low %v2479_v55, %v2489_v56  ;;  %v590_v57 = vrot.slane %v589_v51, 4  ;;  %v599_v2 = vor.u32 %v598_v52, %v594_v50  ;;  %v2493_v6 = vrot.slane %v2491_v54, 4 }
  0x79   : > { %v2496_v7 = vrot.slane %v2494_v60, 5  ;;  %v2502_v9 = vrot.slane %v2500_v61, 5  ;;  %v2504_v10 = vshrl.u32 %v7893_v46, 16  ;;  %v2510_v14 = vshll.u32 %v7901_v59, 16  ;;  %v335_v60 = vld [vmem:[%s7661_s10 + $0x98] sm:$0x1] }
  0x7a   : > { %6706 = vmatmul.mubr.msk.bf16.gmra.mrb[16].mxu0 %vm807_vm3, %v5953_v0  ;;  %v595_v12 = vsel %vm7685_vm2, %v590_v57, %v594_v50  ;;  %v600_v13 = vrot.slane %v599_v2, 4  ;;  %v607_v15 = vshrl.u32 %v7905_v63, 16  ;;  %v610_v21 = vshll.u32 %v7905_v63, 16 }
  0x7b   : > { %v2497_v17 = vor.u32 %v2496_v7, %v2493_v6  ;;  %v2506_v18 = vrot.slane %v2504_v10, 4  ;;  %v616_v23 = vshll.u32 %v7908_v5, 16  ;;  %v2512_v25 = vrot.slane %v2510_v14, 5  ;;  %v5924_v10 = vld [vmem:[%s7661_s10 + $0x9c] sm:$0xf] }
  0x7c   : > { %v605_v24 = vsel %vm7685_vm2, %v600_v13, %v604_v4  ;;  %v609_v26 = vrot.slane %v607_v15, 4  ;;  %v620_v31 = vshrl.u32 %v7908_v5, 16  ;;  %v612_v35 = vrot.slane %v610_v21, 5 }
  0x7d   : > { %v5690_v32 = vcombine.low %v595_v12, %v605_v24  ;;  %v2498_v33 = vrot.slane %v2497_v17, 4  ;;  %v2507_v34 = vor.u32 %v2506_v18, %v2502_v9  ;;  %v618_v38 = vrot.slane %v616_v23, 5  ;;  %v7954_v23 = vld [vmem:[%s7661_s10 + $0xa0] sm:$0xf] }
  0x7e   : > { %v622_v39 = vrot.slane %v620_v31, 4  ;;  %v626_v40 = vshll.u32 %v334_v11, 16  ;;  %v2515_v41 = vshrl.u32 %v5921_v28, 16  ;;  %v613_v45 = vor.u32 %v612_v35, %v609_v26  ;;  %v7958_v31 = vld [vmem:[%s7661_s10 + $0xa4] sm:$0x1] }
  0x7f   : > { %6549 = vmatprep.mubr.msk.bf16.mxu1 %vm807_vm3, %v5690_v32  ;;  %v2503_v43 = vsel %vm7685_vm2, %v2498_v33, %v2502_v9  ;;  %v2508_v44 = vrot.slane %v2507_v34, 4  ;;  %v2518_v47 = vshll.u32 %v5921_v28, 16  ;;  %v2524_v52 = vshll.u32 %v7924_v36, 16  ;;  %v7961_v32 = vld [vmem:[%s7661_s10 + $0x9c] sm:$0xf] }
  0x80   : > { %v623_v49 = vor.u32 %v622_v39, %v618_v38  ;;  %v628_v50 = vrot.slane %v626_v40, 5  ;;  %v2517_v51 = vrot.slane %v2515_v41, 4  ;;  %v614_v54 = vrot.slane %v613_v45, 4 }
  0x81   : > { %v2513_v53 = vsel %vm7685_vm2, %v2508_v44, %v2512_v25  ;;  %v2520_v55 = vrot.slane %v2518_v47, 5  ;;  %v2528_v56 = vshrl.u32 %v7924_v36, 16  ;;  %v2526_v57 = vrot.slane %v2524_v52, 5  ;;  %v7968_v44 = vld [vmem:[%s7661_s10 + $0xa0] sm:$0xf] }
  0x82   : > { %v5954_v61 = vcombine.low %v2503_v43, %v2513_v53  ;;  %v624_v0 = vrot.slane %v623_v49, 4  ;;  %v2534_v2 = vshll.u32 %v7927_v37, 16  ;;  %v619_v4 = vsel %vm7685_vm2, %v614_v54, %v618_v38 }
  0x83   : > { %v2521_v6 = vor.u32 %v2520_v55, %v2517_v51  ;;  %v2530_v7 = vrot.slane %v2528_v56, 4  ;;  %v631_v9 = vshrl.u32 %v7930_v42, 16  ;;  %v634_v13 = vshll.u32 %v7930_v42, 16  ;;  %v336_v55 = vld [vmem:[%s7661_s10 + $0xa4] sm:$0x1] }
  0x84   : > { %6709 = vmatprep.mubr.msk.bf16.mxu0 %vm807_vm3, %v5954_v61  ;;  %v629_v11 = vsel %vm7685_vm2, %v624_v0, %v628_v50  ;;  %v2536_v12 = vrot.slane %v2534_v2, 5  ;;  %v640_v14 = vshll.u32 %v7936_v48, 16  ;;  %v644_v25 = vshrl.u32 %v7936_v48, 16 }
  0x85   : > { %v5691_v15 = vcombine.low %v619_v4, %v629_v11  ;;  %v2522_v17 = vrot.slane %v2521_v6, 4  ;;  %v2531_v18 = vor.u32 %v2530_v7, %v2526_v57  ;;  %v633_v21 = vrot.slane %v631_v9, 4  ;;  %v7983_v9 = vld [vmem:[%s7661_s10 + $0xac] sm:$0xf] }
  0x86   : > { %v636_v28 = vrot.slane %v634_v13, 5  ;;  %v642_v24 = vrot.slane %v640_v14, 5  ;;  %v650_v26 = vshll.u32 %v335_v60, 16  ;;  %v2539_v35 = vshrl.u32 %v5924_v10, 16 }
  0x87   : > { %6550 = vmatmul.mubr.msk.bf16.gmra.mrb[20].mxu1 %vm807_vm3, %v5691_v15  ;;  %v2527_v33 = vsel %vm7685_vm2, %v2522_v17, %v2526_v57  ;;  %v2532_v34 = vrot.slane %v2531_v18, 4  ;;  %v2542_v38 = vshll.u32 %v5924_v10, 16  ;;  %v646_v40 = vrot.slane %v644_v25, 4  ;;  %v5927_v57 = vld [vmem:[%s7661_s10 + $0xa8] sm:$0xf] }
  0x88   : > { %v637_v39 = vor.u32 %v636_v28, %v633_v21  ;;  %v652_v41 = vrot.slane %v650_v26, 5  ;;  %v2548_v43 = vshll.u32 %v7954_v23, 16  ;;  %v2541_v47 = vrot.slane %v2539_v35, 4  ;;  %v7989_v21 = vld [vmem:[%s7661_s10 + $0xb0] sm:$0x1] }
  0x89   : > { %v2537_v45 = vsel %vm7685_vm2, %v2532_v34, %v2536_v12  ;;  %v2544_v49 = vrot.slane %v2542_v38, 5  ;;  %v2552_v50 = vshrl.u32 %v7954_v23, 16  ;;  %v647_v53 = vor.u32 %v646_v40, %v642_v24 }
  0x8a   : > { %v5955_v51 = vcombine.low %v2527_v33, %v2537_v45  ;;  %v638_v52 = vrot.slane %v637_v39, 4  ;;  %v2550_v54 = vrot.slane %v2548_v43, 5  ;;  %v2558_v61 = vshll.u32 %v7958_v31, 16  ;;  %v7994_v33 = vld [vmem:[%s7661_s10 + $0xa8] sm:$0xf] }
  0x8b   : > { %v2545_v56 = vor.u32 %v2544_v49, %v2541_v47  ;;  %v2554_v60 = vrot.slane %v2552_v50, 4  ;;  %v655_v0 = vshrl.u32 %v7961_v32, 16  ;;  %v648_v4 = vrot.slane %v647_v53, 4  ;;  %v8002_v47 = vld [vmem:[%s7661_s10 + $0xac] sm:$0xf] }
  0x8c   : > { %6710 = vmatmul.mubr.msk.bf16.gmra.mrb[20].mxu0 %vm807_vm3, %v5955_v51  ;;  %v643_v2 = vsel %vm7685_vm2, %v638_v52, %v642_v24  ;;  %v658_v6 = vshll.u32 %v7961_v32, 16  ;;  %v664_v7 = vshll.u32 %v7968_v44, 16  ;;  %v2560_v12 = vrot.slane %v2558_v61, 5  ;;  %v5930_v61 = vld [vmem:[%s7661_s10 + $0xb4] sm:$0xf] }
  0x8d   : > { %v2546_v10 = vrot.slane %v2545_v56, 4  ;;  %v2555_v11 = vor.u32 %v2554_v60, %v2550_v54  ;;  %v657_v13 = vrot.slane %v655_v0, 4  ;;  %v653_v14 = vsel %vm7685_vm2, %v648_v4, %v652_v41  ;;  %v337_v60 = vld [vmem:[%s7661_s10 + $0xb0] sm:$0x1] }
  0x8e   : > { %v660_v15 = vrot.slane %v658_v6, 5  ;;  %v666_v17 = vrot.slane %v664_v7, 5  ;;  %v668_v18 = vshrl.u32 %v7968_v44, 16  ;;  %v5692_v28 = vcombine.low %v643_v2, %v653_v14  ;;  %v8013_v6 = vld [vmem:[%s7661_s10 + $0xb8] sm:$0xf] }
  0x8f   : > { %v2551_v24 = vsel %vm7685_vm2, %v2546_v10, %v2550_v54  ;;  %v2556_v25 = vrot.slane %v2555_v11, 4  ;;  %v674_v26 = vshll.u32 %v336_v55, 16  ;;  %v2563_v38 = vshrl.u32 %v5927_v57, 16 }
  0x90   : > { %v661_v34 = vor.u32 %v660_v15, %v657_v13  ;;  %v670_v35 = vrot.slane %v668_v18, 4  ;;  %v2566_v39 = vshll.u32 %v5927_v57, 16  ;;  %6553 = vmatprep.mubr.msk.bf16.mxu1 %vm807_vm3, %v5692_v28  ;;  %v2572_v43 = vshll.u32 %v7983_v9, 16 }
  0x91   : > { %v2561_v40 = vsel %vm7685_vm2, %v2556_v25, %v2560_v12  ;;  %v676_v41 = vrot.slane %v674_v26, 5  ;;  %v2576_v45 = vshrl.u32 %v7983_v9, 16  ;;  %v2565_v52 = vrot.slane %v2563_v38, 4  ;;  %v8020_v26 = vld [vmem:[%s7661_s10 + $0xbc] sm:$0x1] }
  0x92   : > { %v5956_v49 = vcombine.low %v2551_v24, %v2561_v40  ;;  %v662_v50 = vrot.slane %v661_v34, 4  ;;  %v671_v51 = vor.u32 %v670_v35, %v666_v17  ;;  %v2568_v53 = vrot.slane %v2566_v39, 5  ;;  %v8023_v34 = vld [vmem:[%s7661_s10 + $0xb4] sm:$0xf] }
  0x93   : > { %v2574_v54 = vrot.slane %v2572_v43, 5  ;;  %v2578_v55 = vrot.slane %v2576_v45, 4  ;;  %v2582_v56 = vshll.u32 %v7989_v21, 16  ;;  %v679_v2 = vshrl.u32 %v7994_v33, 16 }
  0x94   : > { %6713 = vmatprep.mubr.msk.bf16.mxu0 %vm807_vm3, %v5956_v49  ;;  %v667_v0 = vsel %vm7685_vm2, %v662_v50, %v666_v17  ;;  %v672_v57 = vrot.slane %v671_v51, 4  ;;  %v682_v4 = vshll.u32 %v7994_v33, 16  ;;  %v2569_v7 = vor.u32 %v2568_v53, %v2565_v52  ;;  %v8032_v50 = vld [vmem:[%s7661_s10 + $0xb8] sm:$0xf] }
  0x95   : > { %v2579_v10 = vor.u32 %v2578_v55, %v2574_v54  ;;  %v2584_v11 = vrot.slane %v2582_v56, 5  ;;  %v688_v12 = vshll.u32 %v8002_v47, 16  ;;  %v681_v14 = vrot.slane %v679_v2, 4  ;;  %v338_v2 = vld [vmem:[%s7661_s10 + $0xbc] sm:$0x1] }
  0x96   : > { %v677_v13 = vsel %vm7685_vm2, %v672_v57, %v676_v41  ;;  %v684_v15 = vrot.slane %v682_v4, 5  ;;  %v692_v17 = vshrl.u32 %v8002_v47, 16  ;;  %v2570_v28 = vrot.slane %v2569_v7, 4 }
  0x97   : > { %v5693_v18 = vcombine.low %v667_v0, %v677_v13  ;;  %v2580_v24 = vrot.slane %v2579_v10, 4  ;;  %v690_v25 = vrot.slane %v688_v12, 5  ;;  %v698_v39 = vshll.u32 %v337_v60, 16 }
  0x98   : > { %v685_v35 = vor.u32 %v684_v15, %v681_v14  ;;  %v694_v38 = vrot.slane %v692_v17, 4  ;;  %v2587_v40 = vshrl.u32 %v5930_v61, 16  ;;  %v2575_v41 = vsel %vm7685_vm2, %v2570_v28, %v2574_v54  ;;  %v5933_v54 = vld [vmem:[%s7661_s10 + $0xc0] sm:$0xf] }
  0x99   : > { %6554 = vmatmul.mubr.msk.bf16.gmra.mrb[24].mxu1 %vm807_vm3, %v5693_v18  ;;  %v2585_v43 = vsel %vm7685_vm2, %v2580_v24, %v2584_v11  ;;  %v2590_v45 = vshll.u32 %v5930_v61, 16  ;;  %v2596_v49 = vshll.u32 %v8013_v6, 16  ;;  %v700_v55 = vrot.slane %v698_v39, 5  ;;  %v8048_v24 = vld [vmem:[%s7661_s10 + $0xc4] sm:$0xf] }
  0x9a   : > { %v5957_v51 = vcombine.low %v2575_v41, %v2585_v43  ;;  %v686_v52 = vrot.slane %v685_v35, 4  ;;  %v695_v53 = vor.u32 %v694_v38, %v690_v25  ;;  %v2589_v56 = vrot.slane %v2587_v40, 4 }
  0x9b   : > { %v2592_v60 = vrot.slane %v2590_v45, 5  ;;  %v2598_v0 = vrot.slane %v2596_v49, 5  ;;  %v2600_v57 = vshrl.u32 %v8013_v6, 16  ;;  %v2606_v7 = vshll.u32 %v8020_v26, 16 }
  0x9c   : > { %6714 = vmatmul.mubr.msk.bf16.gmra.mrb[24].mxu0 %vm807_vm3, %v5957_v51  ;;  %v691_v61 = vsel %vm7685_vm2, %v686_v52, %v690_v25  ;;  %v696_v4 = vrot.slane %v695_v53, 4  ;;  %v703_v10 = vshrl.u32 %v8023_v34, 16  ;;  %v706_v13 = vshll.u32 %v8023_v34, 16  ;;  %v8054_v53 = vld [vmem:[%s7661_s10 + $0xc8] sm:$0x1] }
  0x9d   : > { %v2593_v11 = vor.u32 %v2592_v60, %v2589_v56  ;;  %v2602_v12 = vrot.slane %v2600_v57, 4  ;;  %v712_v14 = vshll.u32 %v8032_v50, 16  ;;  %v2608_v17 = vrot.slane %v2606_v7, 5 }
  0x9e   : > { %v701_v15 = vsel %vm7685_vm2, %v696_v4, %v700_v55  ;;  %v705_v18 = vrot.slane %v703_v10, 4  ;;  %v716_v28 = vshrl.u32 %v8032_v50, 16  ;;  %v708_v39 = vrot.slane %v706_v13, 5 }
  0x9f   : > { %v5694_v25 = vcombine.low %v691_v61, %v701_v15  ;;  %v2594_v35 = vrot.slane %v2593_v11, 4  ;;  %v2603_v38 = vor.u32 %v2602_v12, %v2598_v0  ;;  %v714_v40 = vrot.slane %v712_v14, 5  ;;  %v5981_v14 = vld [vmem:[%s7661_s10 + $0x18] sm:$0xe] }
  0xa0   : > { %v718_v41 = vrot.slane %v716_v28, 4  ;;  %v722_v43 = vshll.u32 %v338_v2, 16  ;;  %v2611_v45 = vshrl.u32 %v5933_v54, 16  ;;  %v709_v52 = vor.u32 %v708_v39, %v705_v18  ;;  %v5980_v2 = vld [vmem:[%s7661_s10 + $0xc] sm:$0xe] }
  0xa1   : > { %6557 = vmatprep.mubr.msk.bf16.mxu1 %vm807_vm3, %v5694_v25  ;;  %v2599_v49 = vsel %vm7685_vm2, %v2594_v35, %v2598_v0  ;;  %v2604_v51 = vrot.slane %v2603_v38, 4  ;;  %v2614_v55 = vshll.u32 %v5933_v54, 16  ;;  %v2620_v61 = vshll.u32 %v8048_v24, 16  ;;  %v7402_v25 = vld [vmem:[%s7661_s10] sm:$0xf] }
  0xa2   : > { %v719_v56 = vor.u32 %v718_v41, %v714_v40  ;;  %v724_v60 = vrot.slane %v722_v43, 5  ;;  %v2613_v57 = vrot.slane %v2611_v45, 4  ;;  %v710_v7 = vrot.slane %v709_v52, 4  ;;  %v8067_v35 = vld [vmem:[%s7661_s10 + $0x4] sm:$0xf] }
  0xa3   : > { %v2609_v4 = vsel %vm7685_vm2, %v2604_v51, %v2608_v17  ;;  %v2616_v10 = vrot.slane %v2614_v55, 5  ;;  %v2624_v0 = vshrl.u32 %v8048_v24, 16  ;;  %v2622_v13 = vrot.slane %v2620_v61, 5 }
  0xa4   : > { %v5958_v11 = vcombine.low %v2599_v49, %v2609_v4  ;;  %v720_v12 = vrot.slane %v719_v56, 4  ;;  %v2630_v54 = vshll.u32 %v8054_v53, 16  ;;  %v715_v15 = vsel %vm7685_vm2, %v710_v7, %v714_v40  ;;  %v5982_v56 = vld [vmem:[%s7661_s10 + $0x24] sm:$0xe] }
  0xa5   : > { %v2617_v18 = vor.u32 %v2616_v10, %v2613_v57  ;;  %v2626_v28 = vrot.slane %v2624_v0, 4  ;;  %v5716_v17 = vcombine.low %v7402_v25, %v8067_v35  ;;  %v5996_v49 = vrot.slane %v5980_v2, 9  ;;  %v7406_v0 = vld [vmem:[%s7661_s10 + $0xc] sm:$0xf] }
  0xa6   : > { %6717 = vmatprep.mubr.msk.bf16.mxu0 %vm807_vm3, %v5958_v11  ;;  %v725_v38 = vsel %vm7685_vm2, %v720_v12, %v724_v60  ;;  %v2632_v39 = vrot.slane %v2630_v54, 5  ;;  %v3024_v51 = vrot.slane %v3022_v58, 4  ;;  %v5997_v52 = vrot.slane %v5981_v14, 9  ;;  %v8107_v11 = vld [vmem:[%s7661_s10 + $0x10] sm:$0xf] }
  0xa7   : > { %v5695_v41 = vcombine.low %v715_v15, %v725_v38  ;;  %v2618_v43 = vrot.slane %v2617_v18, 4  ;;  %v2627_v40 = vor.u32 %v2626_v28, %v2622_v13  ;;  %v3033_v55 = vsel %vm8073_vm6, %v7729_v27, %v3032_v30  ;;  %v7404_v30 = vld [vmem:[%s7661_s10 + $0x28] sm:$0xf]  ;;  %v7408_v12 = vld [vmem:[%s7661_s10 + $0x18] sm:$0xf] }
  0xa8   : > { %v3023_v61 = vsel %vm8073_vm6, %v5996_v49, %v3022_v58  ;;  %v3026_v3 = vsel %vm8073_vm6, %v3024_v51, %v3025_v1  ;;  %v3030_v27 = vsel %vm8073_vm6, %v5997_v52, %v3029_v16  ;;  %v3036_v19 = vrot.slane %v7404_v30, 5  ;;  %v7405_v1 = vld [vmem:[%s7661_s10 + $0x2c] sm:$0x1]  ;;  %v5983_v14 = vld [vmem:[%s7661_s10 + $0x30] sm:$0xe] }
  0xa9   : > { %6558 = vmatmul.mubr.msk.bf16.gmra.mrb[28].mxu1 %vm807_vm3, %v5695_v41  ;;  %v2623_v60 = vsel %vm7685_vm2, %v2618_v43, %v2622_v13  ;;  %v2628_v57 = vrot.slane %v2627_v40, 4  ;;  %v6020_v58 = vcombine.low %v3023_v61, %v3026_v3  ;;  %v6021_v4 = vcombine.low %v3030_v27, %v3033_v55  ;;  %v8113_v13 = vld [vmem:[%s7661_s10 + $0x1c] sm:$0xf]  ;;  %v7410_v15 = vld [vmem:[%s7661_s10 + $0x34] sm:$0xf]  ;;  %v7351_v28 = vld [vmem:[%s10028_s1 + $0x48] sm:$0xff]  }
  0xaa   : > { %6569 = vmatprep.mubr.msk.bf16.mxu1 %vm807_vm3, %v5716_v17  ;;  %v5998_v20 = vrot.slane %v5982_v56, 9  ;;  %v3038_v10 = vrot.slane %v3036_v19, 4  ;;  %v3039_v62 = vrot.slane %v7405_v1, 5  ;;  %v5717_v16 = vcombine.low %v7406_v0, %v8107_v11  ;;  %v7411_v38 = vld [vmem:[%s7661_s10 + $0x40] sm:$0xf]  ;;  %v7338_v52 = vld [vmem:[%s10028_s1 + $0xc8] sm:$0xff]  }
  0xab   : > { %v2633_v2 = vsel %vm7685_vm2, %v2628_v57, %v2632_v39  ;;  %v5718_v54 = vcombine.low %v7408_v12, %v8113_v13  ;;  %v3043_v18 = vrot.slane %v7410_v15, 5  ;;  %v3050_v39 = vrot.slane %v7411_v38, 5  ;;  %v5984_v41 = vld [vmem:[%s7661_s10 + $0x3c] sm:$0xe]  ;;  %v5985_v43 = vld [vmem:[%s7661_s10 + $0x48] sm:$0xe] }
  0xac   : > { %v5959_v7 = vcombine.low %v2623_v60, %v2633_v2  ;;  %v3037_v25 = vsel %vm8073_vm6, %v5998_v20, %v3036_v19  ;;  %v3040_v17 = vsel %vm8073_vm6, %v3038_v10, %v3039_v62  ;;  %v5999_v40 = vrot.slane %v5983_v14, 9  ;;  %v7412_v49 = vld [vmem:[%s7661_s10 + $0x38] sm:$0x1]  ;;  %v7413_v60 = vld [vmem:[%s7661_s10 + $0x4c] sm:$0xf]  ;;  %v7354_v19 = vld [vmem:[%s10028_s1 + $0x50] sm:$0xff]  }
  0xad   : > { %v3046_v51 = vrot.slane %v7412_v49, 5  ;;  %v6022_v55 = vcombine.low %v3037_v25, %v3040_v17  ;;  %v3045_v56 = vrot.slane %v3043_v18, 4  ;;  %v3057_v57 = vrot.slane %v7413_v60, 5  ;;  %v7414_v27 = vld [vmem:[%s7661_s10 + $0x44] sm:$0x1]  ;;  %v7343_v17 = vld [vmem:[%s10028_s1 + $0xd0] sm:$0xff]  }
  0xae   : > { %6718 = vmatmul.mubr.msk.bf16.gmra.mrb[28].mxu0 %vm807_vm3, %v5959_v7  ;;  %v6000_v61 = vrot.slane %v5984_v41, 9  ;;  %v3052_v3 = vrot.slane %v3050_v39, 4  ;;  %v3053_v30 = vrot.slane %v7414_v27, 5  ;;  %v7415_v2 = vld [vmem:[%s7661_s10 + $0x24] sm:$0xf]  ;;  %v6001_v62 = vrot.slane %v5985_v43, 9 }
  0xaf   : > { %6729 = vmatprep.mubr.msk.bf16.mxu0 %vm807_vm3, %v6020_v58  ;;  %v8143_v58 = vld [vmem:[%s7661_s10 + $0x28] sm:$0xf]  ;;  %v5986_v20 = vld [vmem:[%s7661_s10 + $0x54] sm:$0xe]  ;;  %v7417_v7 = vld [vmem:[%s7661_s10 + $0x30] sm:$0xf] }
  0xb0   : > { %v8150_v10 = vld [vmem:[%s7661_s10 + $0x34] sm:$0xf]  ;;  %v7419_v0 = vld [vmem:[%s7661_s10 + $0x58] sm:$0xf]  ;;  %v7420_v12 = vld [vmem:[%s10028_s1 + $0xc0] sm:$0xff]   ;;  %v3059_v14 = vrot.slane %v3057_v57, 4  ;;  %v3051_v38 = vsel %vm8073_vm6, %v6000_v61, %v3050_v39  ;;  %v3054_v41 = vsel %vm8073_vm6, %v3052_v3, %v3053_v30  ;;  %v8195_v30 = vsel %vm8073_vm6, %v6001_v62, %v3057_v57 }
  0xb1   : > { %6570 = vmatmul.mubr.msk.bf16.vlgmr.msra.gmra.mrb[0].mxu1 %vm807_vm3, %v5717_v16  ;;  %v5720_v1 = vcombine.low %v7417_v7, %v8150_v10  ;;  %v3064_v16 = vrot.slane %v7419_v0, 5  ;;  %v7421_v15 = vld [vmem:[%s7661_s10 + $0x50] sm:$0x1]  ;;  %v8164_v25 = vld [vmem:[%s7661_s10 + $0x60] sm:$0xe]  ;;  %v6002_v43 = vrot.slane %v5986_v20, 9 }
  0xb2   : > { %6573 = vmatprep.mubr.msk.bf16.mxu1 %vm807_vm3, %v5718_v54  ;;  %6602 = vmatpush3.bf16.msra.mxu1 %v7855_v8  ;;  %v5719_v8 = vcombine.low %v7415_v2, %v8143_v58  ;;  %v3047_v54 = vsel %vm8073_vm6, %v3045_v56, %v3046_v51  ;;  %v7423_v51 = vld [vmem:[%s7661_s10 + $0x3c] sm:$0xf]  ;;  %v7425_v56 = vld [vmem:[%s7661_s10 + $0x48] sm:$0xf]  ;;  %v8188_v60 = vld [vmem:[%s7661_s10 + $0x4c] sm:$0xf] }
  0xb3   : > { %6603 = vmatprep.subr.bf16.mxu1 %v7351_v28  ;;  %v5722_v61 = vcombine.low %v7425_v56, %v8188_v60  ;;  %v5991_v3 = vld [vmem:[%s7661_s10 + $0x90] sm:$0xe]  ;;  %v3066_v2 = vrot.slane %v3064_v16, 4  ;;  %v8199_v7 = vld [vmem:[%s7661_s10 + $0x6c] sm:$0xe]  ;;  %v7348_v62 = vld [vmem:[%s10028_s1 + $0xd8] sm:$0xff]  }
  0xb4   : > { %v5992_v0 = vld [vmem:[%s7661_s10 + $0x9c] sm:$0xe]  ;;  %v5994_v57 = vld [vmem:[%s7661_s10 + $0xb4] sm:$0xe] }
  0xb5   : > { %v6008_v56 = vrot.slane %v5992_v0, 9  ;;  %v3113_v0 = vrot.slane %v7983_v9, 5 }
  0xb6   : > { %6730 = vmatmul.mubr.msk.bf16.vlgmr.msra.gmra.mrb[0].mxu0 %vm807_vm3, %v6021_v4  ;;  %6604 = vmatpush3.bf16.msra.mxu1 %v7351_v28  ;;  %v3044_v4 = vsel %vm8073_vm6, %v5999_v40, %v3043_v18  ;;  %v3060_v28 = vrot.slane %v7421_v15, 5  ;;  %v7355_v18 = vld [vmem:[%s10028_s1 + $0x58] sm:$0xff]   ;;  %v8177_v40 = vld [vmem:[%s7661_s10 + $0x64] sm:$0xf] }
  0xb7   : > { %6762 = vmatpush3.bf16.msra.mxu0 %v7420_v12  ;;  %6733 = vmatprep.mubr.msk.bf16.mxu0 %vm807_vm3, %v6022_v55  ;;  %v3071_v49 = vrot.slane %v8177_v40, 5  ;;  %v8183_v55 = vld [vmem:[%s7661_s10 + $0x40] sm:$0xf]  ;;  %v6023_v27 = vcombine.low %v3044_v4, %v3047_v54  ;;  %v6024_v12 = vcombine.low %v3051_v38, %v3054_v41  ;;  %v8208_v4 = vld [vmem:[%s7661_s10 + $0x68] sm:$0x1] }
  0xb8   : > { %6763 = vmatprep.subr.bf16.mxu0 %v7338_v52  ;;  %6605 = vmatprep.subr.bf16.mxu1 %v7354_v19  ;;  %v5721_v39 = vcombine.low %v7423_v51, %v8183_v55  ;;  %v8204_v15 = vsel %vm8073_vm6, %v3059_v14, %v3060_v28  ;;  %v5993_v54 = vld [vmem:[%s7661_s10 + $0xa8] sm:$0xe]  ;;  %v6007_v14 = vrot.slane %v5991_v3, 9  ;;  %v3099_v28 = vrot.slane %v7924_v36, 5  ;;  %v8225_v38 = vld [vmem:[%s10028_s1 + $0x60] sm:$0xff]  }
  0xb9   : > { %6574 = vmatmul.mubr.msk.bf16.gmra.mrb[4].mxu1 %vm807_vm3, %v5719_v8  ;;  %v7427_v8 = vld [vmem:[%s7661_s10 + $0x5c] sm:$0x1]  ;;  %v8229_v51 = vld [vmem:[%s7661_s10 + $0x70] sm:$0xf]  ;;  %v3081_v36 = vrot.slane %v7862_v22, 5 }
  0xba   : > { %6577 = vmatprep.mubr.msk.bf16.mxu1 %vm807_vm3, %v5720_v1  ;;  %v3067_v20 = vrot.slane %v7427_v8, 5  ;;  %6606 = vmatpush3.bf16.msra.mxu1 %v7354_v19  ;;  %v6003_v1 = vrot.slane %v8164_v25, 9  ;;  %v8217_v19 = vsel %vm8073_vm6, %v6002_v43, %v3064_v16  ;;  %v3078_v16 = vrot.slane %v8229_v51, 5  ;;  %v7434_v25 = vld [vmem:[%s7661_s10 + $0x7c] sm:$0xf] }
  0xbb   : > { %6764 = vmatpush3.bf16.msra.mxu0 %v7338_v52  ;;  %6607 = vmatprep.subr.bf16.mxu1 %v7355_v18  ;;  %v3073_v52 = vrot.slane %v3071_v49, 4  ;;  %v3102_v43 = vrot.slane %v7927_v37, 5  ;;  %v8239_v8 = vsel %vm8073_vm6, %v6007_v14, %v3099_v28  ;;  %v3101_v41 = vrot.slane %v3099_v28, 4  ;;  %v5995_v14 = vld [vmem:[%s7661_s10 + $0xc0] sm:$0xe] }
  0xbc   : > { %6765 = vmatprep.subr.bf16.mxu0 %v7343_v17  ;;  %v3068_v3 = vsel %vm8073_vm6, %v3066_v2, %v3067_v20  ;;  %v6025_v37 = vcombine.low %v8195_v30, %v8204_v15  ;;  %v3109_v2 = vrot.slane %v7958_v31, 5  ;;  %v6009_v20 = vrot.slane %v5993_v54, 9  ;;  %v8257_v30 = vld [vmem:[%s10028_s1 + $0xe0] sm:$0xff]  }
  0xbd   : > { %v8249_v22 = vsel %vm8073_vm6, %v3101_v41, %v3102_v43  ;;  %v3120_v15 = vrot.slane %v8013_v6, 5  ;;  %v3080_v54 = vrot.slane %v3078_v16, 4  ;;  %v3123_v28 = vrot.slane %v8020_v26, 5  ;;  %v8294_v26 = vld [vmem:[%s7661_s10 + $0x58] sm:$0xf] }
  0xbe   : > { %6734 = vmatmul.mubr.msk.bf16.gmra.mrb[4].mxu0 %vm807_vm3, %v6023_v27  ;;  %6608 = vmatpush3.bf16.msra.mxu1 %v7355_v18  ;;  %v3106_v27 = vrot.slane %v7954_v23, 5  ;;  %v3116_v18 = vrot.slane %v7989_v21, 5  ;;  %v6026_v23 = vcombine.low %v8217_v19, %v3068_v3  ;;  %v6031_v31 = vcombine.low %v8239_v8, %v8249_v22  ;;  %v1332_v22 = vld [vmem:[%s7661_s10 + $0x18] sm:$0xe] }
  0xbf   : > { %6737 = vmatprep.mubr.msk.bf16.mxu0 %vm807_vm3, %v6024_v12  ;;  %6766 = vmatpush3.bf16.msra.mxu0 %v7343_v17  ;;  %v8271_v17 = vsel %vm8073_vm6, %v6009_v20, %v3113_v0  ;;  %v3115_v12 = vrot.slane %v3113_v0, 4  ;;  %v3122_v43 = vrot.slane %v3120_v15, 4  ;;  %v3072_v20 = vsel %vm8073_vm6, %v6003_v1, %v3071_v49 }
  0xc0   : > { %6767 = vmatprep.subr.bf16.mxu0 %v7348_v62  ;;  %6641 = vmatprep.subr.bf16.mxu1 %v8225_v38  ;;  %v8266_v9 = vsel %vm8073_vm6, %v6008_v56, %v3106_v27  ;;  %v3108_v21 = vrot.slane %v3106_v27, 4  ;;  %v3127_v27 = vrot.slane %v8048_v24, 5  ;;  %v10052_v0 = vrot.slane %v8208_v4, 5  ;;  %v8314_v24 = vld [vmem:[%s7661_s10 + $0x64] sm:$0xf] }
  0xc1   : > { %6578 = vmatmul.mubr.msk.bf16.gmra.mrb[8].mxu1 %vm807_vm3, %v5721_v39  ;;  %v6010_v39 = vrot.slane %v5994_v57, 9  ;;  %v8285_v57 = vsel %vm8073_vm6, %v3115_v12, %v3116_v18  ;;  %v3085_v40 = vrot.slane %v7434_v25, 5  ;;  %v5989_v12 = vld [vmem:[%s7661_s10 + $0x78] sm:$0xe]  ;;  %v1397_v8 = vrot.slane %v8113_v13, 5 }
  0xc2   : > { %6581 = vmatprep.mubr.msk.bf16.mxu1 %vm807_vm3, %v5722_v61  ;;  %v8278_v19 = vsel %vm8073_vm6, %v3108_v21, %v3109_v2  ;;  %v6011_v61 = vrot.slane %v5995_v14, 9  ;;  %v6033_v3 = vcombine.low %v8271_v17, %v8285_v57  ;;  %v3130_v2 = vrot.slane %v8054_v53, 5  ;;  %v7432_v14 = vld [vmem:[%s7661_s10 + $0x60] sm:$0xf]  ;;  %v7443_v57 = vld [vmem:[%s7661_s10 + $0x2c] sm:$0x1] }
  0xc3   : > { %6768 = vmatpush3.bf16.msra.mxu0 %v7348_v62  ;;  %v6032_v41 = vcombine.low %v8266_v9, %v8278_v19  ;;  %v8289_v6 = vsel %vm8073_vm6, %v6010_v39, %v3120_v15  ;;  %v7430_v62 = vld [vmem:[%s7661_s10 + $0x54] sm:$0xf]  ;;  %v3075_v18 = vsel %vm8073_vm6, %v3073_v52, %v10052_v0  ;;  %v5724_v53 = vcombine.low %v7432_v14, %v8314_v24  ;;  %v5990_v15 = vld [vmem:[%s7661_s10 + $0x84] sm:$0xe]  ;;  %v7438_v0 = vld [vmem:[%s7661_s10 + $0x78] sm:$0xf] }
  0xc4   : > { %6801 = vmatprep.subr.bf16.mxu0 %v8257_v30  ;;  %v5723_v56 = vcombine.low %v7430_v62, %v8294_v26  ;;  %v8327_v1 = vsel %vm8073_vm6, %v6011_v61, %v3127_v27  ;;  %v3129_v4 = vrot.slane %v3127_v27, 4  ;;  %v10053_v52 = vrot.slane %v8199_v7, 9  ;;  %v7436_v27 = vld [vmem:[%s7661_s10 + $0x6c] sm:$0xf]  ;;  %v7441_v19 = vld [vmem:[%s7661_s10 + $0x14] sm:$0x1] }
  0xc5   : > { %v3092_v39 = vrot.slane %v7893_v46, 5  ;;  %v6027_v7 = vcombine.low %v3072_v20, %v3075_v18  ;;  %v7435_v46 = vld [vmem:[%s7661_s10 + $0x80] sm:$0x1]  ;;  %v8358_v18 = vld [vmem:[%s7661_s10 + $0x7c] sm:$0xf]  ;;  %v1404_v9 = vrot.slane %v8143_v58, 5 }
  0xc6   : > { %6738 = vmatmul.mubr.msk.bf16.gmra.mrb[8].mxu0 %vm807_vm3, %v6025_v37  ;;  %v8319_v37 = vsel %vm8073_vm6, %v3122_v43, %v3123_v28  ;;  %v3079_v21 = vsel %vm8073_vm6, %v10053_v52, %v3078_v16  ;;  %v8343_v28 = vsel %vm8073_vm6, %v3129_v4, %v3130_v2  ;;  %v3088_v61 = vrot.slane %v7435_v46, 5  ;;  %v8352_v2 = vld [vmem:[%s7661_s10 + $0x70] sm:$0xf] }
  0xc7   : > { %6741 = vmatprep.mubr.msk.bf16.mxu0 %vm807_vm3, %v6026_v23  ;;  %v6034_v49 = vcombine.low %v8289_v6, %v8319_v37  ;;  %v3082_v23 = vsel %vm8073_vm6, %v3080_v54, %v3081_v36  ;;  %v6035_v51 = vcombine.low %v8327_v1, %v8343_v28  ;;  %v6005_v36 = vrot.slane %v5989_v12, 9 }
  0xc8   : > { %v6028_v16 = vcombine.low %v3079_v21, %v3082_v23  ;;  %v3087_v54 = vrot.slane %v3085_v40, 4  ;;  %v6006_v43 = vrot.slane %v5990_v15, 9  ;;  %v3094_v62 = vrot.slane %v3092_v39, 4 }
  0xc9   : > { %6582 = vmatmul.mubr.msk.bf16.gmra.mrb[12].mxu1 %vm807_vm3, %v5723_v56  ;;  %v3095_v56 = vrot.slane %v7901_v59, 5  ;;  %v5725_v20 = vcombine.low %v7436_v27, %v8352_v2  ;;  %v5726_v14 = vcombine.low %v7438_v0, %v8358_v18  ;;  %v5727_v23 = vcombine.low %v7905_v63, %v7908_v5  ;;  %v7440_v5 = vld [vmem:[%s7661_s10 + $0x8] sm:$0x1]  ;;  %v7444_v27 = vld [vmem:[%s7661_s10 + $0x38] sm:$0x1] }
  0xca   : > { %6585 = vmatprep.mubr.msk.bf16.mxu1 %vm807_vm3, %v5724_v53  ;;  %v3086_v53 = vsel %vm8073_vm6, %v6005_v36, %v3085_v40  ;;  %v3089_v59 = vsel %vm8073_vm6, %v3087_v54, %v3088_v61  ;;  %v3093_v25 = vsel %vm8073_vm6, %v6006_v43, %v3092_v39  ;;  %v5728_v40 = vcombine.low %v7930_v42, %v7936_v48  ;;  %v1330_v39 = vld [vmem:[%s7661_s10] sm:$0xe]  ;;  %v1335_v36 = vld [vmem:[%s7661_s10 + $0x3c] sm:$0xe] }
  0xcb   : > { %v3096_v4 = vsel %vm8073_vm6, %v3094_v62, %v3095_v56  ;;  %v6029_v52 = vcombine.low %v3086_v53, %v3089_v59  ;;  %v1383_v12 = vrot.slane %v8067_v35, 5  ;;  %v5729_v15 = vcombine.low %v7961_v32, %v7968_v44  ;;  %v1331_v35 = vld [vmem:[%s7661_s10 + $0xc] sm:$0xe]  ;;  %v7356_v59 = vld [vmem:[%s7661_s10 + $0x18] sm:$0xff]  }
  0xcc   : > { %v6030_v21 = vcombine.low %v3093_v25, %v3096_v4  ;;  %v5730_v63 = vcombine.low %v7994_v33, %v8002_v47  ;;  %v1386_v42 = vrot.slane %v7440_v5, 5  ;;  %v5752_v48 = vrot.slane %v1330_v39, 9 }
  0xcd   : > { %v1385_v32 = vrot.slane %v1383_v12, 4  ;;  %v1390_v44 = vrot.slane %v8107_v11, 5  ;;  %v5731_v11 = vcombine.low %v8023_v34, %v8032_v50  ;;  %v5753_v54 = vrot.slane %v1331_v35, 9  ;;  %v7446_v35 = vld [vmem:[%s7661_s10 + $0x50] sm:$0x1] }
  0xce   : > { %6742 = vmatmul.mubr.msk.bf16.gmra.mrb[12].mxu0 %vm807_vm3, %v6027_v7  ;;  %v1384_v33 = vsel %vm8073_vm6, %v5752_v48, %v1383_v12  ;;  %v1334_v7 = vld [vmem:[%s7661_s10 + $0x30] sm:$0xe]  ;;  %v1418_v58 = vrot.slane %v8183_v55, 5  ;;  %v5754_v34 = vrot.slane %v1332_v22, 9  ;;  %v1399_v61 = vrot.slane %v1397_v8, 4 }
  0xcf   : > { %6745 = vmatprep.mubr.msk.bf16.mxu0 %vm807_vm3, %v6028_v16  ;;  %v1387_v47 = vsel %vm8073_vm6, %v1385_v32, %v1386_v42  ;;  %v1411_v16 = vrot.slane %v8150_v10, 5  ;;  %v1392_v46 = vrot.slane %v1390_v44, 4  ;;  %v7442_v10 = vld [vmem:[%s7661_s10 + $0x20] sm:$0x1]  ;;  %v1406_v17 = vrot.slane %v1404_v9, 4 }
  0xd0   : > { %v5776_v13 = vcombine.low %v1384_v33, %v1387_v47  ;;  %v1400_v43 = vrot.slane %v7442_v10, 5  ;;  %v5756_v56 = vrot.slane %v1334_v7, 9  ;;  %v5757_v6 = vrot.slane %v1335_v36, 9  ;;  %v7448_v7 = vld [vmem:[%s7661_s10 + $0x88] sm:$0xf] }
  0xd1   : > { %6586 = vmatmul.mubr.msk.bf16.gmra.mrb[16].mxu1 %vm807_vm3, %v5725_v20  ;;  %v1413_v55 = vrot.slane %v1411_v16, 4  ;;  %v1414_v20 = vrot.slane %v7444_v27, 5  ;;  %v1391_v37 = vsel %vm8073_vm6, %v5753_v54, %v1390_v44  ;;  %v1420_v0 = vrot.slane %v1418_v58, 4  ;;  %v1339_v44 = vld [vmem:[%s7661_s10 + $0x6c] sm:$0xe]  ;;  %v7358_v36 = vld [vmem:[%s7661_s10 + $0x24] sm:$0xff]  }
  0xd2   : > { %6589 = vmatprep.mubr.msk.bf16.mxu1 %vm807_vm3, %v5726_v14  ;;  %v7445_v14 = vld [vmem:[%s7661_s10 + $0x44] sm:$0x1]  ;;  %v1398_v25 = vsel %vm8073_vm6, %v5754_v34, %v1397_v8  ;;  %v1401_v4 = vsel %vm8073_vm6, %v1399_v61, %v1400_v43  ;;  %v8448_v12 = vsel %vm8073_vm6, %v5756_v56, %v1411_v16  ;;  %v8462_v42 = vsel %vm8073_vm6, %v5757_v6, %v1418_v58  ;;  %v7359_v34 = vld [vmem:[%s7661_s10 + $0x30] sm:$0xff]  }
  0xd3   : > { %v1421_v53 = vrot.slane %v7445_v14, 5  ;;  %v8452_v39 = vsel %vm8073_vm6, %v1413_v55, %v1414_v20  ;;  %v5778_v5 = vcombine.low %v1398_v25, %v1401_v4  ;;  %v1432_v32 = vrot.slane %v8294_v26, 5  ;;  %v7375_v26 = vld [vmem:[%s10028_s1 + $0x68] sm:$0xff]   ;;  %v7450_v43 = vld [vmem:[%s7661_s10 + $0x74] sm:$0x1] }
  0xd4   : > { %v1446_v33 = vrot.slane %v8352_v2, 5  ;;  %v5780_v47 = vcombine.low %v8448_v12, %v8452_v39  ;;  %v1428_v8 = vrot.slane %v7446_v35, 5  ;;  %v1460_v16 = vrot.slane %v7448_v7, 5  ;;  %v7377_v20 = vld [vmem:[%s10028_s1 + $0x70] sm:$0xff]  }
  0xd5   : > { %v8466_v48 = vsel %vm8073_vm6, %v1420_v0, %v1421_v53  ;;  %v5761_v58 = vrot.slane %v1339_v44, 9  ;;  %v7452_v0 = vld [vmem:[%s7661_s10 + $0x8c] sm:$0x1]  ;;  %v1342_v53 = vld [vmem:[%s7661_s10 + $0x90] sm:$0xe] }
  0xd6   : > { %6746 = vmatmul.mubr.msk.bf16.gmra.mrb[16].mxu0 %vm807_vm3, %v6029_v52  ;;  %v1448_v10 = vrot.slane %v1446_v33, 4  ;;  %v1463_v14 = vrot.slane %v7452_v0, 5 }
  0xd7   : > { %6749 = vmatprep.mubr.msk.bf16.mxu0 %vm807_vm3, %v6030_v21 }
  0xd9   : > { %6590 = vmatmul.mubr.msk.bf16.gmra.mrb[20].mxu1 %vm807_vm3, %v5727_v23  ;;  %v1336_v23 = vld [vmem:[%s7661_s10 + $0x48] sm:$0xe] }
  0xda   : > { %6593 = vmatprep.mubr.msk.bf16.mxu1 %vm807_vm3, %v5728_v40  ;;  %v5758_v28 = vrot.slane %v1336_v23, 9  ;;  %v8529_v23 = vsel %vm8073_vm6, %v5761_v58, %v1446_v33  ;;  %v7372_v58 = vld [vmem:[%s10028_s1 + $0xf8] sm:$0xff]  }
  0xde   : > { %6750 = vmatmul.mubr.msk.bf16.gmra.mrb[20].mxu0 %vm807_vm3, %v6031_v31  ;;  %v1333_v31 = vld [vmem:[%s7661_s10 + $0x24] sm:$0xe] }
  0xdf   : > { %6753 = vmatprep.mubr.msk.bf16.mxu0 %vm807_vm3, %v6032_v41  ;;  %v1393_v41 = vrot.slane %v7441_v19, 5  ;;  %v5755_v62 = vrot.slane %v1333_v31, 9  ;;  %v1340_v31 = vld [vmem:[%s7661_s10 + $0x78] sm:$0xe]  ;;  %v7447_v19 = vld [vmem:[%s7661_s10 + $0x5c] sm:$0x1] }
  0xe1   : > { %6594 = vmatmul.mubr.msk.bf16.gmra.mrb[24].mxu1 %vm807_vm3, %v5729_v15  ;;  %v8439_v52 = vsel %vm8073_vm6, %v5755_v62, %v1404_v9  ;;  %v1425_v15 = vrot.slane %v8188_v60, 5  ;;  %v1338_v60 = vld [vmem:[%s7661_s10 + $0x60] sm:$0xe]  ;;  %v1453_v9 = vrot.slane %v8358_v18, 5  ;;  %v7449_v18 = vld [vmem:[%s7661_s10 + $0x68] sm:$0x1] }
  0xe2   : > { %6597 = vmatprep.mubr.msk.bf16.mxu1 %vm807_vm3, %v5730_v63  ;;  %v1337_v63 = vld [vmem:[%s7661_s10 + $0x54] sm:$0xe]  ;;  %v5760_v54 = vrot.slane %v1338_v60, 9  ;;  %v1449_v62 = vrot.slane %v7450_v43, 5 }
  0xe3   : > { %v5759_v22 = vrot.slane %v1337_v63, 9  ;;  %v1427_v2 = vrot.slane %v1425_v15, 4  ;;  %v1455_v56 = vrot.slane %v1453_v9, 4 }
  0xe4   : > { %v8540_v63 = vsel %vm8073_vm6, %v1448_v10, %v1449_v62  ;;  %v6134_v10 = vld [vmem:[%s7661_s10 + $0x20] sm:$0x1] }
  0xe5   : > { %v8509_v6 = vsel %vm8073_vm6, %v1427_v2, %v1428_v8  ;;  %v7360_v2 = vld [vmem:[%s7661_s10 + $0x3c] sm:$0xff]   ;;  %v5785_v12 = vcombine.low %v8529_v23, %v8540_v63 }
  0xe6   : > { %6754 = vmatmul.mubr.msk.bf16.gmra.mrb[24].mxu0 %vm807_vm3, %v6033_v3  ;;  %v1407_v3 = vrot.slane %v7443_v57, 5  ;;  %v7362_v57 = vld [vmem:[%s10028_s1 + $0xe8] sm:$0xff]  }
  0xe7   : > { %6757 = vmatprep.mubr.msk.bf16.mxu0 %vm807_vm3, %v6034_v49  ;;  %v1394_v49 = vsel %vm8073_vm6, %v1392_v46, %v1393_v41  ;;  %v1435_v41 = vrot.slane %v7447_v19, 5  ;;  %v1442_v46 = vrot.slane %v7449_v18, 5 }
  0xe8   : > { %v8443_v21 = vsel %vm8073_vm6, %v1406_v17, %v1407_v3  ;;  %v5777_v40 = vcombine.low %v1391_v37, %v1394_v49  ;;  %v5762_v17 = vrot.slane %v1340_v31, 9  ;;  %v8501_v3 = vsel %vm8073_vm6, %v5758_v28, %v1425_v15  ;;  %v1343_v28 = vld [vmem:[%s7661_s10 + $0x9c] sm:$0xe] }
  0xe9   : > { %6598 = vmatmul.mubr.msk.bf16.gmra.mrb[28].mxu1 %vm807_vm3, %v5731_v11  ;;  %v5779_v1 = vcombine.low %v8439_v52, %v8443_v21  ;;  %v1341_v11 = vld [vmem:[%s7661_s10 + $0x84] sm:$0xe]  ;;  %v8513_v37 = vsel %vm8073_vm6, %v5759_v22, %v1432_v32  ;;  %v1462_v49 = vrot.slane %v1460_v16, 4  ;;  %v5782_v52 = vcombine.low %v8501_v3, %v8509_v6 }
  0xea   : > { %6609 = vmatprep.mubr.msk.bf16.mxu1 %vm807_vm3, %v5776_v13  ;;  %v1434_v13 = vrot.slane %v1432_v32, 4  ;;  %v5763_v27 = vrot.slane %v1341_v11, 9  ;;  %v7453_v32 = vld [vmem:[%s7661_s10 + $0x94] sm:$0xf]  ;;  %v5765_v19 = vrot.slane %v1343_v28, 9  ;;  %v7361_v11 = vld [vmem:[%s7661_s10 + $0x48] sm:$0xff]  }
  0xeb   : > { %v1467_v60 = vrot.slane %v7453_v32, 5  ;;  %v8568_v8 = vsel %vm8073_vm6, %v1462_v49, %v1463_v14  ;;  %v7456_v49 = vld [vmem:[%s7661_s10 + $0xa4] sm:$0x1]  ;;  %v7458_v32 = vld [vmem:[%s7661_s10 + $0xb0] sm:$0x1]  ;;  %v1488_v28 = vrot.slane %v8032_v50, 5 }
  0xec   : > { %v8521_v25 = vsel %vm8073_vm6, %v1434_v13, %v1435_v41  ;;  %v8560_v33 = vsel %vm8073_vm6, %v5763_v27, %v1460_v16  ;;  %v6135_v41 = vld [vmem:[%s7661_s10 + $0x24] sm:$0xf]  ;;  %v7455_v16 = vld [vmem:[%s7661_s10 + $0xa0] sm:$0xf]  ;;  %v6136_v13 = vld [vmem:[%s7661_s10 + $0x28] sm:$0xf] }
  0xed   : > { %v5783_v21 = vcombine.low %v8513_v37, %v8521_v25  ;;  %v1469_v39 = vrot.slane %v1467_v60, 4  ;;  %v5787_v18 = vcombine.low %v8560_v33, %v8568_v8  ;;  %v6138_v27 = vld [vmem:[%s7661_s10 + $0x30] sm:$0xf]  ;;  %v1477_v0 = vrot.slane %v7456_v49, 5  ;;  %v6137_v50 = vld [vmem:[%s7661_s10 + $0x2c] sm:$0x1] }
  0xee   : > { %6758 = vmatmul.mubr.msk.bf16.gmra.mrb[28].mxu0 %vm807_vm3, %v6035_v51  ;;  %v1439_v51 = vrot.slane %v8314_v24, 5  ;;  %v5781_v24 = vcombine.low %v8462_v42, %v8466_v48  ;;  %v7364_v42 = vld [vmem:[%s7661_s10 + $0x60] sm:$0xff]  }
  0xef   : > { %6769 = vmatprep.mubr.msk.bf16.mxu0 %vm807_vm3, %v7356_v59  ;;  %v6132_v59 = vld [vmem:[%s7661_s10 + $0x18] sm:$0xf] }
  0xf0   : > { %v1441_v61 = vrot.slane %v1439_v51, 4  ;;  %v8525_v4 = vsel %vm8073_vm6, %v5760_v54, %v1439_v51  ;;  %v7367_v51 = vld [vmem:[%s10028_s1 + $0xf0] sm:$0xff]   ;;  %v3890_v35 = vshrl.u32 %v6132_v59, 16  ;;  %v3893_v22 = vshll.u32 %v6132_v59, 16  ;;  %v7457_v59 = vld [vmem:[%s7661_s10 + $0xac] sm:$0xf] }
  0xf1   : > { %6610 = vmatmul.mubr.msk.bf16.vlgmr.msra.gmra.mrb[0].mxu1 %vm807_vm3, %v5777_v40  ;;  %v6133_v40 = vld [vmem:[%s7661_s10 + $0x1c] sm:$0xf] }
  0xf2   : > { %6613 = vmatprep.mubr.msk.bf16.mxu1 %vm807_vm3, %v5778_v5  ;;  %6642 = vmatpush3.bf16.msra.mxu1 %v8225_v38  ;;  %v7451_v38 = vld [vmem:[%s7661_s10 + $0x80] sm:$0x1]  ;;  %v8536_v15 = vsel %vm8073_vm6, %v1441_v61, %v1442_v46  ;;  %v8544_v5 = vsel %vm8073_vm6, %v5762_v17, %v1453_v9  ;;  %v3899_v31 = vshll.u32 %v6133_v40, 16  ;;  %v3903_v9 = vshrl.u32 %v6133_v40, 16 }
  0xf3   : > { %6643 = vmatprep.subr.bf16.mxu1 %v7375_v26  ;;  %v1456_v55 = vrot.slane %v7451_v38, 5  ;;  %v3892_v61 = vrot.slane %v3890_v35, 4  ;;  %v3895_v43 = vrot.slane %v3893_v22, 5  ;;  %v3923_v38 = vshll.u32 %v6136_v13, 16  ;;  %v1345_v35 = vld [vmem:[%s7661_s10 + $0xb4] sm:$0xe] }
  0xf4   : > { %v8603_v62 = vrot.slane %v3899_v31, 5  ;;  %v3905_v17 = vrot.slane %v3903_v9, 4  ;;  %v1481_v40 = vrot.slane %v7457_v59, 5 }
  0xf5   : > { %v8556_v44 = vsel %vm8073_vm6, %v1455_v56, %v1456_v55  ;;  %v3917_v56 = vshll.u32 %v6135_v41, 16  ;;  %v3927_v55 = vshrl.u32 %v6136_v13, 16  ;;  %v3896_v22 = vor.u32 %v3895_v43, %v3892_v61  ;;  %v7459_v13 = vld [vmem:[%s7661_s10 + $0xbc] sm:$0x1] }
  0xf6   : > { %6770 = vmatmul.mubr.msk.bf16.vlgmr.msra.gmra.mrb[0].mxu0 %vm807_vm3, %v7358_v36  ;;  %6644 = vmatpush3.bf16.msra.mxu1 %v7375_v26  ;;  %v5764_v26 = vrot.slane %v1342_v53, 9  ;;  %v1474_v36 = vrot.slane %v7455_v16, 5  ;;  %v5786_v54 = vcombine.low %v8544_v5, %v8556_v44  ;;  %v8621_v53 = vld [vmem:[%s10028_s1 + $0x100] sm:$0xff]   ;;  %v3906_v31 = vor.u32 %v3905_v17, %v8603_v62  ;;  %v6141_v61 = vld [vmem:[%s7661_s10 + $0x3c] sm:$0xf] }
  0xf7   : > { %6802 = vmatpush3.bf16.msra.mxu0 %v8257_v30  ;;  %6773 = vmatprep.mubr.msk.bf16.mxu0 %vm807_vm3, %v7359_v34  ;;  %v7379_v30 = vld [vmem:[%s10028_s1 + $0x78] sm:$0xff]   ;;  %v8600_v34 = vld [vmem:[%s7661_s10 + $0xa8] sm:$0xe]  ;;  %10054 = vst [vmem:[#allocation5_spill] sm:$0xff] %v8621_v53  ;;  %v5767_v16 = vrot.slane %v1345_v35, 9  ;;  %v3962_v59 = vshrl.u32 %v6141_v61, 16 }
  0xf8   : > { %6803 = vmatprep.subr.bf16.mxu0 %v7362_v57  ;;  %6645 = vmatprep.subr.bf16.mxu1 %v7377_v20  ;;  %v8594_v46 = vsel %vm8073_vm6, %v5764_v26, %v1467_v60  ;;  %v8608_v3 = vsel %vm8073_vm6, %v5765_v19, %v1474_v36  ;;  %v1476_v6 = vrot.slane %v1474_v36, 4  ;;  %v5766_v14 = vrot.slane %v8600_v34, 9  ;;  %v7363_v26 = vld [vmem:[%s7661_s10 + $0x54] sm:$0xff]  }
  0xf9   : > { %6614 = vmatmul.mubr.msk.bf16.gmra.mrb[4].mxu1 %vm807_vm3, %v5779_v1  ;;  %v5784_v1 = vcombine.low %v8525_v4, %v8536_v15  ;;  %v1484_v60 = vrot.slane %v7458_v32, 5  ;;  %v3919_v19 = vrot.slane %v3917_v56, 5  ;;  %v1490_v36 = vrot.slane %v1488_v28, 4 }
  0xfa   : > { %6617 = vmatprep.mubr.msk.bf16.mxu1 %vm807_vm3, %v5780_v47  ;;  %6646 = vmatpush3.bf16.msra.mxu1 %v7377_v20  ;;  %v7454_v47 = vld [vmem:[%s7661_s10 + $0x98] sm:$0x1]  ;;  %v1491_v34 = vrot.slane %v7459_v13, 5  ;;  %v3907_v43 = vrot.slane %v3906_v31, 4  ;;  %v3965_v32 = vshll.u32 %v6141_v61, 16  ;;  %v8673_v35 = vsel %vm8073_vm6, %v5767_v16, %v1488_v28 }
  0xfb   : > { %6804 = vmatpush3.bf16.msra.mxu0 %v7362_v57  ;;  %v1470_v7 = vrot.slane %v7454_v47, 5  ;;  %6647 = vmatprep.subr.bf16.mxu1 %v7379_v30  ;;  %v3914_v57 = vshrl.u32 %v6135_v41, 16  ;;  %v8638_v41 = vrot.slane %v3923_v38, 5  ;;  %v8655_v38 = vld [vmem:[%s7661_s10 + $0x38] sm:$0x1] }
  0xfc   : > { %6805 = vmatprep.subr.bf16.mxu0 %v7367_v51  ;;  %v3957_v28 = vshll.u32 %v8655_v38, 16  ;;  %v6144_v31 = vld [vmem:[%s7661_s10 + $0x48] sm:$0xf] }
  0xfd   : > { %v8614_v20 = vsel %vm8073_vm6, %v1469_v39, %v1470_v7  ;;  %v3916_v9 = vrot.slane %v3914_v57, 4  ;;  %v3941_v39 = vshll.u32 %v6138_v27, 16  ;;  %v1483_v7 = vrot.slane %v1481_v40, 4 }
  0xfe   : > { %6774 = vmatmul.mubr.msk.bf16.gmra.mrb[4].mxu0 %vm807_vm3, %v7360_v2  ;;  %6648 = vmatpush3.bf16.msra.mxu1 %v7379_v30  ;;  %v3909_v30 = vshll.u32 %v6134_v10, 16  ;;  %v3938_v2 = vshrl.u32 %v6138_v27, 16  ;;  %v5788_v48 = vcombine.low %v8594_v46, %v8614_v20  ;;  %v3897_v10 = vrot.slane %v3896_v22, 4 }
  0xff   : > { %6777 = vmatprep.mubr.msk.bf16.mxu0 %vm807_vm3, %v7361_v11  ;;  %6806 = vmatpush3.bf16.msra.mxu0 %v7367_v51  ;;  %v8627_v51 = vld [vmem:[%s7661_s10 + $0x34] sm:$0xf]  ;;  %v3929_v11 = vrot.slane %v3927_v55, 4  ;;  %v3933_v57 = vshll.u32 %v6137_v50, 16  ;;  %v3943_v27 = vrot.slane %v3941_v39, 5  ;;  %v8677_v22 = vsel %vm8073_vm6, %v1490_v36, %v1491_v34  ;;  %v7366_v50 = vld [vmem:[%s7661_s10 + $0x78] sm:$0xff]  }
 0x100   : > { %6807 = vmatprep.subr.bf16.mxu0 %v7372_v58  ;;  %v3947_v47 = vshll.u32 %v8627_v51, 16  ;;  %v3911_v17 = vrot.slane %v3909_v30, 5  ;;  %v3940_v55 = vrot.slane %v3938_v2, 4  ;;  %v8665_v30 = vsel %vm8073_vm6, %v5766_v14, %v1481_v40  ;;  %v7365_v2 = vld [vmem:[%s7661_s10 + $0x6c] sm:$0xff]   ;;  %v8718_v36 = vld [vmem:[%s7661_s10 + $0x44] sm:$0x1] }
 0x101   : > { %6618 = vmatmul.mubr.msk.bf16.gmra.mrb[8].mxu1 %vm807_vm3, %v5781_v24  ;;  %v8645_v24 = vsel %vm8073_vm6, %v1476_v6, %v1477_v0  ;;  %v3930_v56 = vor.u32 %v3929_v11, %v8638_v41  ;;  %v8661_v0 = vld [vmem:[%s7661_s10 + $0x40] sm:$0xf]  ;;  %v3902_v14 = vsel %vm7685_vm2, %v3897_v10, %v8603_v62  ;;  %v3964_v11 = vrot.slane %v3962_v59, 4  ;;  %v6147_v34 = vld [vmem:[%s7661_s10 + $0x54] sm:$0xf] }
 0x102   : > { %6621 = vmatprep.mubr.msk.bf16.mxu1 %vm807_vm3, %v5782_v52  ;;  %v3951_v52 = vshrl.u32 %v8627_v51, 16  ;;  %v8658_v6 = vrot.slane %v3947_v47, 5  ;;  %v3912_v40 = vsel %vm7685_vm2, %v3907_v43, %v3911_v17  ;;  %v3971_v62 = vshll.u32 %v8661_v0, 16  ;;  %v8745_v59 = vld [vmem:[%s7661_s10 + $0x64] sm:$0xf] }
 0x103   : > { %6808 = vmatpush3.bf16.msra.mxu0 %v7372_v58  ;;  %v3920_v58 = vor.u32 %v3919_v19, %v3916_v9  ;;  %v8693_v9 = vld [vmem:[%s7661_s10 + $0x4c] sm:$0xf]  ;;  %v8702_v25 = vrot.slane %v3930_v56, 4  ;;  %v3967_v39 = vrot.slane %v3965_v32, 5  ;;  %v3986_v15 = vshrl.u32 %v6144_v31, 16  ;;  %10055 = vst [vmem:[#allocation6_spill] sm:$0xff] %v8745_v59 }
 0x104   : > { %6841 = vmatprep.subr.bf16.mxu0 %v8621_v53  ;;  %v3953_v49 = vrot.slane %v3951_v52, 4  ;;  %v3995_v47 = vshll.u32 %v8693_v9, 16  ;;  %v8715_v16 = vcombine.low %v3902_v14, %v3912_v40  ;;  %v3999_v13 = vshrl.u32 %v8693_v9, 16 }
 0x105   : > { %v8700_v37 = vrot.slane %v3920_v58, 4  ;;  %v8733_v17 = vrot.slane %v3957_v28, 5  ;;  %v6150_v58 = vld [vmem:[%s7661_s10 + $0x60] sm:$0xf]  ;;  %v3988_v32 = vrot.slane %v3986_v15, 4  ;;  %v4010_v28 = vshrl.u32 %v6147_v34, 16 }
 0x106   : > { %6778 = vmatmul.mubr.msk.bf16.gmra.mrb[8].mxu0 %vm807_vm3, %v7363_v26  ;;  %v8669_v26 = vsel %vm8073_vm6, %v1483_v7, %v1484_v60  ;;  %v8688_v60 = vrot.slane %v3933_v57, 5  ;;  %v3954_v19 = vor.u32 %v3953_v49, %v8658_v6  ;;  %v8736_v57 = vld [vmem:[%s7661_s10 + $0x58] sm:$0xf]  ;;  %v8747_v40 = vrot.slane %v3995_v47, 5  ;;  %v6153_v15 = vld [vmem:[%s7661_s10 + $0x6c] sm:$0xf] }
 0x107   : > { %6781 = vmatprep.mubr.msk.bf16.mxu0 %vm807_vm3, %v7364_v42  ;;  %v3975_v42 = vshrl.u32 %v8661_v0, 16  ;;  %v3981_v23 = vshll.u32 %v8718_v36, 16  ;;  %v4034_v63 = vshrl.u32 %v6150_v58, 16 }
 0x108   : > { %v8740_v56 = vrot.slane %v3954_v19, 4  ;;  %v7368_v19 = vld [vmem:[%s7661_s10 + $0x84] sm:$0xff]  }
 0x109   : > { %6622 = vmatmul.mubr.msk.bf16.gmra.mrb[12].mxu1 %vm807_vm3, %v5783_v21  ;;  %v3944_v21 = vor.u32 %v3943_v27, %v3940_v55  ;;  %v3968_v55 = vor.u32 %v3967_v39, %v3964_v11  ;;  %v8742_v27 = vrot.slane %v3971_v62, 5  ;;  %v3977_v49 = vrot.slane %v3975_v42, 4  ;;  %v7369_v39 = vld [vmem:[%s7661_s10 + $0x90] sm:$0xff]  }
 0x10a   : > { %6625 = vmatprep.mubr.msk.bf16.mxu1 %vm807_vm3, %v5784_v1  ;;  %v3989_v1 = vshll.u32 %v6144_v31, 16  ;;  %v8754_v31 = vld [vmem:[%s7661_s10 + $0x50] sm:$0x1]  ;;  %v4019_v62 = vshll.u32 %v8736_v57, 16  ;;  %v4043_v11 = vshll.u32 %v8745_v59, 16  ;;  %v4036_v10 = vrot.slane %v4034_v63, 4 }
 0x10b   : > { %v8731_v43 = vrot.slane %v3944_v21, 4  ;;  %v4013_v21 = vshll.u32 %v6147_v34, 16  ;;  %v3978_v44 = vor.u32 %v3977_v49, %v8742_v27  ;;  %v4012_v34 = vrot.slane %v4010_v28, 4  ;;  %v8788_v49 = vld [vmem:[%s7661_s10 + $0x5c] sm:$0x1] }
 0x10c   : > { %v3991_v14 = vrot.slane %v3989_v1, 5  ;;  %v8777_v1 = vrot.slane %v3968_v55, 4  ;;  %v8784_v61 = vrot.slane %v4019_v62, 5  ;;  %v8790_v52 = vrot.slane %v4043_v11, 5 }
 0x10d   : > { %v4015_v42 = vrot.slane %v4013_v21, 5  ;;  %v8804_v63 = vrot.slane %v3981_v23, 5  ;;  %v7370_v23 = vld [vmem:[%s7661_s10 + $0x9c] sm:$0xff]  }
 0x10e   : > { %6782 = vmatmul.mubr.msk.bf16.gmra.mrb[12].mxu0 %vm807_vm3, %v7365_v2  ;;  %v4001_v2 = vrot.slane %v3999_v13, 4  ;;  %v3992_v47 = vor.u32 %v3991_v14, %v3988_v32  ;;  %v4005_v13 = vshll.u32 %v8754_v31, 16  ;;  %v4058_v32 = vshrl.u32 %v6153_v15, 16  ;;  %v8794_v14 = vld [vmem:[%s7661_s10 + $0x68] sm:$0x1] }
 0x10f   : > { %6785 = vmatprep.mubr.msk.bf16.mxu0 %vm807_vm3, %v7366_v50  ;;  %v4023_v50 = vshrl.u32 %v8736_v57, 16 }
 0x110   : > { %v4002_v7 = vor.u32 %v4001_v2, %v8747_v40  ;;  %v4061_v2 = vshll.u32 %v6153_v15, 16  ;;  %v8812_v11 = vrot.slane %v3992_v47, 4  ;;  %v4029_v15 = vshll.u32 %v8788_v49, 16 }
 0x111   : > { %6626 = vmatmul.mubr.msk.bf16.gmra.mrb[16].mxu1 %vm807_vm3, %v5785_v12  ;;  %v4037_v12 = vshll.u32 %v6150_v58, 16  ;;  %v8781_v58 = vld [vmem:[%s7661_s10 + $0x70] sm:$0xf]  ;;  %v4025_v5 = vrot.slane %v4023_v50, 4  ;;  %v8818_v50 = vld [vmem:[%s7661_s10 + $0x7c] sm:$0xf] }
 0x112   : > { %6629 = vmatprep.mubr.msk.bf16.mxu1 %vm807_vm3, %v5786_v54  ;;  %v4047_v54 = vshrl.u32 %v8745_v59, 16  ;;  %10056 = vst [vmem:[#allocation7_spill] sm:$0xff] %v8781_v58  ;;  %v4067_v21 = vshll.u32 %v8781_v58, 16  ;;  %v4071_v62 = vshrl.u32 %v8781_v58, 16  ;;  %v4003_v33 = vrot.slane %v4002_v7, 4 }
 0x113   : > { %v4039_v55 = vrot.slane %v4037_v12, 5  ;;  %v8806_v12 = vrot.slane %v4005_v13, 5  ;;  %v4060_v47 = vrot.slane %v4058_v32, 4  ;;  %v7371_v13 = vld [vmem:[%s7661_s10 + $0xa8] sm:$0xff]   ;;  %v4091_v46 = vshll.u32 %v8818_v50, 16 }
 0x114   : > { %v4049_v28 = vrot.slane %v4047_v54, 4  ;;  %v4026_v54 = vor.u32 %v4025_v5, %v8784_v61  ;;  %v8829_v5 = vld [vmem:[%s7661_s10 + $0x74] sm:$0x1]  ;;  %v8831_v4 = vrot.slane %v4067_v21, 5  ;;  %v4073_v53 = vrot.slane %v4071_v62, 4 }
 0x115   : > { %v4040_v8 = vor.u32 %v4039_v55, %v4036_v10  ;;  %v4095_v20 = vshrl.u32 %v8818_v50, 16  ;;  %v4031_v55 = vrot.slane %v4029_v15, 5  ;;  %v3998_v32 = vsel %vm7685_vm2, %v8812_v11, %v8747_v40  ;;  %v6159_v62 = vld [vmem:[%s7661_s10 + $0x84] sm:$0xf]  ;;  %v8852_v15 = vld [vmem:[%s7661_s10 + $0x88] sm:$0xf] }
 0x116   : > { %6786 = vmatmul.mubr.msk.bf16.gmra.mrb[16].mxu0 %vm807_vm3, %v7368_v19  ;;  %v8802_v19 = vrot.slane %v3978_v44, 4  ;;  %v6156_v44 = vld [vmem:[%s7661_s10 + $0x78] sm:$0xf]  ;;  %v4027_v10 = vrot.slane %v4026_v54, 4  ;;  %v4077_v21 = vshll.u32 %v8829_v5, 16  ;;  %v4074_v54 = vor.u32 %v4073_v53, %v8831_v4 }
 0x117   : > { %6789 = vmatprep.mubr.msk.bf16.mxu0 %vm807_vm3, %v7369_v39  ;;  %v4016_v39 = vor.u32 %v4015_v42, %v4012_v34  ;;  %v4050_v42 = vor.u32 %v4049_v28, %v8790_v52  ;;  %v4063_v34 = vrot.slane %v4061_v2, 5  ;;  %v4082_v58 = vshrl.u32 %v6156_v44, 16 }
 0x118   : > { %v4085_v59 = vshll.u32 %v6156_v44, 16  ;;  %v4008_v28 = vsel %vm7685_vm2, %v4003_v33, %v8806_v12  ;;  %v4041_v2 = vrot.slane %v4040_v8, 4  ;;  %v8855_v44 = vld [vmem:[%s7661_s10 + $0x80] sm:$0x1]  ;;  %v8857_v12 = vrot.slane %v4091_v46, 5 }
 0x119   : > { %6630 = vmatmul.mubr.msk.bf16.gmra.mrb[20].mxu1 %vm807_vm3, %v5787_v18  ;;  %v4053_v18 = vshll.u32 %v8794_v14, 16  ;;  %v4017_v7 = vrot.slane %v4016_v39, 4  ;;  %v4064_v39 = vor.u32 %v4063_v34, %v4060_v47  ;;  %v4084_v40 = vrot.slane %v4082_v58, 4  ;;  %v7374_v58 = vld [vmem:[%s7661_s10 + $0xb4] sm:$0xff]  }
 0x11a   : > { %6633 = vmatprep.mubr.msk.bf16.mxu1 %vm807_vm3, %v5788_v48  ;;  %v3984_v48 = vsel %vm7685_vm2, %v8802_v19, %v8804_v63  ;;  %v4051_v19 = vrot.slane %v4050_v42, 4  ;;  %v4087_v11 = vrot.slane %v4085_v59, 5  ;;  %v10057_v33 = vcombine.low %v8608_v3, %v8645_v24  ;;  %v7376_v42 = vld [vmem:[%s7661_s10 + $0xc0] sm:$0xff]  }
 0x11b   : > { %v4055_v63 = vrot.slane %v4053_v18, 5  ;;  %v4022_v8 = vsel %vm7685_vm2, %v4017_v7, %v8784_v61  ;;  %v4032_v53 = vsel %vm7685_vm2, %v4027_v10, %v4031_v55  ;;  %v4106_v18 = vshrl.u32 %v6159_v62, 16 }
 0x11c   : > { %v4109_v47 = vshll.u32 %v6159_v62, 16  ;;  %v10058_v59 = vcombine.low %v8665_v30, %v8669_v26  ;;  %v4046_v3 = vsel %vm7685_vm2, %v4041_v2, %v8790_v52  ;;  %v8876_v24 = vrot.slane %v4077_v21, 5  ;;  %v6226_v62 = vld [vmem:[%s7661_s10 + $0x30] sm:$0xe] }
 0x11d   : > { %v4115_v61 = vshll.u32 %v8852_v15, 16  ;;  %v4056_v34 = vsel %vm7685_vm2, %v4051_v19, %v4055_v63  ;;  %v8883_v46 = vrot.slane %v4064_v39, 4  ;;  %v8885_v30 = vrot.slane %v4074_v54, 4 }
 0x11e   : > { %6790 = vmatmul.mubr.msk.bf16.gmra.mrb[20].mxu0 %vm807_vm3, %v7370_v23  ;;  %v4097_v23 = vrot.slane %v4095_v20, 4  ;;  %v4101_v26 = vshll.u32 %v8855_v44, 16  ;;  %v10059_v52 = vsel %vm7685_vm2, %v8702_v25, %v8688_v60  ;;  %v10060_v20 = vsel %vm7685_vm2, %v8700_v37, %v8638_v41  ;;  %v8914_v41 = vld [vmem:[%s7661_s10 + $0x8c] sm:$0x1] }
 0x11f   : > { %6793 = vmatprep.mubr.msk.bf16.mxu0 %vm807_vm3, %v7371_v13  ;;  %v4119_v13 = vshrl.u32 %v8852_v15, 16  ;;  %v8898_v7 = vcombine.low %v10060_v20, %v10059_v52  ;;  %v10061_v10 = vsel %vm7685_vm2, %v8740_v56, %v8733_v17  ;;  %v10062_v55 = vsel %vm7685_vm2, %v8731_v43, %v8658_v6  ;;  %v7380_v37 = vld [vmem:[%s7661_s10 + $0xc] sm:$0xff]  }
 0x120   : > { %v8910_v2 = vcombine.low %v10062_v55, %v10061_v10  ;;  %v4088_v60 = vor.u32 %v4087_v11, %v4084_v40  ;;  %v4098_v25 = vor.u32 %v4097_v23, %v8857_v12  ;;  %v10063_v17 = vsel %vm7685_vm2, %v8777_v1, %v8742_v27  ;;  %v8941_v1 = vld [vmem:[%s7661_s10 + $0x90] sm:$0xf]  ;;  %v8957_v11 = vld [vmem:[%s7661_s10 + $0x94] sm:$0xf]  ;;  %v9162_v40 = vld [vmem:[%s7661_s10 + $0xc4] sm:$0xf] }
 0x121   : > { %6634 = vmatmul.mubr.msk.bf16.gmra.mrb[24].mxu1 %vm807_vm3, %v10057_v33  ;;  %v8922_v56 = vcombine.low %v10063_v17, %v3984_v48  ;;  %v8924_v21 = vcombine.low %v3998_v32, %v4008_v28  ;;  %v8926_v6 = vrot.slane %v4106_v18, 4  ;;  %v8928_v43 = vrot.slane %v4109_v47, 5  ;;  %v6227_v48 = vld [vmem:[%s7661_s10 + $0x3c] sm:$0xe]  ;;  %v6228_v18 = vld [vmem:[%s7661_s10 + $0x48] sm:$0xe] }
 0x122   : > { %6637 = vmatprep.mubr.msk.bf16.mxu1 %vm807_vm3, %v10058_v59  ;;  %v8932_v19 = vcombine.low %v4022_v8, %v4032_v53  ;;  %v8934_v63 = vcombine.low %v4046_v3, %v4056_v34  ;;  %v8936_v39 = vrot.slane %v4115_v61, 5  ;;  %v8938_v27 = vrot.slane %v4119_v13, 4  ;;  %v6229_v13 = vld [vmem:[%s7661_s10 + $0x54] sm:$0xe]  ;;  %v7382_v17 = vld [vmem:[%s7661_s10 + $0x18] sm:$0xff]  }
 0x123   : > { %v8953_v54 = vrot.slane %v4101_v26, 5  ;;  %v8959_v23 = vrot.slane %v4088_v60, 4  ;;  %v8961_v33 = vrot.slane %v4098_v25, 4  ;;  %v6242_v8 = vrot.slane %v6226_v62, 9  ;;  %v9118_v28 = vld [vmem:[%s7661_s10 + $0xb0] sm:$0x1] }
 0x124   : > { %v4675_v53 = vrot.slane %v8627_v51, 5  ;;  %v10064_v47 = vcombine.low %v8673_v35, %v8677_v22  ;;  %v4678_v3 = vrot.slane %v8655_v38, 5  ;;  %v6243_v61 = vrot.slane %v6227_v48, 9  ;;  %v6239_v59 = vld [vmem:[%s7661_s10 + $0xcc] sm:$0xe] }
 0x125   : > { %v4682_v52 = vrot.slane %v8661_v0, 5  ;;  %v4685_v20 = vrot.slane %v8718_v36, 5  ;;  %v6244_v10 = vrot.slane %v6228_v18, 9  ;;  %v4689_v55 = vrot.slane %v8693_v9, 5  ;;  %v7383_v9 = vld [vmem:[%s7661_s10 + $0x24] sm:$0xff]  }
 0x126   : > { %6794 = vmatmul.mubr.msk.bf16.gmra.mrb[24].mxu0 %vm807_vm3, %v7374_v58  ;;  %v8983_v38 = vsel %vm8073_vm6, %v6242_v8, %v4675_v53  ;;  %v4677_v26 = vrot.slane %v4675_v53, 4  ;;  %v4692_v60 = vrot.slane %v8754_v31, 5  ;;  %v6245_v25 = vrot.slane %v6229_v13, 9 }
 0x127   : > { %6797 = vmatprep.mubr.msk.bf16.mxu0 %vm807_vm3, %v7376_v42  ;;  %v7378_v42 = vld [vmem:[%s7661_s10 + $0xcc] sm:$0xff]   ;;  %v8997_v48 = vsel %vm8073_vm6, %v6243_v61, %v4682_v52  ;;  %v4684_v0 = vrot.slane %v4682_v52, 4  ;;  %v4696_v36 = vrot.slane %v8736_v57, 5  ;;  %v9006_v8 = vsel %vm8073_vm6, %v6244_v10, %v4689_v55  ;;  %v6232_v10 = vld [vmem:[%s7661_s10 + $0x78] sm:$0xe] }
 0x128   : > { %v8993_v62 = vsel %vm8073_vm6, %v4677_v26, %v4678_v3  ;;  %v4691_v53 = vrot.slane %v4689_v55, 4  ;;  %v4699_v18 = vrot.slane %v8788_v49, 5  ;;  %v10065_v26 = vld [vmem:[#allocation6_spill] sm:$0xff] }
 0x129   : > { %6638 = vmatmul.mubr.msk.bf16.gmra.mrb[28].mxu1 %vm807_vm3, %v10064_v47  ;;  %v6231_v47 = vld [vmem:[%s7661_s10 + $0x6c] sm:$0xe]  ;;  %v9014_v57 = vsel %vm8073_vm6, %v4684_v0, %v4685_v20  ;;  %v9018_v3 = vsel %vm8073_vm6, %v6245_v25, %v4696_v36  ;;  %v4698_v61 = vrot.slane %v4696_v36, 4  ;;  %v4703_v52 = vrot.slane %v10065_v26, 5 }
 0x12a   : > { %6649 = vmatprep.mubr.msk.bf16.mxu1 %vm807_vm3, %v7380_v37  ;;  %v6230_v37 = vld [vmem:[%s7661_s10 + $0x60] sm:$0xe]  ;;  %v9024_v49 = vsel %vm8073_vm6, %v4691_v53, %v4692_v60  ;;  %v6247_v25 = vrot.slane %v6231_v47, 9  ;;  %v6233_v60 = vld [vmem:[%s7661_s10 + $0x84] sm:$0xe]  ;;  %v4713_v53 = vrot.slane %v8829_v5, 5 }
 0x12b   : > { %v6246_v13 = vrot.slane %v6230_v37, 9  ;;  %v9034_v55 = vsel %vm8073_vm6, %v4698_v61, %v4699_v18  ;;  %v10066_v37 = vld [vmem:[#allocation7_spill] sm:$0xff]  ;;  %v4705_v36 = vrot.slane %v4703_v52, 4  ;;  %v6248_v61 = vrot.slane %v6232_v10, 9  ;;  %v7386_v26 = vld [vmem:[%s10028_s1 + $0x108] sm:$0xff]   ;;  %v7385_v10 = vld [vmem:[%s7661_s10 + $0x3c] sm:$0xff]  }
 0x12c   : > { %v4710_v0 = vrot.slane %v10066_v37, 5  ;;  %v4720_v5 = vrot.slane %v8855_v44, 5  ;;  %v6234_v37 = vld [vmem:[%s7661_s10 + $0x90] sm:$0xe]  ;;  %v6235_v44 = vld [vmem:[%s7661_s10 + $0x9c] sm:$0xe]  ;;  %v10090_v45 = vcombine.low %v9018_v3, %v9034_v55 }
 0x12d   : > { %v6251_v32 = vrot.slane %v6235_v44, 9 }
 0x12e   : > { %6798 = vmatmul.mubr.msk.bf16.gmra.mrb[28].mxu0 %vm807_vm3, %v7378_v42  ;;  %v9048_v18 = vsel %vm8073_vm6, %v6247_v25, %v4710_v0  ;;  %v4712_v47 = vrot.slane %v4710_v0, 4  ;;  %v4724_v25 = vrot.slane %v8852_v15, 5  ;;  %v7384_v0 = vld [vmem:[%s7661_s10 + $0x30] sm:$0xff]   ;;  %v9077_v15 = vld [vmem:[%s7661_s10 + $0x98] sm:$0x1] }
 0x12f   : > { %6809 = vmatprep.mubr.msk.bf16.mxu0 %vm807_vm3, %v8715_v16  ;;  %v4706_v16 = vrot.slane %v8794_v14, 5  ;;  %v6236_v42 = vld [vmem:[%s7661_s10 + $0xa8] sm:$0xe] }
 0x130   : > { %v9067_v14 = vsel %vm8073_vm6, %v4712_v47, %v4713_v53  ;;  %v4726_v47 = vrot.slane %v4724_v25, 4  ;;  %v6252_v34 = vrot.slane %v6236_v42, 9  ;;  %v7396_v42 = vld [vmem:[%s10028_s1 + $0x118] sm:$0xff]  }
 0x131   : > { %6650 = vmatmul.mubr.msk.bf16.vlgmr.msra.gmra.mrb[0].mxu1 %vm807_vm3, %v7382_v17  ;;  %v9043_v17 = vsel %vm8073_vm6, %v6246_v13, %v4703_v52  ;;  %v9056_v13 = vsel %vm8073_vm6, %v4705_v36, %v4706_v16  ;;  %v6249_v52 = vrot.slane %v6233_v60, 9  ;;  %v9080_v60 = vld [vmem:[%s7661_s10 + $0xa0] sm:$0xf] }
 0x132   : > { %6653 = vmatprep.mubr.msk.bf16.mxu1 %vm807_vm3, %v7383_v9  ;;  %v4717_v9 = vrot.slane %v8818_v50, 5  ;;  %v4734_v50 = vrot.slane %v9077_v15, 5 }
 0x133   : > { %v9086_v53 = vsel %vm8073_vm6, %v6249_v52, %v4724_v25  ;;  %v6250_v52 = vrot.slane %v6234_v37, 9  ;;  %v4731_v25 = vrot.slane %v8957_v11, 5  ;;  %v6237_v37 = vld [vmem:[%s7661_s10 + $0xb4] sm:$0xe] }
 0x134   : > { %v9071_v20 = vsel %vm8073_vm6, %v6248_v61, %v4717_v9  ;;  %v4719_v16 = vrot.slane %v4717_v9, 4  ;;  %10067 = vst [vmem:[#allocation6_spill] sm:$0xff] %v9086_v53  ;;  %v4727_v61 = vrot.slane %v8914_v41, 5  ;;  %v10068_v9 = vld [vmem:[#allocation5_spill] sm:$0xff]  ;;  %v6253_v22 = vrot.slane %v6237_v37, 9 }
 0x135   : > { %v4759_v53 = vrot.slane %v9162_v40, 5 }
 0x136   : > { %6810 = vmatmul.mubr.msk.bf16.vlgmr.msra.gmra.mrb[0].mxu0 %vm807_vm3, %v8898_v7  ;;  %v7391_v7 = vld [vmem:[%s10028_s1 + $0x110] sm:$0xff]   ;;  %v9097_v36 = vsel %vm8073_vm6, %v4719_v16, %v4720_v5  ;;  %v9109_v31 = vsel %vm8073_vm6, %v4726_v47, %v4727_v61  ;;  %v4738_v5 = vrot.slane %v9080_v60, 5  ;;  %v9115_v16 = vld [vmem:[%s7661_s10 + $0xac] sm:$0xf]  ;;  %v4733_v47 = vrot.slane %v4731_v25, 4 }
 0x137   : > { %6842 = vmatpush3.bf16.msra.mxu0 %v10068_v9  ;;  %6813 = vmatprep.mubr.msk.bf16.mxu0 %vm807_vm3, %v8910_v2  ;;  %10069 = vst [vmem:[#allocation7_spill] sm:$0xff] %v9097_v36  ;;  %v9103_v9 = vld [vmem:[%s7661_s10 + $0xa4] sm:$0x1]  ;;  %10070 = vst [vmem:[#allocation5_spill] sm:$0xff] %v9109_v31  ;;  %v9124_v2 = vsel %vm8073_vm6, %v6250_v52, %v4731_v25  ;;  %v9129_v61 = vld [vmem:[%s7661_s10 + $0xb8] sm:$0xf] }
 0x138   : > { %6843 = vmatprep.subr.bf16.mxu0 %v7386_v26  ;;  %10071 = vst [vmem:[#allocation8_spill] sm:$0xff] %v9124_v2  ;;  %v4741_v44 = vrot.slane %v9103_v9, 5  ;;  %v4740_v58 = vrot.slane %v4738_v5, 4  ;;  %v4745_v51 = vrot.slane %v9115_v16, 5  ;;  %v7387_v52 = vld [vmem:[%s7661_s10 + $0x48] sm:$0xff]   ;;  %v9139_v25 = vsel %vm8073_vm6, %v4733_v47, %v4734_v50 }
 0x139   : > { %6654 = vmatmul.mubr.msk.bf16.gmra.mrb[4].mxu1 %vm807_vm3, %v7384_v0  ;;  %v9133_v0 = vsel %vm8073_vm6, %v6251_v32, %v4738_v5  ;;  %10073 = vst [vmem:[#allocation10_spill] sm:$0xff] %v9139_v25  ;;  %v4752_v35 = vrot.slane %v9129_v61, 5  ;;  %v6238_v32 = vld [vmem:[%s7661_s10 + $0xc0] sm:$0xe]  ;;  %v9148_v5 = vld [vmem:[%s7661_s10 + $0xbc] sm:$0x1] }
 0x13a   : > { %6657 = vmatprep.mubr.msk.bf16.mxu1 %vm807_vm3, %v7385_v10  ;;  %10072 = vst [vmem:[#allocation9_spill] sm:$0xff] %v9133_v0  ;;  %v4748_v10 = vrot.slane %v9118_v28, 5  ;;  %v9154_v50 = vsel %vm8073_vm6, %v4740_v58, %v4741_v44  ;;  %v9158_v37 = vsel %vm8073_vm6, %v6252_v34, %v4745_v51  ;;  %v4747_v47 = vrot.slane %v4745_v51, 4  ;;  %v9165_v31 = vld [vmem:[%s7661_s10 + $0xc8] sm:$0x1]  ;;  %v7388_v51 = vld [vmem:[%s7661_s10 + $0x54] sm:$0xff]  }
 0x13b   : > { %6844 = vmatpush3.bf16.msra.mxu0 %v7386_v26  ;;  %10074 = vst [vmem:[#allocation11_spill] sm:$0xff] %v9154_v50  ;;  %v9171_v26 = vsel %vm8073_vm6, %v6253_v22, %v4752_v35  ;;  %v4754_v58 = vrot.slane %v4752_v35, 4  ;;  %v4755_v44 = vrot.slane %v9148_v5, 5  ;;  %v9178_v34 = vld [vmem:[%s7661_s10 + $0xd0] sm:$0xf]  ;;  %v6254_v2 = vrot.slane %v6238_v32, 9 }
 0x13c   : > { %6845 = vmatprep.subr.bf16.mxu0 %v7391_v7  ;;  %10075 = vst [vmem:[#allocation12_spill] sm:$0xff] %v9171_v26  ;;  %v9182_v25 = vsel %vm8073_vm6, %v4747_v47, %v4748_v10  ;;  %v4762_v50 = vrot.slane %v9165_v31, 5  ;;  %v6165_v35 = vld [vmem:[%s7661_s10 + $0x9c] sm:$0xf]  ;;  %v9190_v22 = vld [vmem:[%s7661_s10 + $0xd4] sm:$0x1] }
 0x13d   : > { %10076 = vst [vmem:[#allocation13_spill] sm:$0xff] %v9182_v25  ;;  %v9196_v0 = vsel %vm8073_vm6, %v4754_v58, %v4755_v44  ;;  %v6255_v10 = vrot.slane %v6239_v59, 9  ;;  %v4766_v32 = vrot.slane %v9178_v34, 5  ;;  %v4769_v36 = vrot.slane %v9190_v22, 5 }
 0x13e   : > { %6814 = vmatmul.mubr.msk.bf16.gmra.mrb[4].mxu0 %vm807_vm3, %v8922_v56  ;;  %10077 = vst [vmem:[#allocation14_spill] sm:$0xff] %v9196_v0  ;;  %v10078_v58 = vshll.u32 %v8914_v41, 16  ;;  %v10079_v59 = vshrl.u32 %v8941_v1, 16  ;;  %v10081_v0 = vshll.u32 %v8957_v11, 16  ;;  %v4154_v41 = vshrl.u32 %v6165_v35, 16 }
 0x13f   : > { %6817 = vmatprep.mubr.msk.bf16.mxu0 %vm807_vm3, %v8924_v21  ;;  %6846 = vmatpush3.bf16.msra.mxu0 %v7391_v7  ;;  %v9203_v21 = vsel %vm8073_vm6, %v6254_v2, %v4759_v53  ;;  %v4761_v7 = vrot.slane %v4759_v53, 4  ;;  %v9213_v25 = vsel %vm8073_vm6, %v6255_v10, %v4766_v32  ;;  %v4768_v47 = vrot.slane %v4766_v32, 4  ;;  %v10098_v55 = vld [vmem:[#allocation8_spill] sm:$0xff] }
 0x140   : > { %6847 = vmatprep.subr.bf16.mxu0 %v7396_v42  ;;  %v4127_v44 = vrot.slane %v10078_v58, 5  ;;  %v4132_v56 = vrot.slane %v10079_v59, 4  ;;  %v10080_v53 = vshll.u32 %v8941_v1, 16  ;;  %v6168_v58 = vld [vmem:[%s7661_s10 + $0xa8] sm:$0xf]  ;;  %v10082_v10 = vshrl.u32 %v8957_v11, 16 }
 0x141   : > { %6658 = vmatmul.mubr.msk.bf16.gmra.mrb[8].mxu1 %vm807_vm3, %v7387_v52  ;;  %v9220_v52 = vrot.slane %v10081_v0, 5  ;;  %v9225_v59 = vsel %vm8073_vm6, %v4761_v7, %v4762_v50  ;;  %v4157_v26 = vshll.u32 %v6165_v35, 16  ;;  %v4094_v0 = vsel %vm7685_vm2, %v8959_v23, %v8857_v12  ;;  %v7390_v12 = vld [vmem:[%s7661_s10 + $0x6c] sm:$0xff]  }
 0x142   : > { %6661 = vmatprep.mubr.msk.bf16.mxu1 %vm807_vm3, %v7388_v51  ;;  %v4135_v2 = vrot.slane %v10080_v53, 5  ;;  %v4145_v32 = vrot.slane %v10082_v10, 4  ;;  %v9233_v51 = vsel %vm8073_vm6, %v4768_v47, %v4769_v36  ;;  %v10083_v50 = vor.u32 %v8928_v43, %v8926_v6  ;;  %v7389_v53 = vld [vmem:[%s7661_s10 + $0x60] sm:$0xff]  }
 0x143   : > { %6848 = vmatpush3.bf16.msra.mxu0 %v7396_v42  ;;  %v10084_v35 = vor.u32 %v8938_v27, %v8936_v39  ;;  %v6279_v7 = vcombine.low %v9213_v25, %v9233_v51  ;;  %v4163_v36 = vshll.u32 %v9080_v60, 16  ;;  %v4167_v47 = vshrl.u32 %v9080_v60, 16  ;;  %v5132_v25 = vld [vmem:[%s10029_s2 + $0x10] sm:$0xff]  ;;  %v5134_v51 = vld [vmem:[%s10029_s2 + $0x20] sm:$0xff] }
 0x144   : > { %v4113_v11 = vrot.slane %v10083_v50, 4  ;;  %v4178_v10 = vshrl.u32 %v6168_v58, 16  ;;  %v4181_v1 = vshll.u32 %v6168_v58, 16  ;;  %v4104_v6 = vsel %vm7685_vm2, %v8961_v33, %v8953_v54 }
 0x145   : > { %v4123_v42 = vrot.slane %v10084_v35, 4  ;;  %v4149_v43 = vshll.u32 %v9077_v15, 16  ;;  %v4187_v27 = vshll.u32 %v9115_v16, 16  ;;  %v4191_v23 = vshrl.u32 %v9115_v16, 16 }
 0x146   : > { %6818 = vmatmul.mubr.msk.bf16.gmra.mrb[8].mxu0 %vm807_vm3, %v8932_v19  ;;  %v4136_v60 = vor.u32 %v4135_v2, %v4132_v56  ;;  %v4146_v58 = vor.u32 %v4145_v32, %v9220_v52  ;;  %v4156_v19 = vrot.slane %v4154_v41, 4  ;;  %v4159_v50 = vrot.slane %v4157_v26, 5  ;;  %v6171_v41 = vld [vmem:[%s7661_s10 + $0xb4] sm:$0xf] }
 0x147   : > { %6821 = vmatprep.mubr.msk.bf16.mxu0 %vm807_vm3, %v8934_v63  ;;  %v10085_v54 = vsel %vm7685_vm2, %v8885_v30, %v8876_v24  ;;  %v10086_v33 = vsel %vm7685_vm2, %v8883_v46, %v8831_v4  ;;  %v4118_v63 = vsel %vm7685_vm2, %v4113_v11, %v8936_v39  ;;  %v4128_v16 = vsel %vm7685_vm2, %v4123_v42, %v4127_v44 }
 0x148   : > { %v6195_v15 = vcombine.low %v10086_v33, %v10085_v54  ;;  %v9279_v26 = vrot.slane %v4163_v36, 5  ;;  %v4169_v56 = vrot.slane %v4167_v47, 4  ;;  %v4180_v24 = vrot.slane %v4178_v10, 4 }
 0x149   : > { %6662 = vmatmul.mubr.msk.bf16.gmra.mrb[12].mxu1 %vm807_vm3, %v7389_v53  ;;  %v4183_v30 = vrot.slane %v4181_v1, 5  ;;  %v6196_v4 = vcombine.low %v4094_v0, %v4104_v6  ;;  %v4151_v46 = vrot.slane %v4149_v43, 5  ;;  %v9282_v2 = vrot.slane %v4187_v27, 5  ;;  %v7392_v53 = vld [vmem:[%s7661_s10 + $0x78] sm:$0xff]   ;;  %v6174_v0 = vld [vmem:[%s7661_s10 + $0xc0] sm:$0xf] }
 0x14a   : > { %6665 = vmatprep.mubr.msk.bf16.mxu1 %vm807_vm3, %v7390_v12  ;;  %v4193_v39 = vrot.slane %v4191_v23, 4  ;;  %v4137_v32 = vrot.slane %v4136_v60, 4  ;;  %v4147_v44 = vrot.slane %v4146_v58, 4  ;;  %v4160_v11 = vor.u32 %v4159_v50, %v4156_v19  ;;  %v7393_v12 = vld [vmem:[%s7661_s10 + $0x84] sm:$0xff]  }
 0x14b   : > { %v4173_v35 = vshll.u32 %v9103_v9, 16  ;;  %v6197_v42 = vcombine.low %v4118_v63, %v4128_v16  ;;  %v4170_v36 = vor.u32 %v4169_v56, %v9279_v26  ;;  %v4184_v1 = vor.u32 %v4183_v30, %v4180_v24 }
 0x14c   : > { %v4197_v47 = vshll.u32 %v9118_v28, 16  ;;  %v4202_v10 = vshrl.u32 %v6171_v41, 16  ;;  %v4194_v6 = vor.u32 %v4193_v39, %v9282_v2  ;;  %v4205_v43 = vshll.u32 %v6171_v41, 16 }
 0x14d   : > { %v4211_v27 = vshll.u32 %v9129_v61, 16  ;;  %v4215_v23 = vshrl.u32 %v9129_v61, 16  ;;  %v4142_v9 = vsel %vm7685_vm2, %v4137_v32, %v9220_v52  ;;  %v4152_v28 = vsel %vm7685_vm2, %v4147_v44, %v4151_v46  ;;  %v6177_v32 = vld [vmem:[%s7661_s10 + $0xcc] sm:$0xf]  ;;  %v7394_v44 = vld [vmem:[%s7661_s10 + $0x90] sm:$0xff]  }
 0x14e   : > { %6822 = vmatmul.mubr.msk.bf16.gmra.mrb[12].mxu0 %vm807_vm3, %v6195_v15  ;;  %v4161_v60 = vrot.slane %v4160_v11, 4  ;;  %v4175_v58 = vrot.slane %v4173_v35, 5  ;;  %v4226_v19 = vshrl.u32 %v6174_v0, 16  ;;  %v4229_v50 = vshll.u32 %v6174_v0, 16 }
 0x14f   : > { %6825 = vmatprep.mubr.msk.bf16.mxu0 %vm807_vm3, %v6196_v4  ;;  %v4235_v54 = vshll.u32 %v9162_v40, 16  ;;  %v4239_v33 = vshrl.u32 %v9162_v40, 16  ;;  %v4171_v61 = vrot.slane %v4170_v36, 4  ;;  %v4185_v15 = vrot.slane %v4184_v1, 4  ;;  %v7395_v36 = vld [vmem:[%s7661_s10 + $0x9c] sm:$0xff]  }
 0x150   : > { %v4199_v63 = vrot.slane %v4197_v47, 5  ;;  %v4204_v16 = vrot.slane %v4202_v10, 4  ;;  %v4195_v52 = vrot.slane %v4194_v6, 4  ;;  %v4207_v56 = vrot.slane %v4205_v43, 5 }
 0x151   : > { %6666 = vmatmul.mubr.msk.bf16.gmra.mrb[16].mxu1 %vm807_vm3, %v7392_v53  ;;  %v4213_v24 = vrot.slane %v4211_v27, 5  ;;  %v4217_v30 = vrot.slane %v4215_v23, 4  ;;  %v6198_v4 = vcombine.low %v4142_v9, %v4152_v28  ;;  %v4228_v46 = vrot.slane %v4226_v19, 4 }
 0x152   : > { %6669 = vmatprep.mubr.msk.bf16.mxu1 %vm807_vm3, %v7393_v12  ;;  %v4231_v39 = vrot.slane %v4229_v50, 5  ;;  %v4237_v41 = vrot.slane %v4235_v54, 5  ;;  %v4241_v40 = vrot.slane %v4239_v33, 4  ;;  %v4166_v11 = vsel %vm7685_vm2, %v4161_v60, %v9279_v26 }
 0x153   : > { %v4176_v35 = vsel %vm7685_vm2, %v4171_v61, %v4175_v58  ;;  %v4221_v53 = vshll.u32 %v9148_v5, 16  ;;  %v4190_v1 = vsel %vm7685_vm2, %v4185_v15, %v9282_v2  ;;  %v4200_v47 = vsel %vm7685_vm2, %v4195_v52, %v4199_v63  ;;  %v7398_v63 = vld [vmem:[%s7661_s10 + $0xb4] sm:$0xff]  }
 0x154   : > { %v4208_v10 = vor.u32 %v4207_v56, %v4204_v16  ;;  %v4218_v0 = vor.u32 %v4217_v30, %v4213_v24  ;;  %v4250_v26 = vshrl.u32 %v6177_v32, 16  ;;  %v4253_v12 = vshll.u32 %v6177_v32, 16 }
 0x155   : > { %v4259_v6 = vshll.u32 %v9178_v34, 16  ;;  %v4263_v5 = vshrl.u32 %v9178_v34, 16  ;;  %v4232_v43 = vor.u32 %v4231_v39, %v4228_v46  ;;  %v4245_v27 = vshll.u32 %v9165_v31, 16  ;;  %v7397_v31 = vld [vmem:[%s7661_s10 + $0xa8] sm:$0xff]   ;;  %v7460_v39 = vld [vmem:[%s7661_s10 + $0x1c] sm:$0xf] }
 0x156   : > { %6826 = vmatmul.mubr.msk.bf16.gmra.mrb[16].mxu0 %vm807_vm3, %v6197_v42  ;;  %v4242_v42 = vor.u32 %v4241_v40, %v4237_v41  ;;  %v6199_v2 = vcombine.low %v4166_v11, %v4176_v35  ;;  %v6200_v23 = vcombine.low %v4190_v1, %v4200_v47  ;;  %v4209_v9 = vrot.slane %v4208_v10, 4  ;;  %v6224_v40 = vld [vmem:[%s7661_s10 + $0x18] sm:$0xe]  ;;  %v7399_v47 = vld [vmem:[%s7661_s10 + $0xc0] sm:$0xff]  }
 0x157   : > { %6829 = vmatprep.mubr.msk.bf16.mxu0 %vm807_vm3, %v6198_v4  ;;  %v4219_v28 = vrot.slane %v4218_v0, 4  ;;  %v4223_v60 = vrot.slane %v4221_v53, 5  ;;  %v4252_v58 = vrot.slane %v4250_v26, 4  ;;  %v4255_v19 = vrot.slane %v4253_v12, 5  ;;  %v7462_v26 = vld [vmem:[%s7661_s10 + $0x28] sm:$0xf] }
 0x158   : > { %v4261_v50 = vrot.slane %v4259_v6, 5  ;;  %v4265_v34 = vrot.slane %v4263_v5, 4  ;;  %v4233_v54 = vrot.slane %v4232_v43, 4  ;;  %v4243_v33 = vrot.slane %v4242_v42, 4  ;;  %v6225_v43 = vld [vmem:[%s7661_s10 + $0x24] sm:$0xe] }
 0x159   : > { %6670 = vmatmul.mubr.msk.bf16.gmra.mrb[20].mxu1 %vm807_vm3, %v7394_v44  ;;  %v4247_v61 = vrot.slane %v4245_v27, 5  ;;  %v4214_v15 = vsel %vm7685_vm2, %v4209_v9, %v4213_v24  ;;  %v4224_v16 = vsel %vm7685_vm2, %v4219_v28, %v4223_v60  ;;  %v4256_v52 = vor.u32 %v4255_v19, %v4252_v58  ;;  %v7463_v9 = vld [vmem:[%s7661_s10 + $0x2c] sm:$0x1] }
 0x15a   : > { %6673 = vmatprep.mubr.msk.bf16.mxu1 %vm807_vm3, %v7395_v36  ;;  %v4266_v56 = vor.u32 %v4265_v34, %v4261_v50  ;;  %v4269_v30 = vshll.u32 %v9190_v22, 16  ;;  %v4238_v4 = vsel %vm7685_vm2, %v4233_v54, %v4237_v41  ;;  %v4661_v24 = vrot.slane %v7460_v39, 5  ;;  %v7461_v36 = vld [vmem:[%s7661_s10 + $0x20] sm:$0x1]  ;;  %v10099_v54 = vld [vmem:[#allocation10_spill] sm:$0xff]  ;;  %s7547_s10 = smov [#allocation2]  }
 0x15b   : > { %v4248_v46 = vsel %vm7685_vm2, %v4243_v33, %v4247_v61  ;;  %v6201_v32 = vcombine.low %v4214_v15, %v4224_v16  ;;  %v4257_v11 = vrot.slane %v4256_v52, 4  ;;  %v6240_v53 = vrot.slane %v6224_v40, 9  ;;  %v10102_v33 = vld [vmem:[#allocation11_spill] sm:$0xff]  ;;  %v10106_v61 = vld [vmem:[#allocation12_spill] sm:$0xff]  ;;  %v5131_v52 = vld [vmem:[%s10029_s2 + $0x8] sm:$0xff]  ;;  %s7468_s15 = sshll.u32 %s7547_s10, 4  ;;  %s7469_s15 = int_to_ptr.vmem [resolvable:$false] %s7468_s15 }
 0x15c   : > { %v6202_v44 = vcombine.low %v4238_v4, %v4248_v46  ;;  %v4267_v22 = vrot.slane %v4266_v56, 4  ;;  %v4271_v35 = vrot.slane %v4269_v30, 5  ;;  %v4663_v41 = vrot.slane %v4661_v24, 4  ;;  %v5136_v4 = vld [vmem:[%s10029_s2 + $0x30] sm:$0xff]  ;;  %v5137_v46 = vld [vmem:[%s10029_s2 + $0x38] sm:$0xff]  ;;  %v5139_v40 = vld [vmem:[%s10029_s2 + $0x48] sm:$0xff]  ;;  %p7471_p1 = scmp.lt.s32.totalorder %s9961_s9, %s7469_s15 }
 0x15d   : > { %v4664_v1 = vrot.slane %v7461_v36, 5  ;;  %v4262_v10 = vsel %vm7685_vm2, %v4257_v11, %v4261_v50  ;;  %v4668_v12 = vrot.slane %v7462_v26, 5  ;;  %v4662_v6 = vsel %vm8073_vm6, %v6240_v53, %v4661_v24  ;;  %v5138_v24 = vld [vmem:[%s10029_s2 + $0x40] sm:$0xff]  ;;  %v5141_v11 = vld [vmem:[%s10029_s2 + $0x58] sm:$0xff]  ;;  %s7470_s16 = scalar_lea.vmem %s7469_s15, 8192 }
 0x15e   : > { %6830 = vmatmul.mubr.msk.bf16.gmra.mrb[20].mxu0 %vm807_vm3, %v6199_v2  ;;  %v4272_v0 = vsel %vm7685_vm2, %v4267_v22, %v4271_v35  ;;  %v6241_v2 = vrot.slane %v6225_v43, 9  ;;  %v4671_v28 = vrot.slane %v7463_v9, 5  ;;  %v10087_v19 = vcombine.low %v8983_v38, %v8993_v62  ;;  %v5142_v26 = vld [vmem:[%s10029_s2 + $0x60] sm:$0xff]  ;;  %v5145_v43 = vld [vmem:[%s10029_s2 + $0x78] sm:$0xff]  ;;  %p7472_p2 = scmp.lt.s32.totalorder %s7470_s16, %s7464_s14 }
 0x15f   : > { %6833 = vmatprep.mubr.msk.bf16.mxu0 %vm807_vm3, %v6200_v23  ;;  %v4665_v5 = vsel %vm8073_vm6, %v4663_v41, %v4664_v1  ;;  %v6203_v42 = vcombine.low %v4262_v10, %v4272_v0  ;;  %v4670_v23 = vrot.slane %v4668_v12, 4  ;;  %v10088_v50 = vcombine.low %v8997_v48, %v9014_v57  ;;  %v10093_v48 = vld [vmem:[#allocation7_spill] sm:$0xff]  ;;  %v10095_v57 = vld [vmem:[#allocation6_spill] sm:$0xff] }
 0x160   : > { %v6264_v27 = vcombine.low %v4662_v6, %v4665_v5  ;;  %v4669_v29 = vsel %vm8073_vm6, %v6241_v2, %v4668_v12  ;;  %v10089_v34 = vcombine.low %v9006_v8, %v9024_v49  ;;  %v10091_v38 = vcombine.low %v9043_v17, %v9056_v13  ;;  %v10096_v49 = vld [vmem:[#allocation5_spill] sm:$0xff]  ;;  %v5143_v12 = vld [vmem:[%s10029_s2 + $0x68] sm:$0xff]  ;;  %v5144_v5 = vld [vmem:[%s10029_s2 + $0x70] sm:$0xff]  ;;  %p7473_p3 = por %p7472_p2, %p7471_p1 }
 0x161   : > { %6674 = vmatmul.mubr.msk.bf16.gmra.mrb[24].mxu1 %vm807_vm3, %v7397_v31  ;;  %v4672_v60 = vsel %vm8073_vm6, %v4670_v23, %v4671_v28  ;;  %v10092_v62 = vcombine.low %v9048_v18, %v9067_v14  ;;  %v10094_v8 = vcombine.low %v9071_v20, %v10093_v48  ;;  %v10097_v3 = vcombine.low %v10095_v57, %v10096_v49  ;;  %v10101_v13 = vld [vmem:[#allocation9_spill] sm:$0xff]  ;;  %v10107_v31 = vld [vmem:[#allocation14_spill] sm:$0xff] }
 0x162   : > { %6677 = vmatprep.mubr.msk.bf16.mxu1 %vm807_vm3, %v7398_v63  ;;  %v6265_v58 = vcombine.low %v4669_v29, %v4672_v60  ;;  %v10100_v17 = vcombine.low %v10098_v55, %v10099_v54  ;;  %v10103_v14 = vcombine.low %v10101_v13, %v10102_v33  ;;  %v10104_v18 = vld [vmem:[#allocation13_spill] sm:$0xff]  ;;  %v10108_v15 = vcombine.low %v10106_v61, %v10107_v31  ;;  %p7474_p5 = pnand %p7473_p3, %p7467_p0 }
 0x163   : > { %v10105_v20 = vcombine.low %v9158_v37, %v10104_v18  ;;  %v10109_v63 = vcombine.low %v9203_v21, %v9225_v59  ;;  %v7544_v16 = vmov 0.0|0.0   ;;  %v5130_v37 = vld [vmem:[%s10029_s2] sm:$0xff]  ;;  %v5133_v21 = vld [vmem:[%s10029_s2 + $0x18] sm:$0xff]  ;;  %v9459_v39 = vpack.c.bf16 %v5137_v46, %v5136_v4 }
 0x164   : > { %6951 = vmatprep.subr.bf16.mxu1 %v7544_v16  ;;  %v9429_v56 = vpack.c.bf16 %v5131_v52, %v5130_v37  ;;  %v9439_v59 = vpack.c.bf16 %v5133_v21, %v5132_v25  ;;  %v9489_v6 = vpack.c.bf16 %v5143_v12, %v5142_v26  ;;  %v7546_v9 = vmov 0.0  }
 0x166   : > { %6834 = vmatmul.mubr.msk.bf16.gmra.mrb[24].mxu0 %vm807_vm3, %v6201_v32  ;;  %6953 = vmatpush3.bf16.msra.mxu1 %v9429_v56  ;;  %v9469_v32 = vpack.c.bf16 %v5139_v40, %v5138_v24 }
 0x167   : > { %6837 = vmatprep.mubr.msk.bf16.mxu0 %vm807_vm3, %v6202_v44  ;;  %6954 = vmatprep.subr.bf16.mxu1 %v7544_v16  ;;  %v5140_v44 = vld [vmem:[%s10029_s2 + $0x50] sm:$0xff] }
 0x168   : > { %v9479_v22 = vpack.c.bf16 %v5141_v11, %v5140_v44 }
 0x169   : > { %6678 = vmatmul.mubr.msk.bf16.gmra.mrb[28].mxu1 %vm807_vm3, %v7399_v47 }
 0x16a   : > { %6956 = vmatpush3.bf16.msra.mxu1 %v9439_v59  ;;  %6913 = vmatprep.mubr.msk.f32.mxu1 %vm7545_vm7, %v7546_v9 }
 0x16b   : > { %6957 = vmatprep.subr.bf16.mxu1 %v7544_v16 }
 0x16e   : > { %6838 = vmatmul.mubr.msk.bf16.gmra.mrb[28].mxu0 %vm807_vm3, %v6203_v42 }
 0x16f   : > { %6849 = vmatprep.mubr.msk.bf16.mxu0 %vm807_vm3, %v6264_v27  ;;  %v9499_v27 = vpack.c.bf16 %v5145_v43, %v5144_v5 }
 0x176   : > { %6850 = vmatmul.mubr.msk.bf16.vlgmr.msra.gmra.mrb[0].mxu0 %vm807_vm3, %v6265_v58 }
 0x177   : > { %6853 = vmatprep.mubr.msk.bf16.mxu0 %vm807_vm3, %v10087_v19 }
 0x17e   : > { %6854 = vmatmul.mubr.msk.bf16.gmra.mrb[4].mxu0 %vm807_vm3, %v10088_v50 }
 0x17f   : > { %6857 = vmatprep.mubr.msk.bf16.mxu0 %vm807_vm3, %v10089_v34 }
 0x186   : > { %6858 = vmatmul.mubr.msk.bf16.gmra.mrb[8].mxu0 %vm807_vm3, %v10090_v45 }
 0x187   : > { %6861 = vmatprep.mubr.msk.bf16.mxu0 %vm807_vm3, %v10091_v38 }
 0x18e   : > { %6862 = vmatmul.mubr.msk.bf16.gmra.mrb[12].mxu0 %vm807_vm3, %v10092_v62 }
 0x18f   : > { %6865 = vmatprep.mubr.msk.bf16.mxu0 %vm807_vm3, %v10094_v8 }
 0x196   : > { %6866 = vmatmul.mubr.msk.bf16.gmra.mrb[16].mxu0 %vm807_vm3, %v10097_v3 }
 0x197   : > { %6869 = vmatprep.mubr.msk.bf16.mxu0 %vm807_vm3, %v10100_v17 }
 0x19e   : > { %6870 = vmatmul.mubr.msk.bf16.gmra.mrb[20].mxu0 %vm807_vm3, %v10103_v14 }
 0x19f   : > { %6873 = vmatprep.mubr.msk.bf16.mxu0 %vm807_vm3, %v10105_v20 }
 0x1a6   : > { %6874 = vmatmul.mubr.msk.bf16.gmra.mrb[24].mxu0 %vm807_vm3, %v10108_v15 }
 0x1a7   : > { %6877 = vmatprep.mubr.msk.bf16.mxu0 %vm807_vm3, %v10109_v63 }
 0x1ae   : > { %6878 = vmatmul.mubr.msk.bf16.gmra.mrb[28].mxu0 %vm807_vm3, %v6279_v7  ;;  %v5135_v7 = vld [vmem:[%s10029_s2 + $0x28] sm:$0xff] }
 0x1af   : > { %v9449_v30 = vpack.c.bf16 %v5135_v7, %v5134_v51 }
 0x1b1   : > { %6959 = vmatpush3.bf16.msra.mxu1 %v9449_v30 }
 0x1b2   : > { %6960 = vmatprep.subr.bf16.mxu1 %v7544_v16 }
 0x1b5   : > { %6962 = vmatpush3.bf16.msra.mxu1 %v9459_v39 }
 0x1b6   : > { %6963 = vmatprep.subr.bf16.mxu1 %v7544_v16 }
 0x1b9   : > { %6965 = vmatpush3.bf16.msra.mxu1 %v9469_v32 }
 0x1ba   : > { %6966 = vmatprep.subr.bf16.mxu1 %v7544_v16 }
 0x1bd   : > { %6968 = vmatpush3.bf16.msra.mxu1 %v9479_v22 }
 0x1be   : > { %6969 = vmatprep.subr.bf16.mxu1 %v7544_v16 }
 0x1c1   : > { %6971 = vmatpush3.bf16.msra.mxu1 %v9489_v6 }
 0x1c2   : > { %6972 = vmatprep.subr.bf16.mxu1 %v7544_v16 }
 0x1c5   : > { %6974 = vmatpush3.bf16.msra.mxu1 %v9499_v27 }
 0x1c6   : > { %6975 = vmatprep.subr.bf16.mxu1 %v7544_v16 }
 0x204   : > { %v6651_v35 = vpop.f32.mrb[0].mxu1 }
 0x205   : > { %v2043_v53 = vpop.f32.mrb[1].mxu1 }
 0x206   : > { %v6652_v41 = vpop.f32.mrb[2].mxu1 }
 0x207   : > { %v2046_v36 = vpop.f32.mrb[3].mxu1 }
 0x20c   : > { %v6655_v1 = vpop.f32.mrb[4].mxu1 }
 0x20d   : > { %v2059_v47 = vpop.f32.mrb[5].mxu1 }
 0x20e   : > { %v6656_v10 = vpop.f32.mrb[6].mxu1 }
 0x20f   : > { %v2062_v0 = vpop.f32.mrb[7].mxu1 }
 0x214   : > { %v6659_v42 = vpop.f32.mrb[8].mxu1 }
 0x215   : > { %v2075_v2 = vpop.f32.mrb[9].mxu1 }
 0x216   : > { %v6660_v23 = vpop.f32.mrb[10].mxu1 }
 0x217   : > { %v2078_v28 = vpop.f32.mrb[11].mxu1 }
 0x21c   : > { %v6663_v29 = vpop.f32.mrb[12].mxu1 }
 0x21d   : > { %v2091_v60 = vpop.f32.mrb[13].mxu1 }
 0x21e   : > { %v6664_v58 = vpop.f32.mrb[14].mxu1 }
 0x21f   : > { %v2094_v19 = vpop.f32.mrb[15].mxu1 }
 0x224   : > { %v9505_v50 = vpop.f32.mrb[16].mxu1 }
 0x225   : > { %v9507_v34 = vpop.f32.mrb[17].mxu1 }
 0x226   : > { %v9509_v45 = vpop.f32.mrb[18].mxu1 }
 0x227   : > { %v9511_v38 = vpop.f32.mrb[19].mxu1 }
 0x22c   : > { %v9513_v62 = vpop.f32.mrb[20].mxu1 }
 0x22d   : > { %v9515_v48 = vpop.f32.mrb[21].mxu1 }
 0x22e   : > { %v9517_v8 = vpop.f32.mrb[22].mxu1 }
 0x22f   : > { %v9519_v57 = vpop.f32.mrb[23].mxu1 }
 0x234   : > { %v9521_v49 = vpop.f32.mrb[24].mxu1 }
 0x235   : > { %v9523_v3 = vpop.f32.mrb[25].mxu1 }
 0x236   : > { %v9525_v55 = vpop.f32.mrb[26].mxu1 }
 0x237   : > { %v9527_v54 = vpop.f32.mrb[27].mxu1 }
 0x23c   : > { %v9529_v17 = vpop.f32.mrb[28].mxu1 }
 0x23d   : > { %v9531_v13 = vpop.f32.mrb[29].mxu1 }
 0x23e   : > { %v9533_v33 = vpop.f32.mrb[30].mxu1 }
 0x23f   : > { %v9535_v14 = vpop.f32.mrb[31].mxu1 }
 0x249   : > { %v6851_v18 = vpop.f32.mrb[0].mxu0 }
 0x24a   : > { %v9537_v20 = vadd.f32 %v6851_v18, %v6651_v35  ;;  %v4934_v61 = vpop.f32.mrb[1].mxu0 }
 0x24b   : > { %v9539_v31 = vadd.f32 %v4934_v61, %v2043_v53  ;;  %v6852_v15 = vpop.f32.mrb[2].mxu0 }
 0x24c   : > { %v9541_v63 = vadd.f32 %v6852_v15, %v6652_v41  ;;  %v4937_v37 = vpop.f32.mrb[3].mxu0 }
 0x24d   : > { %v9543_v52 = vadd.f32 %v4937_v37, %v2046_v36 }
 0x24f   : > { %v5093_v25 = vadd.f32 %v9543_v52, %v9539_v31 }
 0x251   : > { %v5094_v21 = vadd.f32 %v9537_v20, %v5093_v25  ;;  %v6855_v51 = vpop.f32.mrb[4].mxu0 }
 0x252   : > { %v9548_v7 = vadd.f32 %v6855_v51, %v6655_v1  ;;  %v4950_v4 = vpop.f32.mrb[5].mxu0 }
 0x253   : > { %v9550_v46 = vadd.f32 %v4950_v4, %v2059_v47  ;;  %v5095_v24 = vadd.f32 %v9541_v63, %v5094_v21  ;;  %v6856_v40 = vpop.f32.mrb[6].mxu0 }
 0x254   : > { %v9553_v44 = vadd.f32 %v6856_v40, %v6656_v10  ;;  %v4953_v11 = vpop.f32.mrb[7].mxu0 }
 0x255   : > { %v5096_v35 = vadd.f32 %v9550_v46, %v5095_v24  ;;  %v9556_v53 = vadd.f32 %v4953_v11, %v2062_v0 }
 0x257   : > { %v5097_v41 = vadd.f32 %v9556_v53, %v5096_v35 }
 0x259   : > { %v5098_v36 = vadd.f32 %v9548_v7, %v5097_v41  ;;  %v6859_v26 = vpop.f32.mrb[8].mxu0 }
 0x25a   : > { %v9560_v1 = vadd.f32 %v6859_v26, %v6659_v42  ;;  %v4966_v12 = vpop.f32.mrb[9].mxu0 }
 0x25b   : > { %v9562_v47 = vadd.f32 %v4966_v12, %v2075_v2  ;;  %v5099_v5 = vadd.f32 %v9553_v44, %v5098_v36  ;;  %v6860_v43 = vpop.f32.mrb[10].mxu0 }
 0x25c   : > { %v9565_v10 = vadd.f32 %v6860_v43, %v6660_v23  ;;  %v4969_v18 = vpop.f32.mrb[11].mxu0 }
 0x25d   : > { %v5100_v61 = vadd.f32 %v9562_v47, %v5099_v5  ;;  %v9568_v0 = vadd.f32 %v4969_v18, %v2078_v28 }
 0x25f   : > { %v5101_v15 = vadd.f32 %v9568_v0, %v5100_v61 }
 0x261   : > { %v5102_v37 = vadd.f32 %v9560_v1, %v5101_v15  ;;  %v6863_v25 = vpop.f32.mrb[12].mxu0 }
 0x262   : > { %v9572_v42 = vadd.f32 %v6863_v25, %v6663_v29  ;;  %v4982_v21 = vpop.f32.mrb[13].mxu0 }
 0x263   : > { %v9574_v2 = vadd.f32 %v4982_v21, %v2091_v60  ;;  %v5103_v51 = vadd.f32 %v9565_v10, %v5102_v37  ;;  %v6864_v4 = vpop.f32.mrb[14].mxu0 }
 0x264   : > { %v9577_v23 = vadd.f32 %v6864_v4, %v6664_v58  ;;  %v4985_v24 = vpop.f32.mrb[15].mxu0 }
 0x265   : > { %v5104_v40 = vadd.f32 %v9574_v2, %v5103_v51  ;;  %v9580_v28 = vadd.f32 %v4985_v24, %v2094_v19 }
 0x267   : > { %v5105_v11 = vadd.f32 %v9580_v28, %v5104_v40 }
 0x269   : > { %v5106_v35 = vadd.f32 %v9572_v42, %v5105_v11  ;;  %v6867_v41 = vpop.f32.mrb[16].mxu0 }
 0x26a   : > { %v9585_v29 = vadd.f32 %v6867_v41, %v9505_v50  ;;  %v4998_v60 = vpop.f32.mrb[17].mxu0 }
 0x26b   : > { %v9588_v36 = vadd.f32 %v4998_v60, %v9507_v34  ;;  %v5107_v58 = vadd.f32 %v9577_v23, %v5106_v35  ;;  %v6868_v26 = vpop.f32.mrb[18].mxu0 }
 0x26c   : > { %v9592_v12 = vadd.f32 %v6868_v26, %v9509_v45  ;;  %v5001_v19 = vpop.f32.mrb[19].mxu0 }
 0x26d   : > { %v5108_v5 = vadd.f32 %v9588_v36, %v5107_v58  ;;  %v9596_v43 = vadd.f32 %v5001_v19, %v9511_v38 }
 0x26f   : > { %v5109_v18 = vadd.f32 %v9596_v43, %v5108_v5 }
 0x271   : > { %v5110_v50 = vadd.f32 %v9585_v29, %v5109_v18  ;;  %v6871_v61 = vpop.f32.mrb[20].mxu0 }
 0x272   : > { %v9601_v34 = vadd.f32 %v6871_v61, %v9513_v62  ;;  %v5014_v15 = vpop.f32.mrb[21].mxu0 }
 0x273   : > { %v9604_v37 = vadd.f32 %v5014_v15, %v9515_v48  ;;  %v5111_v45 = vadd.f32 %v9592_v12, %v5110_v50  ;;  %v6872_v25 = vpop.f32.mrb[22].mxu0 }
 0x274   : > { %v9608_v21 = vadd.f32 %v6872_v25, %v9517_v8  ;;  %v5017_v38 = vpop.f32.mrb[23].mxu0 }
 0x275   : > { %v5112_v51 = vadd.f32 %v9604_v37, %v5111_v45  ;;  %v9612_v4 = vadd.f32 %v5017_v38, %v9519_v57 }
 0x277   : > { %v5113_v24 = vadd.f32 %v9612_v4, %v5112_v51 }
 0x279   : > { %v5114_v62 = vadd.f32 %v9601_v34, %v5113_v24  ;;  %v6875_v40 = vpop.f32.mrb[24].mxu0 }
 0x27a   : > { %v9617_v48 = vadd.f32 %v6875_v40, %v9521_v49  ;;  %v5030_v11 = vpop.f32.mrb[25].mxu0 }
 0x27b   : > { %v9620_v35 = vadd.f32 %v5030_v11, %v9523_v3  ;;  %v5115_v8 = vadd.f32 %v9608_v21, %v5114_v62  ;;  %v6876_v41 = vpop.f32.mrb[26].mxu0 }
 0x27c   : > { %v9624_v60 = vadd.f32 %v6876_v41, %v9525_v55  ;;  %v5033_v57 = vpop.f32.mrb[27].mxu0 }
 0x27d   : > { %v5116_v58 = vadd.f32 %v9620_v35, %v5115_v8  ;;  %v9628_v26 = vadd.f32 %v5033_v57, %v9527_v54 }
 0x27f   : > { %v5117_v19 = vadd.f32 %v9628_v26, %v5116_v58 }
 0x281   : > { %v5118_v49 = vadd.f32 %v9617_v48, %v5117_v19  ;;  %v6879_v5 = vpop.f32.mrb[28].mxu0 }
 0x282   : > { %v9633_v3 = vadd.f32 %v6879_v5, %v9529_v17  ;;  %v5046_v18 = vpop.f32.mrb[29].mxu0 }
 0x283   : > { %v9636_v50 = vadd.f32 %v5046_v18, %v9531_v13  ;;  %v5119_v55 = vadd.f32 %v9624_v60, %v5118_v49  ;;  %v6880_v61 = vpop.f32.mrb[30].mxu0 }
 0x284   : > { %v9640_v15 = vadd.f32 %v6880_v61, %v9533_v33  ;;  %v5049_v54 = vpop.f32.mrb[31].mxu0 }
 0x285   : > { %v5120_v45 = vadd.f32 %v9636_v50, %v5119_v55  ;;  %v9644_v25 = vadd.f32 %v5049_v54, %v9535_v14 }
 0x287   : > { %v5121_v38 = vadd.f32 %v9644_v25, %v5120_v45 }
 0x289   : > { %v5122_v17 = vadd.f32 %v9633_v3, %v5121_v38 }
 0x28b   : > { %v5123_v51 = vadd.f32 %v9640_v15, %v5122_v17 }
 0x28d   : > { %v5124_v13 = vrot.slane %v5123_v51, 4 }
 0x28f   : > { %v5125_v24 = vadd.f32 %v5124_v13, %v5123_v51 }
 0x291   : > { %v5126_v62 = vrot.slane %v5125_v24, 2 }
 0x293   : > { %v5127_v40 = vadd.f32 %v5126_v62, %v5125_v24 }
 0x295   : > { %v5128_v11 = vrot.slane %v5127_v40, 1 }
 0x297   : > { %v5129_v8 = vadd.f32 %v5128_v11, %v5127_v40 }
 0x299   : > { %6914 = vmatmul.mubr.f32.vlgmr.msra.gmra.mrb[32].mxu1 %v5129_v8 }
 0x29a   : > { %6977 = vmatpush3.bf16.msra.mxu1 %v9429_v56  ;;  %6948 = vmatprep.mubr.msk.f32.mxu1 %vm7545_vm7, %v7546_v9  ;;  %v5217_v56 = vlaneseq }
 0x29b   : > { %6978 = vmatprep.subr.bf16.mxu1 %v7544_v16 }
 0x29e   : > { %6980 = vmatpush3.bf16.msra.mxu1 %v9439_v59 }
 0x29f   : > { %6981 = vmatprep.subr.bf16.mxu1 %v7544_v16 }
 0x2a2   : > { %6983 = vmatpush3.bf16.msra.mxu1 %v9449_v30  ;;  %v9666_v30 = vshrl.u32 %v5217_v56, 7 }
 0x2a3   : > { %6984 = vmatprep.subr.bf16.mxu1 %v7544_v16 }
 0x2a6   : > { %6986 = vmatpush3.bf16.msra.mxu1 %v9459_v39 }
 0x2a7   : > { %6987 = vmatprep.subr.bf16.mxu1 %v7544_v16 }
 0x2aa   : > { %6989 = vmatpush3.bf16.msra.mxu1 %v9469_v32  ;;  %v5219_v32 = vsub.s32 0, %v9666_v30 }
 0x2ab   : > { %6990 = vmatprep.subr.bf16.mxu1 %v7544_v16 }
 0x2ae   : > { %6992 = vmatpush3.bf16.msra.mxu1 %v9479_v22 }
 0x2af   : > { %6993 = vmatprep.subr.bf16.mxu1 %v7544_v16 }
 0x2b2   : > { %6995 = vmatpush3.bf16.msra.mxu1 %v9489_v6 }
 0x2b3   : > { %6996 = vmatprep.subr.bf16.mxu1 %v7544_v16 }
 0x2b6   : > { %6998 = vmatpush3.bf16.msra.mxu1 %v9499_v27 }
 0x36c   : > { %v5212_v59 = vpop.f32.mrb[32].mxu1 }
 0x36d   : > { %v6915_v39 = vpop.f32.mrb[33].mxu1  ;;  %v5216_v9 = vmul.f32 0.0009765625, %v5212_v59 }
 0x36f   : > { %v9671_v33 = vrot.slane %v5216_v9, %v5219_v32 }
 0x371   : > { %v9675_v22 = vsub.f32 %v9539_v31, %v9671_v33  ;;  %v9679_v16 = vsub.f32 %v9543_v52, %v9671_v33  ;;  %v9683_v6 = vsub.f32 %v9537_v20, %v9671_v33  ;;  %v9691_v41 = vsub.f32 %v9541_v63, %v9671_v33 }
 0x372   : > { %v9695_v31 = vsub.f32 %v9550_v46, %v9671_v33  ;;  %v9701_v20 = vsub.f32 %v9556_v53, %v9671_v33  ;;  %v9707_v63 = vsub.f32 %v9548_v7, %v9671_v33  ;;  %v9713_v5 = vsub.f32 %v9553_v44, %v9671_v33 }
 0x373   : > { %v5253_v27 = vmul.f32 %v9675_v22, %v9675_v22  ;;  %v5254_v14 = vmul.f32 %v9679_v16, %v9679_v16  ;;  %v5255_v52 = vmul.f32 %v9683_v6, %v9683_v6  ;;  %v5256_v58 = vmul.f32 %v9691_v41, %v9691_v41 }
 0x374   : > { %v5257_v46 = vmul.f32 %v9695_v31, %v9695_v31  ;;  %v5258_v53 = vmul.f32 %v9701_v20, %v9701_v20  ;;  %v9719_v55 = vsub.f32 %v9562_v47, %v9671_v33  ;;  %v5259_v7 = vmul.f32 %v9707_v63, %v9707_v63 }
 0x375   : > { %v5285_v57 = vadd.f32 %v5254_v14, %v5253_v27  ;;  %v9725_v54 = vsub.f32 %v9568_v0, %v9671_v33  ;;  %v5260_v44 = vmul.f32 %v9713_v5, %v9713_v5  ;;  %v9731_v38 = vsub.f32 %v9560_v1, %v9671_v33 }
 0x376   : > { %v5261_v47 = vmul.f32 %v9719_v55, %v9719_v55  ;;  %v9737_v51 = vsub.f32 %v9565_v10, %v9671_v33  ;;  %v9743_v24 = vsub.f32 %v9574_v2, %v9671_v33  ;;  %v9749_v40 = vsub.f32 %v9580_v28, %v9671_v33 }
 0x377   : > { %v5286_v19 = vadd.f32 %v5285_v57, %v5255_v52  ;;  %v5262_v0 = vmul.f32 %v9725_v54, %v9725_v54  ;;  %v5263_v1 = vmul.f32 %v9731_v38, %v9731_v38  ;;  %v9755_v8 = vsub.f32 %v9572_v42, %v9671_v33 }
 0x378   : > { %v5264_v10 = vmul.f32 %v9737_v51, %v9737_v51  ;;  %v5265_v2 = vmul.f32 %v9743_v24, %v9743_v24  ;;  %v9761_v59 = vsub.f32 %v9577_v23, %v9671_v33  ;;  %v5266_v28 = vmul.f32 %v9749_v40, %v9749_v40 }
 0x379   : > { %v5287_v49 = vadd.f32 %v5286_v19, %v5256_v58  ;;  %v9767_v9 = vsub.f32 %v9588_v36, %v9671_v33  ;;  %v5267_v42 = vmul.f32 %v9755_v8, %v9755_v8  ;;  %v9773_v14 = vsub.f32 %v9596_v43, %v9671_v33 }
 0x37a   : > { %v5268_v23 = vmul.f32 %v9761_v59, %v9761_v59  ;;  %v9779_v57 = vsub.f32 %v9585_v29, %v9671_v33  ;;  %v9785_v19 = vsub.f32 %v9592_v12, %v9671_v33 }
 0x37b   : > { %v5288_v18 = vadd.f32 %v5287_v49, %v5257_v46  ;;  %v5269_v36 = vmul.f32 %v9767_v9, %v9767_v9  ;;  %v5270_v43 = vmul.f32 %v9773_v14, %v9773_v14  ;;  %v9791_v49 = vsub.f32 %v9604_v37, %v9671_v33 }
 0x37c   : > { %v5271_v29 = vmul.f32 %v9779_v57, %v9779_v57  ;;  %v5272_v12 = vmul.f32 %v9785_v19, %v9785_v19 }
 0x37d   : > { %v5289_v61 = vadd.f32 %v5288_v18, %v5258_v53  ;;  %v9797_v18 = vsub.f32 %v9612_v4, %v9671_v33  ;;  %v5273_v37 = vmul.f32 %v9791_v49, %v9791_v49 }
 0x37f   : > { %v5290_v45 = vadd.f32 %v5289_v61, %v5259_v7  ;;  %v9803_v61 = vsub.f32 %v9601_v34, %v9671_v33  ;;  %v5274_v4 = vmul.f32 %v9797_v18, %v9797_v18 }
 0x381   : > { %v5291_v17 = vadd.f32 %v5290_v45, %v5260_v44  ;;  %v9809_v45 = vsub.f32 %v9608_v21, %v9671_v33  ;;  %v5275_v34 = vmul.f32 %v9803_v61, %v9803_v61 }
 0x383   : > { %v5292_v13 = vadd.f32 %v5291_v17, %v5261_v47  ;;  %v9815_v17 = vsub.f32 %v9620_v35, %v9671_v33  ;;  %v5276_v21 = vmul.f32 %v9809_v45, %v9809_v45 }
 0x385   : > { %v5293_v62 = vadd.f32 %v5292_v13, %v5262_v0  ;;  %v9821_v13 = vsub.f32 %v9628_v26, %v9671_v33  ;;  %v5277_v35 = vmul.f32 %v9815_v17, %v9815_v17 }
 0x387   : > { %v5294_v11 = vadd.f32 %v5293_v62, %v5263_v1  ;;  %v9827_v62 = vsub.f32 %v9617_v48, %v9671_v33  ;;  %v5278_v26 = vmul.f32 %v9821_v13, %v9821_v13 }
 0x389   : > { %v5295_v56 = vadd.f32 %v5294_v11, %v5264_v10  ;;  %v9833_v11 = vsub.f32 %v9624_v60, %v9671_v33  ;;  %v5251_v60 = vsub.f32 %v9633_v3, %v9671_v33 }
 0x38b   : > { %v5296_v39 = vadd.f32 %v5295_v56, %v5265_v2  ;;  %v5249_v56 = vsub.f32 %v9636_v50, %v9671_v33 }
 0x38d   : > { %v5297_v27 = vadd.f32 %v5296_v39, %v5266_v28  ;;  %v5279_v28 = vmul.f32 %v9827_v62, %v9827_v62  ;;  %v5250_v39 = vsub.f32 %v9644_v25, %v9671_v33 }
 0x38f   : > { %v5298_v52 = vadd.f32 %v5297_v27, %v5267_v42  ;;  %v5280_v42 = vmul.f32 %v9833_v11, %v9833_v11  ;;  %v5282_v50 = vmul.f32 %v5250_v39, %v5250_v39 }
 0x391   : > { %v5299_v58 = vadd.f32 %v5298_v52, %v5268_v23  ;;  %v5281_v23 = vmul.f32 %v5249_v56, %v5249_v56 }
 0x393   : > { %v5300_v46 = vadd.f32 %v5299_v58, %v5269_v36  ;;  %v5252_v36 = vsub.f32 %v9640_v15, %v9671_v33  ;;  %v5395_v15 = vld [vmem:[%s10030_s3] sm:$0x1] }
 0x395   : > { %v5301_v53 = vadd.f32 %v5300_v46, %v5270_v43  ;;  %v5283_v43 = vmul.f32 %v5251_v60, %v5251_v60 }
 0x397   : > { %v5302_v7 = vadd.f32 %v5301_v53, %v5271_v29  ;;  %v5284_v29 = vmul.f32 %v5252_v36, %v5252_v36 }
 0x399   : > { %v5303_v44 = vadd.f32 %v5302_v7, %v5272_v12 }
 0x39b   : > { %v5304_v47 = vadd.f32 %v5303_v44, %v5273_v37 }
 0x39d   : > { %v5305_v0 = vadd.f32 %v5304_v47, %v5274_v4 }
 0x39f   : > { %v5306_v1 = vadd.f32 %v5305_v0, %v5275_v34 }
 0x3a1   : > { %v5307_v10 = vadd.f32 %v5306_v1, %v5276_v21 }
 0x3a3   : > { %v5308_v2 = vadd.f32 %v5307_v10, %v5277_v35 }
 0x3a5   : > { %v5309_v48 = vadd.f32 %v5308_v2, %v5278_v26 }
 0x3a7   : > { %v5310_v27 = vadd.f32 %v5309_v48, %v5279_v28 }
 0x3a9   : > { %v5311_v52 = vadd.f32 %v5310_v27, %v5280_v42 }
 0x3ab   : > { %v5312_v58 = vadd.f32 %v5311_v52, %v5281_v23 }
 0x3ad   : > { %v5313_v46 = vadd.f32 %v5312_v58, %v5282_v50 }
 0x3af   : > { %v5314_v53 = vadd.f32 %v5313_v46, %v5283_v43 }
 0x3b1   : > { %v5315_v12 = vadd.f32 %v5314_v53, %v5284_v29 }
 0x3b3   : > { %v5316_v25 = vrot.slane %v5315_v12, 4 }
 0x3b5   : > { %v5317_v7 = vadd.f32 %v5316_v25, %v5315_v12 }
 0x3b7   : > { %v5318_v37 = vrot.slane %v5317_v7, 2 }
 0x3b9   : > { %v5319_v44 = vadd.f32 %v5318_v37, %v5317_v7 }
 0x3bb   : > { %v5320_v4 = vrot.slane %v5319_v44, 1 }
 0x3bd   : > { %v5321_v47 = vadd.f32 %v5320_v4, %v5319_v44 }
 0x3bf   : > { %6949 = vmatmul.mubr.f32.vlgmr.msra.gmra.mrb[34].mxu1 %v5321_v47 }
 0x492   : > { %v5388_v3 = vpop.f32.mrb[34].mxu1 }
 0x493   : > { %v5392_v34 = vmul.f32 0.0009765625, %v5388_v3  ;;  %v6950_v0 = vpop.f32.mrb[35].mxu1 }
 0x495   : > { %v5393_v21 = vadd.f32 1e-05, %v5392_v34 }
 0x497   : > { %7400 = vrsqrt.f32 %v5393_v21 }
 0x4a1   : > { %v7401_v33 = vpop.eup %7400 }
 0x4a2   : > { %v5396_v1 = vmul.f32 %v7401_v33, %v5395_v15 }
 0x4a4   : > { %v5400_v35 = vrot.slane %v5396_v1, %v5219_v32 }
 0x4a6   : > { %v5401_v10 = vmul.f32 %v5400_v35, %v9675_v22  ;;  %v5402_v26 = vmul.f32 %v5400_v35, %v9679_v16  ;;  %v5403_v2 = vmul.f32 %v5400_v35, %v9683_v6  ;;  %v5404_v28 = vmul.f32 %v5400_v35, %v9691_v41 }
 0x4a7   : > { %v5405_v48 = vmul.f32 %v5400_v35, %v9695_v31  ;;  %v5406_v42 = vmul.f32 %v5400_v35, %v9701_v20  ;;  %v5407_v27 = vmul.f32 %v5400_v35, %v9707_v63  ;;  %v5408_v23 = vmul.f32 %v5400_v35, %v9713_v5 }
 0x4a8   : > { %v5409_v52 = vmul.f32 %v5400_v35, %v9719_v55  ;;  %v5410_v30 = vmul.f32 %v5400_v35, %v9725_v54  ;;  %v5411_v32 = vmul.f32 %v5400_v35, %v9731_v38  ;;  %v5412_v22 = vmul.f32 %v5400_v35, %v9737_v51  ;;  %v6300_v54 = vld [vmem:[%s10031_s4] ss:$0 sm:$0xff] }
 0x4a9   : > { %v5413_v16 = vmul.f32 %v5400_v35, %v9743_v24  ;;  %v5414_v6 = vmul.f32 %v5400_v35, %v9749_v40  ;;  %v5415_v41 = vmul.f32 %v5400_v35, %v9755_v8  ;;  %v5416_v31 = vmul.f32 %v5400_v35, %v9761_v59 }
 0x4aa   : > { %v5417_v20 = vmul.f32 %v5400_v35, %v9767_v9  ;;  %v5418_v63 = vmul.f32 %v5400_v35, %v9773_v14  ;;  %v5419_v5 = vmul.f32 %v5400_v35, %v9779_v57  ;;  %v5420_v55 = vmul.f32 %v5400_v35, %v9785_v19 }
 0x4ab   : > { %v5421_v38 = vmul.f32 %v5400_v35, %v9791_v49  ;;  %v5422_v51 = vmul.f32 %v5400_v35, %v9797_v18  ;;  %v5423_v24 = vmul.f32 %v5400_v35, %v9803_v61  ;;  %v5424_v40 = vmul.f32 %v5400_v35, %v9809_v45 }
 0x4ac   : > { %v5425_v8 = vmul.f32 %v5400_v35, %v9815_v17  ;;  %v5426_v59 = vmul.f32 %v5400_v35, %v9821_v13  ;;  %v5427_v9 = vmul.f32 %v5400_v35, %v9827_v62  ;;  %v5428_v14 = vmul.f32 %v5400_v35, %v9833_v11 }
 0x4ad   : > { %v5429_v57 = vmul.f32 %v5400_v35, %v5249_v56  ;;  %v5430_v19 = vmul.f32 %v5400_v35, %v5250_v39  ;;  %v5431_v50 = vmul.f32 %v5400_v35, %v5251_v60  ;;  %v5432_v58 = vmul.f32 %v5400_v35, %v5252_v36 }
 0x4ae   : > { %v5440_v49 = vadd.f32 %v6300_v54, %v5401_v10  ;;  %v5441_v43 = vadd.f32 %v6300_v54, %v5402_v26  ;;  %v5442_v18 = vadd.f32 %v6300_v54, %v5403_v2  ;;  %v5443_v46 = vadd.f32 %v6300_v54, %v5404_v28 }
 0x4af   : > { %v5444_v61 = vadd.f32 %v6300_v54, %v5405_v48  ;;  %v5445_v45 = vadd.f32 %v6300_v54, %v5406_v42  ;;  %v5446_v29 = vadd.f32 %v6300_v54, %v5407_v27  ;;  %v5447_v17 = vadd.f32 %v6300_v54, %v5408_v23 }
 0x4b0   : > { %v5448_v53 = vadd.f32 %v6300_v54, %v5409_v52  ;;  %v5449_v13 = vadd.f32 %v6300_v54, %v5410_v30  ;;  %v5450_v12 = vadd.f32 %v6300_v54, %v5411_v32  ;;  %v5451_v62 = vadd.f32 %v6300_v54, %v5412_v22 }
 0x4b1   : > { %v5452_v25 = vadd.f32 %v6300_v54, %v5413_v16  ;;  %v5453_v11 = vadd.f32 %v6300_v54, %v5414_v6  ;;  %v5454_v56 = vadd.f32 %v6300_v54, %v5415_v41  ;;  %v5455_v39 = vadd.f32 %v6300_v54, %v5416_v31 }
 0x4b2   : > { %v9888_v60 = vadd.f32 %v6300_v54, %v5417_v20  ;;  %v9890_v36 = vadd.f32 %v6300_v54, %v5418_v63  ;;  %v9892_v7 = vadd.f32 %v6300_v54, %v5419_v5  ;;  %v9894_v37 = vadd.f32 %v6300_v54, %v5420_v55 }
 0x4b3   : > { %v9896_v44 = vadd.f32 %v6300_v54, %v5421_v38  ;;  %v9898_v4 = vadd.f32 %v6300_v54, %v5422_v51  ;;  %v9900_v47 = vadd.f32 %v6300_v54, %v5423_v24  ;;  %v9902_v3 = vadd.f32 %v6300_v54, %v5424_v40 }
 0x4b4   : > { %v9904_v34 = vadd.f32 %v6300_v54, %v5425_v8  ;;  %v9906_v0 = vadd.f32 %v6300_v54, %v5426_v59  ;;  %v9908_v21 = vadd.f32 %v6300_v54, %v5427_v9  ;;  %v9910_v15 = vadd.f32 %v6300_v54, %v5428_v14 }
 0x4b5   : > { %v9912_v33 = vadd.f32 %v6300_v54, %v5429_v57  ;;  %v9914_v1 = vadd.f32 %v6300_v54, %v5430_v19  ;;  %v9916_v35 = vadd.f32 %v6300_v54, %v5431_v50  ;;  %v9918_v10 = vadd.f32 %v6300_v54, %v5432_v58 }
 0x4b6   : > { %v5472_v26 = vmax.f32 %v5440_v49, 0.0  ;;  %v5473_v2 = vmax.f32 %v5441_v43, 0.0  ;;  %v5474_v28 = vmax.f32 %v5442_v18, 0.0  ;;  %v5475_v48 = vmax.f32 %v5443_v46, 0.0 }
 0x4b7   : > { %v5476_v42 = vmax.f32 %v5444_v61, 0.0  ;;  %v5477_v27 = vmax.f32 %v5445_v45, 0.0  ;;  %v5478_v23 = vmax.f32 %v5446_v29, 0.0  ;;  %v5479_v52 = vmax.f32 %v5447_v17, 0.0 }
 0x4b8   : > { %v5480_v30 = vmax.f32 %v5448_v53, 0.0  ;;  %v5481_v32 = vmax.f32 %v5449_v13, 0.0  ;;  %v5482_v22 = vmax.f32 %v5450_v12, 0.0  ;;  %v5483_v16 = vmax.f32 %v5451_v62, 0.0  ;;  %5504 = vst [vmem:[%s9920_s7] sm:$0xff] %v5472_v26  ;;  %5505 = vst [vmem:[%s9920_s7 + $0x8] sm:$0xff] %v5473_v2 }
 0x4b9   : > { %5506 = vst [vmem:[%s9920_s7 + $0x10] sm:$0xff] %v5474_v28  ;;  %5507 = vst [vmem:[%s9920_s7 + $0x18] sm:$0xff] %v5475_v48  ;;  %v5484_v6 = vmax.f32 %v5452_v25, 0.0  ;;  %v5485_v41 = vmax.f32 %v5453_v11, 0.0  ;;  %v5486_v31 = vmax.f32 %v5454_v56, 0.0  ;;  %v5487_v20 = vmax.f32 %v5455_v39, 0.0 }
 0x4ba   : > { %5508 = vst [vmem:[%s9920_s7 + $0x20] sm:$0xff] %v5476_v42  ;;  %5509 = vst [vmem:[%s9920_s7 + $0x28] sm:$0xff] %v5477_v27  ;;  %v5488_v63 = vmax.f32 %v9888_v60, 0.0  ;;  %v5489_v5 = vmax.f32 %v9890_v36, 0.0  ;;  %v5490_v55 = vmax.f32 %v9892_v7, 0.0  ;;  %v5491_v54 = vmax.f32 %v9894_v37, 0.0 }
 0x4bb   : > { %5510 = vst [vmem:[%s9920_s7 + $0x30] sm:$0xff] %v5478_v23  ;;  %5511 = vst [vmem:[%s9920_s7 + $0x38] sm:$0xff] %v5479_v52  ;;  %v5492_v38 = vmax.f32 %v9896_v44, 0.0  ;;  %v5493_v51 = vmax.f32 %v9898_v4, 0.0  ;;  %v5494_v24 = vmax.f32 %v9900_v47, 0.0  ;;  %v5495_v40 = vmax.f32 %v9902_v3, 0.0 }
 0x4bc   : > { %5512 = vst [vmem:[%s9920_s7 + $0x40] sm:$0xff] %v5480_v30  ;;  %5513 = vst [vmem:[%s9920_s7 + $0x48] sm:$0xff] %v5481_v32  ;;  %v5496_v8 = vmax.f32 %v9904_v34, 0.0  ;;  %v5497_v59 = vmax.f32 %v9906_v0, 0.0  ;;  %v5498_v9 = vmax.f32 %v9908_v21, 0.0  ;;  %v5499_v14 = vmax.f32 %v9910_v15, 0.0 }
 0x4bd   : > { %5514 = vst [vmem:[%s9920_s7 + $0x50] sm:$0xff] %v5482_v22  ;;  %5515 = vst [vmem:[%s9920_s7 + $0x58] sm:$0xff] %v5483_v16  ;;  %v5500_v57 = vmax.f32 %v9912_v33, 0.0  ;;  %v5501_v19 = vmax.f32 %v9914_v1, 0.0  ;;  %v5502_v50 = vmax.f32 %v9916_v35, 0.0  ;;  %v5503_v58 = vmax.f32 %v9918_v10, 0.0 }
 0x4be   : > { %5516 = vst [vmem:[%s9920_s7 + $0x60] sm:$0xff] %v5484_v6  ;;  %5517 = vst [vmem:[%s9920_s7 + $0x68] sm:$0xff] %v5485_v41 }
 0x4bf   : > { %5518 = vst [vmem:[%s9920_s7 + $0x70] sm:$0xff] %v5486_v31  ;;  %5519 = vst [vmem:[%s9920_s7 + $0x78] sm:$0xff] %v5487_v20 }
 0x4c0   : > { %5520 = vst [vmem:[%s9920_s7 + $0x80] sm:$0xff] %v5488_v63  ;;  %5521 = vst [vmem:[%s9920_s7 + $0x88] sm:$0xff] %v5489_v5 }
 0x4c1   : > { %5522 = vst [vmem:[%s9920_s7 + $0x90] sm:$0xff] %v5490_v55  ;;  %5523 = vst [vmem:[%s9920_s7 + $0x98] sm:$0xff] %v5491_v54 }
 0x4c2   : > { %5524 = vst [vmem:[%s9920_s7 + $0xa0] sm:$0xff] %v5492_v38  ;;  %5525 = vst [vmem:[%s9920_s7 + $0xa8] sm:$0xff] %v5493_v51 }
 0x4c3   : > { %5526 = vst [vmem:[%s9920_s7 + $0xb0] sm:$0xff] %v5494_v24  ;;  %5527 = vst [vmem:[%s9920_s7 + $0xb8] sm:$0xff] %v5495_v40 }
 0x4c4   : > { %5528 = vst [vmem:[%s9920_s7 + $0xc0] sm:$0xff] %v5496_v8  ;;  %5529 = vst [vmem:[%s9920_s7 + $0xc8] sm:$0xff] %v5497_v59 }
 0x4c5   : > { %5530 = vst [vmem:[%s9920_s7 + $0xd0] sm:$0xff] %v5498_v9  ;;  %5531 = vst [vmem:[%s9920_s7 + $0xd8] sm:$0xff] %v5499_v14 }
 0x4c6   : > { %5532 = vst [vmem:[%s9920_s7 + $0xe0] sm:$0xff] %v5500_v57  ;;  %5533 = vst [vmem:[%s9920_s7 + $0xe8] sm:$0xff] %v5501_v19 }
 0x4c7   : > { %5534 = vst [vmem:[%s9920_s7 + $0xf0] sm:$0xff] %v5502_v50  ;;  %5535 = vst [vmem:[%s9920_s7 + $0xf8] sm:$0xff] %v5503_v58 }
 0x4c8   : > { %7477 = shalt.err (!%p7474_p5)
}
 0x4c9   : > { %s7478_s17 = scalar_lea.hbm %s9959_s12, 4096  ;;  %s7482_s27 = scalar_lea.hbm %s10032_s5, 8192 }
 0x4ca   : > { %p7479_p6 = scmp.ne.s32.totalorder %s9959_s12, %s7478_s17  ;;  %p7483_p10 = scmp.lt.u32.totalorder %s9959_s12, %s10032_s5 }
 0x4cb   : > { %p7484_p11 = scmp.lt.u32.totalorder %s7482_s27, %s7478_s17  ;;  %p7486_p13 = scmp.lt.u32.totalorder %s7478_s17, %s9959_s12 }
 0x4cc   : > { %p7480_p7 = pnand %p7479_p6, %p7620_p4 }
 0x4cd   : > { %p7485_p12 = por %p7484_p11, %p7483_p10 }
 0x4ce   : > { %p7481_p9 = pneg %p7480_p7 }
 0x4cf   : > { %p7487_p0 = por %p7486_p13, %p7485_p12 }
 0x4d1   : > { %p7488_p1 = pnand %p7487_p0, %p7481_p9 }
 0x4d3   : > { %7491 = shalt.err (!%p7488_p1)
}
 0x4d4   : > { %s7548_s8 = smov 128   ;;  %s7549_s21 = smov 8  }
 0x4d5   : > { %7256 = dma.vmem_to_hbm [thread:$0]  (%p7620_p4), %s9961_s9, 4096, %s9959_s12, %s9981_s13, %s7548_s8, %s7548_s8, %s7549_s21  }
 0x4d6 PF: > { %p7262_p2 = scmp.ge.s32.totalorder %s7542_s23, 2  ;;  %s5566_s11 = sand.u32 1, %s7522_s18  }
 0x4d7   : > { %s5567_s14 = scalar_lea.sflag [#allocation3], %s5566_s11 }
 0x4d8   : > { %p7259_p3 = pnand %p7262_p2, %p7627_p8 }
 0x4da   : > { %7517 = dma.done.wait (!%p7259_p3), %s5567_s14, 4096  }
 0x4db   : > { %7519 = vsyncadd (!%p7259_p3), %s5567_s14, 4294963200  ;;  %s18_s23 = sadd.s32 1, %s7542_s23   ;;  %s10110_s18 = smov %s7526_s19 }
 0x4dc   : > { %p15_p5 = scmp.ge.s32.totalorder %s18_s23, 4   ;;  %s10111_s19 = smov %s7530_s20 }
 0x4dd   : > { %s10112_s20 = smov %s7633_s6  ;;  %s10113_s21 = smov %s7538_s22 }
 0x4de   : > { %s10114_s22 = smov %s10116_s26  ;;  %17 = sbr.rel (!%p15_p5) target bundleno = 4 (0x4), region = 94 }
 0x4e5   :  { %5572 = vsyncpa [#allocation3], 1 }
 0x4e6   :  { %5574 = vsyncpa [#allocation3 + $0x1], 1 }

</bundles_post_ra>
